<compile_context>
chip_gen: v5e
topology: v5e:2x2
jax: 0.10.0
libtpu: 0.0.40
codegen_flags: <defaults>
</compile_context>

<pallas_src>
import functools
import math

import numpy as np
import jax
import jax.numpy as jnp
from jax.experimental import pallas as pl
from jax.experimental.pallas import tpu as pltpu

_PARALLEL1 = pltpu.CompilerParams(dimension_semantics=("parallel",))


def _mm(a, b):
    """MXU matmul: bf16 operands, f32 accumulation."""
    return jnp.dot(a.astype(jnp.bfloat16), b.astype(jnp.bfloat16),
                   preferred_element_type=jnp.float32)


# ----------------------------------------------------------------------------
# Constant time-mixing matrices (built once per (L, k) at trace time)
# ----------------------------------------------------------------------------
@functools.lru_cache(maxsize=None)
def _decomp_matrix_np(L, k):
    """W so that (W @ x) == AvgPool1d(k, stride=1) over x replicate-padded by (k-1)//2."""
    pad = (k - 1) // 2
    W = np.zeros((L, L), np.float32)
    for t in range(L):
        for i in range(k):
            s = min(max(t - pad + i, 0), L - 1)
            W[t, s] += 1.0 / k
    return W


def _decomp_matrix_j(L, k):
    return jnp.asarray(_decomp_matrix_np(L, k))


@functools.lru_cache(maxsize=None)
def _shift_matrices_np(L):
    """S[0] @ x -> x[t-1 mod L]  (circular), S[1] @ x -> x[t+1 mod L]."""
    s_prev = np.zeros((L, L), np.float32)
    s_next = np.zeros((L, L), np.float32)
    for t in range(L):
        s_prev[t, (t - 1) % L] = 1.0
        s_next[t, (t + 1) % L] = 1.0
    return np.stack([s_prev, s_next])


def _shift_matrices_j(L):
    return jnp.asarray(_shift_matrices_np(L))


# ----------------------------------------------------------------------------
# Pallas kernels
# ----------------------------------------------------------------------------
def _linear_kernel(*refs, relu, has_bias):
    if has_bias:
        x_ref, w_ref, b_ref, o_ref = refs
    else:
        x_ref, w_ref, o_ref = refs
    acc = jnp.dot(x_ref[...], w_ref[...], preferred_element_type=jnp.float32)
    if has_bias:
        acc = acc + b_ref[...]
    if relu:
        acc = jnp.maximum(acc, 0.0)
    o_ref[...] = acc


def _round_up(v, m):
    return ((v + m - 1) // m) * m


def _pick_tm(M):
    """Row-tile: multiple of 8, split into >=2 tiles when possible (megacore), cap 256."""
    if M > 512:
        return 256
    half = _round_up(-(-M // 2), 8)
    if half >= M:
        return M            # single block equal to full dim (always legal)
    return half


def pallas_linear(x, w, b=None, relu=False):
    """x: (..., K) @ w: (K, N) (+ b) -> (..., N); rows tiled, bf16 MXU inputs."""
    K, N = w.shape
    lead = x.shape[:-1]
    x2 = x.reshape(-1, K).astype(jnp.bfloat16)
    M = x2.shape[0]
    tm = _pick_tm(M)
    grid_m = pl.cdiv(M, tm)
    has_bias = b is not None
    in_specs = [pl.BlockSpec((tm, K), lambda i: (i, 0)),
                pl.BlockSpec((K, N), lambda i: (0, 0))]
    args = [x2, w.astype(jnp.bfloat16)]
    if has_bias:
        in_specs.append(pl.BlockSpec((1, N), lambda i: (0, 0)))
        args.append(b.reshape(1, N).astype(jnp.float32))
    out = pl.pallas_call(
        functools.partial(_linear_kernel, relu=relu, has_bias=has_bias),
        grid=(grid_m,),
        in_specs=in_specs,
        out_specs=pl.BlockSpec((tm, N), lambda i: (i, 0)),
        out_shape=jax.ShapeDtypeStruct((M, N), jnp.float32),
        compiler_params=_PARALLEL1,
    )(*args)
    return out.reshape(lead + (N,))


def _embed_kernel(x_ref, mk_ref, s_ref, cw_ref, tw_ref, o_ref):
    # TokenEmbedding (circular conv k=3, no bias) + TimeFeatureEmbedding (linear, no bias)
    x = x_ref[0]                                                     # (L, Df)
    mk = mk_ref[0]                                                   # (L, Dm)
    xm1 = jnp.dot(s_ref[0], x, preferred_element_type=jnp.float32)   # x[t-1]
    xp1 = jnp.dot(s_ref[1], x, preferred_element_type=jnp.float32)   # x[t+1]
    val = _mm(xm1, cw_ref[0]) + _mm(x, cw_ref[1]) + _mm(xp1, cw_ref[2])
    o_ref[0] = val + _mm(mk, tw_ref[...])


def pallas_data_embedding(x, x_mark, p):
    B, L, Df = x.shape
    Dm = x_mark.shape[-1]
    Dmod = p['temp_w'].shape[-1]
    S = _shift_matrices_j(L)
    return pl.pallas_call(
        _embed_kernel,
        grid=(B,),
        in_specs=[pl.BlockSpec((1, L, Df), lambda b: (b, 0, 0)),
                  pl.BlockSpec((1, L, Dm), lambda b: (b, 0, 0)),
                  pl.BlockSpec((2, L, L), lambda b: (0, 0, 0)),
                  pl.BlockSpec((3, Df, Dmod), lambda b: (0, 0, 0)),
                  pl.BlockSpec((Dm, Dmod), lambda b: (0, 0))],
        out_specs=pl.BlockSpec((1, L, Dmod), lambda b: (b, 0, 0)),
        out_shape=jax.ShapeDtypeStruct((B, L, Dmod), jnp.float32),
        compiler_params=_PARALLEL1,
    )(x.astype(jnp.float32), x_mark.astype(jnp.float32), S,
      p['conv_w'].astype(jnp.bfloat16), p['temp_w'].astype(jnp.bfloat16))


def _decomp_kernel(x_ref, dm_ref, so_ref, to_ref):
    x = x_ref[0]
    trend = jnp.dot(dm_ref[...], x, preferred_element_type=jnp.float32)
    so_ref[0] = x - trend
    to_ref[0] = trend


def pallas_series_decomp(x, kernel_size):
    """Returns (season, trend); trend = moving average via MXU banded matmul."""
    B, L, D = x.shape
    dm = _decomp_matrix_j(L, kernel_size)
    season, trend = pl.pallas_call(
        _decomp_kernel,
        grid=(B,),
        in_specs=[pl.BlockSpec((1, L, D), lambda b: (b, 0, 0)),
                  pl.BlockSpec((L, L), lambda b: (0, 0))],
        out_specs=(pl.BlockSpec((1, L, D), lambda b: (b, 0, 0)),
                   pl.BlockSpec((1, L, D), lambda b: (b, 0, 0))),
        out_shape=(jax.ShapeDtypeStruct((B, L, D), jnp.float32),
                   jax.ShapeDtypeStruct((B, L, D), jnp.float32)),
        compiler_params=_PARALLEL1,
    )(x.astype(jnp.float32), dm)
    return season, trend


def _proj_add_decomp_kernel(a_ref, x_ref, w_ref, b_ref, dm_ref, so_ref, to_ref):
    # season, trend = decomp(x + attn_out @ Wo + bo)
    v = x_ref[0] + _mm(a_ref[0], w_ref[...]) + b_ref[...]
    trend = jnp.dot(dm_ref[...], v, preferred_element_type=jnp.float32)
    so_ref[0] = v - trend
    to_ref[0] = trend


def pallas_proj_add_decomp(a, x, wo, bo, dm):
    B, L, D = x.shape
    block = lambda: pl.BlockSpec((1, L, D), lambda b: (b, 0, 0))
    oshape = jax.ShapeDtypeStruct((B, L, D), jnp.float32)
    return pl.pallas_call(
        _proj_add_decomp_kernel,
        grid=(B,),
        in_specs=[block(), block(),
                  pl.BlockSpec((D, D), lambda b: (0, 0)),
                  pl.BlockSpec((1, D), lambda b: (0, 0)),
                  pl.BlockSpec((L, L), lambda b: (0, 0))],
        out_specs=(block(), block()),
        out_shape=(oshape, oshape),
        compiler_params=_PARALLEL1,
    )(a, x, wo.astype(jnp.bfloat16), bo.reshape(1, D).astype(jnp.float32), dm)


def _enc_layer_post_kernel(a_ref, x_ref, wo_ref, bo_ref, w1_ref, w2_ref, dm_ref, o_ref):
    # season2 = decomp( decomp(x + a@Wo + bo) + conv2(relu(conv1(.))) )
    # -- everything (incl. d_ff intermediate and first season) stays in VMEM.
    dm = dm_ref[...]
    v = x_ref[0] + _mm(a_ref[0], wo_ref[...]) + bo_ref[...]
    s = v - jnp.dot(dm, v, preferred_element_type=jnp.float32)
    h = jnp.maximum(_mm(s, w1_ref[...]), 0.0)
    v2 = s + _mm(h, w2_ref[...])
    o_ref[0] = v2 - jnp.dot(dm, v2, preferred_element_type=jnp.float32)


def pallas_enc_layer_post(a, x, wo, bo, w1, w2, dm):
    B, L, D = x.shape
    F = w1.shape[-1]
    block = lambda: pl.BlockSpec((1, L, D), lambda b: (b, 0, 0))
    return pl.pallas_call(
        _enc_layer_post_kernel,
        grid=(B,),
        in_specs=[block(), block(),
                  pl.BlockSpec((D, D), lambda b: (0, 0)),
                  pl.BlockSpec((1, D), lambda b: (0, 0)),
                  pl.BlockSpec((D, F), lambda b: (0, 0)),
                  pl.BlockSpec((F, D), lambda b: (0, 0)),
                  pl.BlockSpec((L, L), lambda b: (0, 0))],
        out_specs=block(),
        out_shape=jax.ShapeDtypeStruct((B, L, D), jnp.float32),
        compiler_params=_PARALLEL1,
    )(a, x, wo.astype(jnp.bfloat16), bo.reshape(1, D).astype(jnp.float32),
      w1.astype(jnp.bfloat16), w2.astype(jnp.bfloat16), dm)


def _dec_layer_post_kernel(a_ref, x_ref, wo_ref, bo_ref, w1_ref, w2_ref, dm_ref,
                           t1_ref, base_ref, sh_ref, tw_ref, so_ref, tr_ref):
    # Fused decoder tail (after cross attention):
    #   v  = x + a@Wo + bo ; t2 = MA(v)  ; s = v - t2
    #   v2 = s + conv2(relu(conv1(s)))   ; t3 = MA(v2) ; season = v2 - t3
    #   residual_trend = t1 + t2 + t3
    #   trend_out = base + CircularConv3(residual_trend) @ Wt   (d_model -> c_out)
    dm = dm_ref[...]
    v = x_ref[0] + _mm(a_ref[0], wo_ref[...]) + bo_ref[...]
    t2 = jnp.dot(dm, v, preferred_element_type=jnp.float32)
    s = v - t2
    h = jnp.maximum(_mm(s, w1_ref[...]), 0.0)
    v2 = s + _mm(h, w2_ref[...])
    t3 = jnp.dot(dm, v2, preferred_element_type=jnp.float32)
    so_ref[0] = v2 - t3
    t = t1_ref[0] + t2 + t3
    tm1 = jnp.dot(sh_ref[0], t, preferred_element_type=jnp.float32)
    tp1 = jnp.dot(sh_ref[1], t, preferred_element_type=jnp.float32)
    conv = _mm(tm1, tw_ref[0]) + _mm(t, tw_ref[1]) + _mm(tp1, tw_ref[2])
    tr_ref[0] = base_ref[0] + conv


def pallas_dec_layer_post(a, x, wo, bo, w1, w2, dm, t1, base, trend_w):
    B, L, D = x.shape
    F = w1.shape[-1]
    C = trend_w.shape[-1]
    S = _shift_matrices_j(L)
    dblock = lambda: pl.BlockSpec((1, L, D), lambda b: (b, 0, 0))
    cblock = lambda: pl.BlockSpec((1, L, C), lambda b: (b, 0, 0))
    return pl.pallas_call(
        _dec_layer_post_kernel,
        grid=(B,),
        in_specs=[dblock(), dblock(),
                  pl.BlockSpec((D, D), lambda b: (0, 0)),
                  pl.BlockSpec((1, D), lambda b: (0, 0)),
                  pl.BlockSpec((D, F), lambda b: (0, 0)),
                  pl.BlockSpec((F, D), lambda b: (0, 0)),
                  pl.BlockSpec((L, L), lambda b: (0, 0)),
                  dblock(), cblock(),
                  pl.BlockSpec((2, L, L), lambda b: (0, 0, 0)),
                  pl.BlockSpec((3, D, C), lambda b: (0, 0, 0))],
        out_specs=(dblock(), cblock()),
        out_shape=(jax.ShapeDtypeStruct((B, L, D), jnp.float32),
                   jax.ShapeDtypeStruct((B, L, C), jnp.float32)),
        compiler_params=_PARALLEL1,
    )(a, x, wo.astype(jnp.bfloat16), bo.reshape(1, D).astype(jnp.float32),
      w1.astype(jnp.bfloat16), w2.astype(jnp.bfloat16), dm,
      t1, base.astype(jnp.float32), S, trend_w.astype(jnp.bfloat16))


def _my_layernorm_kernel(x_ref, g_ref, b_ref, o_ref):
    x = x_ref[0]
    mean = jnp.mean(x, axis=-1, keepdims=True)
    var = jnp.mean(jnp.square(x - mean), axis=-1, keepdims=True)
    xhat = (x - mean) * jax.lax.rsqrt(var + 1e-5) * g_ref[...] + b_ref[...]
    o_ref[0] = xhat - jnp.mean(xhat, axis=0, keepdims=True)   # subtract temporal mean


def pallas_my_layernorm(x, gamma, beta):
    B, L, D = x.shape
    return pl.pallas_call(
        _my_layernorm_kernel,
        grid=(B,),
        in_specs=[pl.BlockSpec((1, L, D), lambda b: (b, 0, 0)),
                  pl.BlockSpec((1, D), lambda b: (0, 0)),
                  pl.BlockSpec((1, D), lambda b: (0, 0))],
        out_specs=pl.BlockSpec((1, L, D), lambda b: (b, 0, 0)),
        out_shape=jax.ShapeDtypeStruct((B, L, D), jnp.float32),
        compiler_params=_PARALLEL1,
    )(x, gamma.reshape(1, D).astype(jnp.float32), beta.reshape(1, D).astype(jnp.float32))


def _final_kernel(x_ref, g_ref, b_ref, pw_ref, pb_ref, tr_ref, o_ref):
    # decoder epilogue: my_Layernorm -> Linear(d_model, c_out) -> + trend
    x = x_ref[0]
    mean = jnp.mean(x, axis=-1, keepdims=True)
    var = jnp.mean(jnp.square(x - mean), axis=-1, keepdims=True)
    xhat = (x - mean) * jax.lax.rsqrt(var + 1e-5) * g_ref[...] + b_ref[...]
    xhat = xhat - jnp.mean(xhat, axis=0, keepdims=True)
    o_ref[0] = _mm(xhat, pw_ref[...]) + pb_ref[...] + tr_ref[0]


def pallas_final(x, gamma, beta, proj_w, proj_b, trend):
    B, L, D = x.shape
    C = proj_w.shape[-1]
    return pl.pallas_call(
        _final_kernel,
        grid=(B,),
        in_specs=[pl.BlockSpec((1, L, D), lambda b: (b, 0, 0)),
                  pl.BlockSpec((1, D), lambda b: (0, 0)),
                  pl.BlockSpec((1, D), lambda b: (0, 0)),
                  pl.BlockSpec((D, C), lambda b: (0, 0)),
                  pl.BlockSpec((1, C), lambda b: (0, 0)),
                  pl.BlockSpec((1, L, C), lambda b: (b, 0, 0))],
        out_specs=pl.BlockSpec((1, L, C), lambda b: (b, 0, 0)),
        out_shape=jax.ShapeDtypeStruct((B, L, C), jnp.float32),
        compiler_params=_PARALLEL1,
    )(x, gamma.reshape(1, D).astype(jnp.float32), beta.reshape(1, D).astype(jnp.float32),
      proj_w.astype(jnp.bfloat16), proj_b.reshape(1, C).astype(jnp.float32),
      trend.astype(jnp.float32))


# ----------------------------------------------------------------------------
# AutoCorrelation (plain JAX: FFT / top-k; periodic aggregation via one-hot matmul)
# ----------------------------------------------------------------------------
def auto_correlation(q, k, v, factor):
    # TODO(synk): rfft/irfft and top_k have no clean Pallas equivalent on TPU;
    #             this block stays in plain JAX (XLA FFT / top_k).
    B, L, H, E = q.shape
    S = v.shape[1]
    if L > S:
        pad = jnp.zeros((B, L - S, H, E), q.dtype)
        v = jnp.concatenate([v, pad], axis=1)
        k = jnp.concatenate([k, pad], axis=1)
    else:
        v = v[:, :L]
        k = k[:, :L]
    q_ = jnp.transpose(q, (0, 2, 3, 1))  # (B,H,E,L)
    k_ = jnp.transpose(k, (0, 2, 3, 1))
    v_ = jnp.transpose(v, (0, 2, 3, 1))
    q_fft = jnp.fft.rfft(q_, axis=-1)
    k_fft = jnp.fft.rfft(k_, axis=-1)
    corr = jnp.fft.irfft(q_fft * jnp.conj(k_fft), n=L, axis=-1)  # (B,H,E,L)

    top_k = max(1, int(factor * math.log(L)))
    mean_value = jnp.mean(corr, axis=(1, 2))                     # (B, L)
    weights, delay = jax.lax.top_k(mean_value, top_k)            # (B, top_k)
    tmp_corr = jax.nn.softmax(weights, axis=-1)                  # (B, top_k)

    # delays_agg[b,h,e,l] = sum_k w[b,k] * v_[b,h,e,(l+delay[b,k]) % L]
    # expressed as a per-batch (L,L) mixing matrix -> one batched matmul instead of
    # an unrolled top_k gather loop.
    idx = jnp.arange(L)
    tgt = (idx[None, None, :] + delay[:, :, None]) % L           # (B, K, L)
    onehot = jax.nn.one_hot(tgt, L, dtype=jnp.float32)           # (B, K, L, L)
    mix = jnp.einsum('bk,bkls->bls', tmp_corr, onehot)           # (B, L, L)
    delays_agg = jnp.einsum('bhes,bls->bhel', v_, mix)           # (B, H, E, L)
    return jnp.transpose(delays_agg, (0, 3, 1, 2))               # (B, L, H, E)


def self_attention_block(p, x, n_heads, factor):
    """Fused QKV projection + AutoCorrelation. Output projection is fused into the
    following per-layer kernel."""
    B, L, D = x.shape
    qkv = pallas_linear(x, p['w_qkv'], p['b_qkv'])
    q = qkv[..., :D].reshape(B, L, n_heads, -1)
    k = qkv[..., D:2 * D].reshape(B, L, n_heads, -1)
    v = qkv[..., 2 * D:].reshape(B, L, n_heads, -1)
    return auto_correlation(q, k, v, factor).reshape(B, L, D)


def cross_attention_block(p, x, cross, n_heads, factor):
    B, L, D = x.shape
    S = cross.shape[1]
    q = pallas_linear(x, p['wq'], p['bq']).reshape(B, L, n_heads, -1)
    kv = pallas_linear(cross, p['w_kv'], p['b_kv'])
    k = kv[..., :D].reshape(B, S, n_heads, -1)
    v = kv[..., D:].reshape(B, S, n_heads, -1)
    return auto_correlation(q, k, v, factor).reshape(B, L, D)


# ----------------------------------------------------------------------------
# Encoder / Decoder
# ----------------------------------------------------------------------------
def encoder_layer(x, p, dm, n_heads, factor):
    a = self_attention_block(p['attn'], x, n_heads, factor)
    return pallas_enc_layer_post(a, x, p['attn']['wo'], p['attn']['bo'],
                                 p['conv1_w'], p['conv2_w'], dm)


def run_encoder(enc_x, enc_mark, params, cfg):
    dm = _decomp_matrix_j(enc_x.shape[1], cfg['mov_avg'])
    x = pallas_data_embedding(enc_x, enc_mark, params['enc_embed'])
    for lp in params['enc_layers']:
        x = encoder_layer(x, lp, dm, cfg['n_heads'], cfg['factor'])
    return pallas_my_layernorm(x, params['enc_norm_g'], params['enc_norm_b'])


def decoder_layer(x, cross, trend, p, dm, n_heads, factor):
    a = self_attention_block(p['self_attn'], x, n_heads, factor)
    x, t1 = pallas_proj_add_decomp(a, x, p['self_attn']['wo'], p['self_attn']['bo'], dm)
    a = cross_attention_block(p['cross_attn'], x, cross, n_heads, factor)
    x, trend = pallas_dec_layer_post(a, x, p['cross_attn']['wo'], p['cross_attn']['bo'],
                                     p['conv1_w'], p['conv2_w'], dm,
                                     t1, trend, p['trend_w'])
    return x, trend


def run_decoder(season, trend, dec_mark, enc_out, params, cfg):
    dm = _decomp_matrix_j(season.shape[1], cfg['mov_avg'])
    x = pallas_data_embedding(season, dec_mark, params['dec_embed'])
    for lp in params['dec_layers']:
        x, trend = decoder_layer(x, enc_out, trend, lp, dm, cfg['n_heads'], cfg['factor'])
    return pallas_final(x, params['dec_norm_g'], params['dec_norm_b'],
                        params['dec_proj_w'], params['dec_proj_b'], trend)


def autoformer_forward(params, enc_x, enc_mark, y, y_mark, *, cfg):
    pred_len, label_len = cfg['pred_len'], cfg['label_len']
    dec_inp = jnp.zeros_like(y[:, -pred_len:, :])
    dec_x = jnp.concatenate([y[:, :label_len, :], dec_inp], axis=1).astype(jnp.float32)
    dec_mark = y_mark

    enc_out = run_encoder(enc_x, enc_mark, params, cfg)

    mean = jnp.repeat(jnp.mean(enc_x, axis=1, keepdims=True), pred_len, axis=1)
    zeros = jnp.zeros((dec_x.shape[0], pred_len, dec_x.shape[2]), jnp.float32)
    season_part, trend_part = pallas_series_decomp(dec_x[:, :-pred_len, :], cfg['mov_avg'])
    trend = jnp.concatenate([trend_part, mean], axis=1)
    season = jnp.concatenate([season_part, zeros], axis=1)

    dec_out = run_decoder(season, trend, dec_mark, enc_out, params, cfg)
    return dec_out[:, -pred_len:, :]


# ----------------------------------------------------------------------------
# Deterministic parameter initialization (synthetic weights)
# ----------------------------------------------------------------------------
def init_autoformer(key, cfg):
    d_model, d_ff = cfg['d_model'], cfg['d_ff']
    d_feature, d_mark = cfg['d_feature'], cfg['d_mark']
    keys = iter(jax.random.split(key, 512))

    def w(shape):
        return 0.02 * jax.random.normal(next(keys), shape, jnp.float32)

    def init_embed():
        return {'conv_w': w((3, d_feature, d_model)),     # TokenEmbedding (k=3 circular, no bias)
                'temp_w': w((d_mark, d_model))}            # TimeFeatureEmbedding (no bias)

    def init_self_attn():
        return {'w_qkv': w((d_model, 3 * d_model)), 'b_qkv': w((3 * d_model,)),
                'wo': w((d_model, d_model)), 'bo': w((d_model,))}

    def init_cross_attn():
        return {'wq': w((d_model, d_model)), 'bq': w((d_model,)),
                'w_kv': w((d_model, 2 * d_model)), 'b_kv': w((2 * d_model,)),
                'wo': w((d_model, d_model)), 'bo': w((d_model,))}

    enc_layers = [{'attn': init_self_attn(),
                   'conv1_w': w((d_model, d_ff)),
                   'conv2_w': w((d_ff, d_model))}
                  for _ in range(cfg['e_layers'])]
    dec_layers = [{'self_attn': init_self_attn(),
                   'cross_attn': init_cross_attn(),
                   'conv1_w': w((d_model, d_ff)),
                   'conv2_w': w((d_ff, d_model)),
                   'trend_w': w((3, d_model, d_feature))}
                  for _ in range(cfg['d_layers'])]

    return {
        'enc_embed': init_embed(),
        'enc_layers': enc_layers,
        'enc_norm_g': jnp.ones((d_model,), jnp.float32),
        'enc_norm_b': jnp.zeros((d_model,), jnp.float32),
        'dec_embed': init_embed(),
        'dec_layers': dec_layers,
        'dec_norm_g': jnp.ones((d_model,), jnp.float32),
        'dec_norm_b': jnp.zeros((d_model,), jnp.float32),
        'dec_proj_w': w((d_model, d_feature)),
        'dec_proj_b': w((d_feature,)),
    }


# ----------------------------------------------------------------------------
if __name__ == "__main__":
    cfg = dict(label_len=8, pred_len=16, seq_len=16, d_feature=7, d_mark=4,
               d_model=32, d_ff=64, e_layers=2, d_layers=1, mov_avg=5,
               n_heads=4, factor=3)

    key = jax.random.PRNGKey(0)
    k_param, k_in = jax.random.split(key)
    params = init_autoformer(k_param, cfg)

    ks = jax.random.split(k_in, 4)
    B = 2
    enc_x = jax.random.normal(ks[0], (B, cfg['seq_len'], cfg['d_feature']), jnp.float32)
    enc_mark = jax.random.normal(ks[1], (B, cfg['seq_len'], cfg['d_mark']), jnp.float32)
    y = jax.random.normal(ks[2], (B, cfg['label_len'] + cfg['pred_len'], cfg['d_feature']), jnp.float32)
    y_mark = jax.random.normal(ks[3], (B, cfg['label_len'] + cfg['pred_len'], cfg['d_mark']), jnp.float32)

    fwd = jax.jit(functools.partial(autoformer_forward, cfg=cfg))
    out = jax.block_until_ready(fwd(params, enc_x, enc_mark, y, y_mark))

    assert out.shape == (B, cfg['pred_len'], cfg['d_feature'])
    assert jnp.all(jnp.isfinite(out))
    print("KERNEL_OK")
</pallas_src>

<mosaic_0001>
module attributes {stable_mosaic.version = 11 : i64} {
  func.func @_embed_kernel(%arg0: i32, %arg1: memref<1x16x7xf32, #tpu.memory_space<vmem>>, %arg2: memref<1x16x4xf32, #tpu.memory_space<vmem>>, %arg3: memref<2x16x16xf32, #tpu.memory_space<vmem>>, %arg4: memref<3x7x32xbf16, #tpu.memory_space<vmem>>, %arg5: memref<4x32xbf16, #tpu.memory_space<vmem>>, %arg6: memref<1x16x32xf32, #tpu.memory_space<vmem>>) attributes {dimension_semantics = [#tpu.dimension_semantics<parallel>], iteration_bounds = array<i64: 2>, scalar_prefetch = 0 : i64, scratch_operands = 0 : i64, tpu.core_type = #tpu.core_type<tc>, window_params = [{transform_indices = @transform_0, window_bounds = array<i64: 1, 16, 7>}, {transform_indices = @transform_1, window_bounds = array<i64: 1, 16, 4>}, {pipeline_mode = #tpu.pipeline_mode<synchronous>, transform_indices = @transform_2, window_bounds = array<i64: 2, 16, 16>}, {pipeline_mode = #tpu.pipeline_mode<synchronous>, transform_indices = @transform_3, window_bounds = array<i64: 3, 7, 32>}, {pipeline_mode = #tpu.pipeline_mode<synchronous>, transform_indices = @transform_4, window_bounds = array<i64: 4, 32>}, {transform_indices = @transform_5, window_bounds = array<i64: 1, 16, 32>}]} {
    %c0 = arith.constant 0 : index
    %c0_0 = arith.constant 0 : index
    %c0_1 = arith.constant 0 : index
    %0 = vector.load %arg1[%c0, %c0_0, %c0_1] : memref<1x16x7xf32, #tpu.memory_space<vmem>>, vector<1x16x7xf32>
    %1 = vector.shape_cast %0 : vector<1x16x7xf32> to vector<16x7xf32>
    %c0_2 = arith.constant 0 : index
    %c0_3 = arith.constant 0 : index
    %c0_4 = arith.constant 0 : index
    %2 = vector.load %arg2[%c0_2, %c0_3, %c0_4] : memref<1x16x4xf32, #tpu.memory_space<vmem>>, vector<1x16x4xf32>
    %3 = vector.shape_cast %2 : vector<1x16x4xf32> to vector<16x4xf32>
    %c0_5 = arith.constant 0 : index
    %c0_6 = arith.constant 0 : index
    %c0_7 = arith.constant 0 : index
    %4 = vector.load %arg3[%c0_5, %c0_6, %c0_7] : memref<2x16x16xf32, #tpu.memory_space<vmem>>, vector<1x16x16xf32>
    %5 = vector.shape_cast %4 : vector<1x16x16xf32> to vector<16x16xf32>
    %cst = arith.constant dense<0.000000e+00> : vector<16x7xf32>
    %6 = tpu.matmul %5, %1, %cst {dimension_numbers = #tpu.dot_dimension_numbers<[1], [0], [0], [1], [0, 0, 1, 1], [], []>} : vector<16x16xf32>, vector<16x7xf32>, vector<16x7xf32> -> vector<16x7xf32>
    %c1 = arith.constant 1 : index
    %c0_8 = arith.constant 0 : index
    %c0_9 = arith.constant 0 : index
    %7 = vector.load %arg3[%c1, %c0_8, %c0_9] : memref<2x16x16xf32, #tpu.memory_space<vmem>>, vector<1x16x16xf32>
    %8 = vector.shape_cast %7 : vector<1x16x16xf32> to vector<16x16xf32>
    %cst_10 = arith.constant dense<0.000000e+00> : vector<16x7xf32>
    %9 = tpu.matmul %8, %1, %cst_10 {dimension_numbers = #tpu.dot_dimension_numbers<[1], [0], [0], [1], [0, 0, 1, 1], [], []>} : vector<16x16xf32>, vector<16x7xf32>, vector<16x7xf32> -> vector<16x7xf32>
    %c0_11 = arith.constant 0 : index
    %c0_12 = arith.constant 0 : index
    %c0_13 = arith.constant 0 : index
    %10 = vector.load %arg4[%c0_11, %c0_12, %c0_13] : memref<3x7x32xbf16, #tpu.memory_space<vmem>>, vector<1x7x32xbf16>
    %11 = vector.shape_cast %10 : vector<1x7x32xbf16> to vector<7x32xbf16>
    %12 = arith.truncf %6 : vector<16x7xf32> to vector<16x7xbf16>
    %cst_14 = arith.constant dense<0.000000e+00> : vector<16x32xf32>
    %13 = tpu.matmul %12, %11, %cst_14 {dimension_numbers = #tpu.dot_dimension_numbers<[1], [0], [0], [1], [0, 0, 1, 1], [], []>} : vector<16x7xbf16>, vector<7x32xbf16>, vector<16x32xf32> -> vector<16x32xf32>
    %c1_15 = arith.constant 1 : index
    %c0_16 = arith.constant 0 : index
    %c0_17 = arith.constant 0 : index
    %14 = vector.load %arg4[%c1_15, %c0_16, %c0_17] : memref<3x7x32xbf16, #tpu.memory_space<vmem>>, vector<1x7x32xbf16>
    %15 = vector.shape_cast %14 : vector<1x7x32xbf16> to vector<7x32xbf16>
    %16 = arith.truncf %1 : vector<16x7xf32> to vector<16x7xbf16>
    %cst_18 = arith.constant dense<0.000000e+00> : vector<16x32xf32>
    %17 = tpu.matmul %16, %15, %cst_18 {dimension_numbers = #tpu.dot_dimension_numbers<[1], [0], [0], [1], [0, 0, 1, 1], [], []>} : vector<16x7xbf16>, vector<7x32xbf16>, vector<16x32xf32> -> vector<16x32xf32>
    %18 = arith.addf %13, %17 : vector<16x32xf32>
    %c2 = arith.constant 2 : index
    %c0_19 = arith.constant 0 : index
    %c0_20 = arith.constant 0 : index
    %19 = vector.load %arg4[%c2, %c0_19, %c0_20] : memref<3x7x32xbf16, #tpu.memory_space<vmem>>, vector<1x7x32xbf16>
    %20 = vector.shape_cast %19 : vector<1x7x32xbf16> to vector<7x32xbf16>
    %21 = arith.truncf %9 : vector<16x7xf32> to vector<16x7xbf16>
    %cst_21 = arith.constant dense<0.000000e+00> : vector<16x32xf32>
    %22 = tpu.matmul %21, %20, %cst_21 {dimension_numbers = #tpu.dot_dimension_numbers<[1], [0], [0], [1], [0, 0, 1, 1], [], []>} : vector<16x7xbf16>, vector<7x32xbf16>, vector<16x32xf32> -> vector<16x32xf32>
    %23 = arith.addf %18, %22 : vector<16x32xf32>
    %c0_22 = arith.constant 0 : index
    %c0_23 = arith.constant 0 : index
    %24 = vector.load %arg5[%c0_22, %c0_23] : memref<4x32xbf16, #tpu.memory_space<vmem>>, vector<4x32xbf16>
    %25 = arith.truncf %3 : vector<16x4xf32> to vector<16x4xbf16>
    %cst_24 = arith.constant dense<0.000000e+00> : vector<16x32xf32>
    %26 = tpu.matmul %25, %24, %cst_24 {dimension_numbers = #tpu.dot_dimension_numbers<[1], [0], [0], [1], [0, 0, 1, 1], [], []>} : vector<16x4xbf16>, vector<4x32xbf16>, vector<16x32xf32> -> vector<16x32xf32>
    %27 = arith.addf %23, %26 : vector<16x32xf32>
    %c0_25 = arith.constant 0 : index
    %c0_26 = arith.constant 0 : index
    %c0_27 = arith.constant 0 : index
    %28 = vector.load %arg6[%c0_25, %c0_26, %c0_27] : memref<1x16x32xf32, #tpu.memory_space<vmem>>, vector<1x16x32xf32>
    %29 = vector.shape_cast %28 : vector<1x16x32xf32> to vector<16x32xf32>
    %30 = vector.shape_cast %27 : vector<16x32xf32> to vector<1x16x32xf32>
    tpu.vector_store %arg6[%c0_25, %c0_26, %c0_27], %30 {strides = array<i32>} : memref<1x16x32xf32, #tpu.memory_space<vmem>>, vector<1x16x32xf32>,
    return
  }
  func.func @transform_0(%arg0: i32) -> (i32, i32, i32) {
    %c0_i32 = arith.constant 0 : i32
    %c0_i32_0 = arith.constant 0 : i32
    %c0_i32_1 = arith.constant 0 : i32
    return %arg0, %c0_i32, %c0_i32_0 : i32, i32, i32
  }
  func.func @transform_1(%arg0: i32) -> (i32, i32, i32) {
    %c0_i32 = arith.constant 0 : i32
    %c0_i32_0 = arith.constant 0 : i32
    %c0_i32_1 = arith.constant 0 : i32
    return %arg0, %c0_i32, %c0_i32_0 : i32, i32, i32
  }
  func.func @transform_2(%arg0: i32) -> (i32, i32, i32) {
    %c0_i32 = arith.constant 0 : i32
    %c0_i32_0 = arith.constant 0 : i32
    %c0_i32_1 = arith.constant 0 : i32
    %c0_i32_2 = arith.constant 0 : i32
    return %c0_i32, %c0_i32_0, %c0_i32_1 : i32, i32, i32
  }
  func.func @transform_3(%arg0: i32) -> (i32, i32, i32) {
    %c0_i32 = arith.constant 0 : i32
    %c0_i32_0 = arith.constant 0 : i32
    %c0_i32_1 = arith.constant 0 : i32
    %c0_i32_2 = arith.constant 0 : i32
    return %c0_i32, %c0_i32_0, %c0_i32_1 : i32, i32, i32
  }
  func.func @transform_4(%arg0: i32) -> (i32, i32) {
    %c0_i32 = arith.constant 0 : i32
    %c0_i32_0 = arith.constant 0 : i32
    %c0_i32_1 = arith.constant 0 : i32
    return %c0_i32, %c0_i32_0 : i32, i32
  }
  func.func @transform_5(%arg0: i32) -> (i32, i32, i32) {
    %c0_i32 = arith.constant 0 : i32
    %c0_i32_0 = arith.constant 0 : i32
    %c0_i32_1 = arith.constant 0 : i32
    return %arg0, %c0_i32, %c0_i32_0 : i32, i32, i32
  }
}

module attributes {stable_mosaic.version = 11 : i64} {
  func.func @_linear_kernel(%arg0: i32, %arg1: memref<16x32xbf16, #tpu.memory_space<vmem>>, %arg2: memref<32x96xbf16, #tpu.memory_space<vmem>>, %arg3: memref<1x96xf32, #tpu.memory_space<vmem>>, %arg4: memref<16x96xf32, #tpu.memory_space<vmem>>) attributes {dimension_semantics = [#tpu.dimension_semantics<parallel>], iteration_bounds = array<i64: 2>, scalar_prefetch = 0 : i64, scratch_operands = 0 : i64, tpu.core_type = #tpu.core_type<tc>, window_params = [{transform_indices = @transform_0, window_bounds = array<i64: 16, 32>}, {pipeline_mode = #tpu.pipeline_mode<synchronous>, transform_indices = @transform_1, window_bounds = array<i64: 32, 96>}, {pipeline_mode = #tpu.pipeline_mode<synchronous>, transform_indices = @transform_2, window_bounds = array<i64: 1, 96>}, {transform_indices = @transform_3, window_bounds = array<i64: 16, 96>}]} {
    %c0 = arith.constant 0 : index
    %c0_0 = arith.constant 0 : index
    %0 = vector.load %arg1[%c0, %c0_0] : memref<16x32xbf16, #tpu.memory_space<vmem>>, vector<16x32xbf16>
    %c0_1 = arith.constant 0 : index
    %c0_2 = arith.constant 0 : index
    %1 = vector.load %arg2[%c0_1, %c0_2] : memref<32x96xbf16, #tpu.memory_space<vmem>>, vector<32x96xbf16>
    %cst = arith.constant dense<0.000000e+00> : vector<16x96xf32>
    %2 = tpu.matmul %0, %1, %cst {dimension_numbers = #tpu.dot_dimension_numbers<[1], [0], [0], [1], [0, 0, 1, 1], [], []>} : vector<16x32xbf16>, vector<32x96xbf16>, vector<16x96xf32> -> vector<16x96xf32>
    %c0_3 = arith.constant 0 : index
    %c0_4 = arith.constant 0 : index
    %3 = vector.load %arg3[%c0_3, %c0_4] : memref<1x96xf32, #tpu.memory_space<vmem>>, vector<1x96xf32>
    %4 = vector.broadcast %3 : vector<1x96xf32> to vector<16x96xf32>
    %5 = arith.addf %2, %4 : vector<16x96xf32>
    %c0_5 = arith.constant 0 : index
    %c0_6 = arith.constant 0 : index
    %6 = vector.load %arg4[%c0_5, %c0_6] : memref<16x96xf32, #tpu.memory_space<vmem>>, vector<16x96xf32>
    tpu.vector_store %arg4[%c0_5, %c0_6], %5 {strides = array<i32>} : memref<16x96xf32, #tpu.memory_space<vmem>>, vector<16x96xf32>,
    return
  }
  func.func @transform_0(%arg0: i32) -> (i32, i32) {
    %c0_i32 = arith.constant 0 : i32
    %c0_i32_0 = arith.constant 0 : i32
    return %arg0, %c0_i32 : i32, i32
  }
  func.func @transform_1(%arg0: i32) -> (i32, i32) {
    %c0_i32 = arith.constant 0 : i32
    %c0_i32_0 = arith.constant 0 : i32
    %c0_i32_1 = arith.constant 0 : i32
    return %c0_i32, %c0_i32_0 : i32, i32
  }
  func.func @transform_2(%arg0: i32) -> (i32, i32) {
    %c0_i32 = arith.constant 0 : i32
    %c0_i32_0 = arith.constant 0 : i32
    %c0_i32_1 = arith.constant 0 : i32
    return %c0_i32, %c0_i32_0 : i32, i32
  }
  func.func @transform_3(%arg0: i32) -> (i32, i32) {
    %c0_i32 = arith.constant 0 : i32
    %c0_i32_0 = arith.constant 0 : i32
    return %arg0, %c0_i32 : i32, i32
  }
}

module attributes {stable_mosaic.version = 11 : i64} {
  func.func @_linear_kernel(%arg0: i32, %arg1: memref<16x32xbf16, #tpu.memory_space<vmem>>, %arg2: memref<32x64xbf16, #tpu.memory_space<vmem>>, %arg3: memref<1x64xf32, #tpu.memory_space<vmem>>, %arg4: memref<16x64xf32, #tpu.memory_space<vmem>>) attributes {dimension_semantics = [#tpu.dimension_semantics<parallel>], iteration_bounds = array<i64: 2>, scalar_prefetch = 0 : i64, scratch_operands = 0 : i64, tpu.core_type = #tpu.core_type<tc>, window_params = [{transform_indices = @transform_0, window_bounds = array<i64: 16, 32>}, {pipeline_mode = #tpu.pipeline_mode<synchronous>, transform_indices = @transform_1, window_bounds = array<i64: 32, 64>}, {pipeline_mode = #tpu.pipeline_mode<synchronous>, transform_indices = @transform_2, window_bounds = array<i64: 1, 64>}, {transform_indices = @transform_3, window_bounds = array<i64: 16, 64>}]} {
    %c0 = arith.constant 0 : index
    %c0_0 = arith.constant 0 : index
    %0 = vector.load %arg1[%c0, %c0_0] : memref<16x32xbf16, #tpu.memory_space<vmem>>, vector<16x32xbf16>
    %c0_1 = arith.constant 0 : index
    %c0_2 = arith.constant 0 : index
    %1 = vector.load %arg2[%c0_1, %c0_2] : memref<32x64xbf16, #tpu.memory_space<vmem>>, vector<32x64xbf16>
    %cst = arith.constant dense<0.000000e+00> : vector<16x64xf32>
    %2 = tpu.matmul %0, %1, %cst {dimension_numbers = #tpu.dot_dimension_numbers<[1], [0], [0], [1], [0, 0, 1, 1], [], []>} : vector<16x32xbf16>, vector<32x64xbf16>, vector<16x64xf32> -> vector<16x64xf32>
    %c0_3 = arith.constant 0 : index
    %c0_4 = arith.constant 0 : index
    %3 = vector.load %arg3[%c0_3, %c0_4] : memref<1x64xf32, #tpu.memory_space<vmem>>, vector<1x64xf32>
    %4 = vector.broadcast %3 : vector<1x64xf32> to vector<16x64xf32>
    %5 = arith.addf %2, %4 : vector<16x64xf32>
    %c0_5 = arith.constant 0 : index
    %c0_6 = arith.constant 0 : index
    %6 = vector.load %arg4[%c0_5, %c0_6] : memref<16x64xf32, #tpu.memory_space<vmem>>, vector<16x64xf32>
    tpu.vector_store %arg4[%c0_5, %c0_6], %5 {strides = array<i32>} : memref<16x64xf32, #tpu.memory_space<vmem>>, vector<16x64xf32>,
    return
  }
  func.func @transform_0(%arg0: i32) -> (i32, i32) {
    %c0_i32 = arith.constant 0 : i32
    %c0_i32_0 = arith.constant 0 : i32
    return %arg0, %c0_i32 : i32, i32
  }
  func.func @transform_1(%arg0: i32) -> (i32, i32) {
    %c0_i32 = arith.constant 0 : i32
    %c0_i32_0 = arith.constant 0 : i32
    %c0_i32_1 = arith.constant 0 : i32
    return %c0_i32, %c0_i32_0 : i32, i32
  }
  func.func @transform_2(%arg0: i32) -> (i32, i32) {
    %c0_i32 = arith.constant 0 : i32
    %c0_i32_0 = arith.constant 0 : i32
    %c0_i32_1 = arith.constant 0 : i32
    return %c0_i32, %c0_i32_0 : i32, i32
  }
  func.func @transform_3(%arg0: i32) -> (i32, i32) {
    %c0_i32 = arith.constant 0 : i32
    %c0_i32_0 = arith.constant 0 : i32
    return %arg0, %c0_i32 : i32, i32
  }
}

module attributes {stable_mosaic.version = 11 : i64} {
  func.func @_enc_layer_post_kernel(%arg0: i32, %arg1: memref<1x16x32xf32, #tpu.memory_space<vmem>>, %arg2: memref<1x16x32xf32, #tpu.memory_space<vmem>>, %arg3: memref<32x32xbf16, #tpu.memory_space<vmem>>, %arg4: memref<1x32xf32, #tpu.memory_space<vmem>>, %arg5: memref<32x64xbf16, #tpu.memory_space<vmem>>, %arg6: memref<64x32xbf16, #tpu.memory_space<vmem>>, %arg7: memref<16x16xf32, #tpu.memory_space<vmem>>, %arg8: memref<1x16x32xf32, #tpu.memory_space<vmem>>) attributes {dimension_semantics = [#tpu.dimension_semantics<parallel>], iteration_bounds = array<i64: 2>, scalar_prefetch = 0 : i64, scratch_operands = 0 : i64, tpu.core_type = #tpu.core_type<tc>, window_params = [{transform_indices = @transform_0, window_bounds = array<i64: 1, 16, 32>}, {transform_indices = @transform_1, window_bounds = array<i64: 1, 16, 32>}, {pipeline_mode = #tpu.pipeline_mode<synchronous>, transform_indices = @transform_2, window_bounds = array<i64: 32, 32>}, {pipeline_mode = #tpu.pipeline_mode<synchronous>, transform_indices = @transform_3, window_bounds = array<i64: 1, 32>}, {pipeline_mode = #tpu.pipeline_mode<synchronous>, transform_indices = @transform_4, window_bounds = array<i64: 32, 64>}, {pipeline_mode = #tpu.pipeline_mode<synchronous>, transform_indices = @transform_5, window_bounds = array<i64: 64, 32>}, {pipeline_mode = #tpu.pipeline_mode<synchronous>, transform_indices = @transform_6, window_bounds = array<i64: 16, 16>}, {transform_indices = @transform_7, window_bounds = array<i64: 1, 16, 32>}]} {
    %c0 = arith.constant 0 : index
    %c0_0 = arith.constant 0 : index
    %0 = vector.load %arg7[%c0, %c0_0] : memref<16x16xf32, #tpu.memory_space<vmem>>, vector<16x16xf32>
    %c0_1 = arith.constant 0 : index
    %c0_2 = arith.constant 0 : index
    %c0_3 = arith.constant 0 : index
    %1 = vector.load %arg2[%c0_1, %c0_2, %c0_3] : memref<1x16x32xf32, #tpu.memory_space<vmem>>, vector<1x16x32xf32>
    %2 = vector.shape_cast %1 : vector<1x16x32xf32> to vector<16x32xf32>
    %c0_4 = arith.constant 0 : index
    %c0_5 = arith.constant 0 : index
    %c0_6 = arith.constant 0 : index
    %3 = vector.load %arg1[%c0_4, %c0_5, %c0_6] : memref<1x16x32xf32, #tpu.memory_space<vmem>>, vector<1x16x32xf32>
    %4 = vector.shape_cast %3 : vector<1x16x32xf32> to vector<16x32xf32>
    %c0_7 = arith.constant 0 : index
    %c0_8 = arith.constant 0 : index
    %5 = vector.load %arg3[%c0_7, %c0_8] : memref<32x32xbf16, #tpu.memory_space<vmem>>, vector<32x32xbf16>
    %6 = arith.truncf %4 : vector<16x32xf32> to vector<16x32xbf16>
    %cst = arith.constant dense<0.000000e+00> : vector<16x32xf32>
    %7 = tpu.matmul %6, %5, %cst {dimension_numbers = #tpu.dot_dimension_numbers<[1], [0], [0], [1], [0, 0, 1, 1], [], []>} : vector<16x32xbf16>, vector<32x32xbf16>, vector<16x32xf32> -> vector<16x32xf32>
    %8 = arith.addf %2, %7 : vector<16x32xf32>
    %c0_9 = arith.constant 0 : index
    %c0_10 = arith.constant 0 : index
    %9 = vector.load %arg4[%c0_9, %c0_10] : memref<1x32xf32, #tpu.memory_space<vmem>>, vector<1x32xf32>
    %10 = vector.broadcast %9 : vector<1x32xf32> to vector<16x32xf32>
    %11 = arith.addf %8, %10 : vector<16x32xf32>
    %cst_11 = arith.constant dense<0.000000e+00> : vector<16x32xf32>
    %12 = tpu.matmul %0, %11, %cst_11 {dimension_numbers = #tpu.dot_dimension_numbers<[1], [0], [0], [1], [0, 0, 1, 1], [], []>} : vector<16x16xf32>, vector<16x32xf32>, vector<16x32xf32> -> vector<16x32xf32>
    %13 = arith.subf %11, %12 : vector<16x32xf32>
    %c0_12 = arith.constant 0 : index
    %c0_13 = arith.constant 0 : index
    %14 = vector.load %arg5[%c0_12, %c0_13] : memref<32x64xbf16, #tpu.memory_space<vmem>>, vector<32x64xbf16>
    %15 = arith.truncf %13 : vector<16x32xf32> to vector<16x32xbf16>
    %cst_14 = arith.constant dense<0.000000e+00> : vector<16x64xf32>
    %16 = tpu.matmul %15, %14, %cst_14 {dimension_numbers = #tpu.dot_dimension_numbers<[1], [0], [0], [1], [0, 0, 1, 1], [], []>} : vector<16x32xbf16>, vector<32x64xbf16>, vector<16x64xf32> -> vector<16x64xf32>
    %cst_15 = arith.constant 0.000000e+00 : f32
    %17 = vector.broadcast %cst_15 : f32 to vector<16x64xf32>
    %18 = arith.maximumf %16, %17 : vector<16x64xf32>
    %c0_16 = arith.constant 0 : index
    %c0_17 = arith.constant 0 : index
    %19 = vector.load %arg6[%c0_16, %c0_17] : memref<64x32xbf16, #tpu.memory_space<vmem>>, vector<64x32xbf16>
    %20 = arith.truncf %18 : vector<16x64xf32> to vector<16x64xbf16>
    %cst_18 = arith.constant dense<0.000000e+00> : vector<16x32xf32>
    %21 = tpu.matmul %20, %19, %cst_18 {dimension_numbers = #tpu.dot_dimension_numbers<[1], [0], [0], [1], [0, 0, 1, 1], [], []>} : vector<16x64xbf16>, vector<64x32xbf16>, vector<16x32xf32> -> vector<16x32xf32>
    %22 = arith.addf %13, %21 : vector<16x32xf32>
    %cst_19 = arith.constant dense<0.000000e+00> : vector<16x32xf32>
    %23 = tpu.matmul %0, %22, %cst_19 {dimension_numbers = #tpu.dot_dimension_numbers<[1], [0], [0], [1], [0, 0, 1, 1], [], []>} : vector<16x16xf32>, vector<16x32xf32>, vector<16x32xf32> -> vector<16x32xf32>
    %24 = arith.subf %22, %23 : vector<16x32xf32>
    %c0_20 = arith.constant 0 : index
    %c0_21 = arith.constant 0 : index
    %c0_22 = arith.constant 0 : index
    %25 = vector.load %arg8[%c0_20, %c0_21, %c0_22] : memref<1x16x32xf32, #tpu.memory_space<vmem>>, vector<1x16x32xf32>
    %26 = vector.shape_cast %25 : vector<1x16x32xf32> to vector<16x32xf32>
    %27 = vector.shape_cast %24 : vector<16x32xf32> to vector<1x16x32xf32>
    tpu.vector_store %arg8[%c0_20, %c0_21, %c0_22], %27 {strides = array<i32>} : memref<1x16x32xf32, #tpu.memory_space<vmem>>, vector<1x16x32xf32>,
    return
  }
  func.func @transform_0(%arg0: i32) -> (i32, i32, i32) {
    %c0_i32 = arith.constant 0 : i32
    %c0_i32_0 = arith.constant 0 : i32
    %c0_i32_1 = arith.constant 0 : i32
    return %arg0, %c0_i32, %c0_i32_0 : i32, i32, i32
  }
  func.func @transform_1(%arg0: i32) -> (i32, i32, i32) {
    %c0_i32 = arith.constant 0 : i32
    %c0_i32_0 = arith.constant 0 : i32
    %c0_i32_1 = arith.constant 0 : i32
    return %arg0, %c0_i32, %c0_i32_0 : i32, i32, i32
  }
  func.func @transform_2(%arg0: i32) -> (i32, i32) {
    %c0_i32 = arith.constant 0 : i32
    %c0_i32_0 = arith.constant 0 : i32
    %c0_i32_1 = arith.constant 0 : i32
    return %c0_i32, %c0_i32_0 : i32, i32
  }
  func.func @transform_3(%arg0: i32) -> (i32, i32) {
    %c0_i32 = arith.constant 0 : i32
    %c0_i32_0 = arith.constant 0 : i32
    %c0_i32_1 = arith.constant 0 : i32
    return %c0_i32, %c0_i32_0 : i32, i32
  }
  func.func @transform_4(%arg0: i32) -> (i32, i32) {
    %c0_i32 = arith.constant 0 : i32
    %c0_i32_0 = arith.constant 0 : i32
    %c0_i32_1 = arith.constant 0 : i32
    return %c0_i32, %c0_i32_0 : i32, i32
  }
  func.func @transform_5(%arg0: i32) -> (i32, i32) {
    %c0_i32 = arith.constant 0 : i32
    %c0_i32_0 = arith.constant 0 : i32
    %c0_i32_1 = arith.constant 0 : i32
    return %c0_i32, %c0_i32_0 : i32, i32
  }
  func.func @transform_6(%arg0: i32) -> (i32, i32) {
    %c0_i32 = arith.constant 0 : i32
    %c0_i32_0 = arith.constant 0 : i32
    %c0_i32_1 = arith.constant 0 : i32
    return %c0_i32, %c0_i32_0 : i32, i32
  }
  func.func @transform_7(%arg0: i32) -> (i32, i32, i32) {
    %c0_i32 = arith.constant 0 : i32
    %c0_i32_0 = arith.constant 0 : i32
    %c0_i32_1 = arith.constant 0 : i32
    return %arg0, %c0_i32, %c0_i32_0 : i32, i32, i32
  }
}

module attributes {stable_mosaic.version = 11 : i64} {
  func.func @_my_layernorm_kernel(%arg0: i32, %arg1: memref<1x16x32xf32, #tpu.memory_space<vmem>>, %arg2: memref<1x32xf32, #tpu.memory_space<vmem>>, %arg3: memref<1x32xf32, #tpu.memory_space<vmem>>, %arg4: memref<1x16x32xf32, #tpu.memory_space<vmem>>) attributes {dimension_semantics = [#tpu.dimension_semantics<parallel>], iteration_bounds = array<i64: 2>, scalar_prefetch = 0 : i64, scratch_operands = 0 : i64, tpu.core_type = #tpu.core_type<tc>, window_params = [{transform_indices = @transform_0, window_bounds = array<i64: 1, 16, 32>}, {pipeline_mode = #tpu.pipeline_mode<synchronous>, transform_indices = @transform_1, window_bounds = array<i64: 1, 32>}, {pipeline_mode = #tpu.pipeline_mode<synchronous>, transform_indices = @transform_2, window_bounds = array<i64: 1, 32>}, {transform_indices = @transform_3, window_bounds = array<i64: 1, 16, 32>}]} {
    %c0 = arith.constant 0 : index
    %c0_0 = arith.constant 0 : index
    %c0_1 = arith.constant 0 : index
    %0 = vector.load %arg1[%c0, %c0_0, %c0_1] : memref<1x16x32xf32, #tpu.memory_space<vmem>>, vector<1x16x32xf32>
    %1 = vector.shape_cast %0 : vector<1x16x32xf32> to vector<16x32xf32>
    %cst = arith.constant dense<0.000000e+00> : vector<16xf32>
    %2 = vector.multi_reduction <add>, %1, %cst [1] : vector<16x32xf32> to vector<16xf32>
    %3 = vector.shape_cast %2 : vector<16xf32> to vector<16x1xf32>
    %cst_2 = arith.constant 3.200000e+01 : f32
    %4 = vector.broadcast %cst_2 : f32 to vector<16x1xf32>
    %5 = arith.divf %3, %4 : vector<16x1xf32>
    %6 = vector.broadcast %5 : vector<16x1xf32> to vector<16x32xf32>
    %7 = arith.subf %1, %6 : vector<16x32xf32>
    %8 = arith.mulf %7, %7 : vector<16x32xf32>
    %cst_3 = arith.constant dense<0.000000e+00> : vector<16xf32>
    %9 = vector.multi_reduction <add>, %8, %cst_3 [1] : vector<16x32xf32> to vector<16xf32>
    %10 = vector.shape_cast %9 : vector<16xf32> to vector<16x1xf32>
    %cst_4 = arith.constant 3.200000e+01 : f32
    %11 = vector.broadcast %cst_4 : f32 to vector<16x1xf32>
    %12 = arith.divf %10, %11 : vector<16x1xf32>
    %13 = vector.broadcast %5 : vector<16x1xf32> to vector<16x32xf32>
    %14 = arith.subf %1, %13 : vector<16x32xf32>
    %cst_5 = arith.constant 9.99999974E-6 : f32
    %15 = vector.broadcast %cst_5 : f32 to vector<16x1xf32>
    %16 = arith.addf %12, %15 : vector<16x1xf32>
    %17 = math.rsqrt %16 : vector<16x1xf32>
    %18 = vector.broadcast %17 : vector<16x1xf32> to vector<16x32xf32>
    %19 = arith.mulf %14, %18 : vector<16x32xf32>
    %c0_6 = arith.constant 0 : index
    %c0_7 = arith.constant 0 : index
    %20 = vector.load %arg2[%c0_6, %c0_7] : memref<1x32xf32, #tpu.memory_space<vmem>>, vector<1x32xf32>
    %21 = vector.broadcast %20 : vector<1x32xf32> to vector<16x32xf32>
    %22 = arith.mulf %19, %21 : vector<16x32xf32>
    %c0_8 = arith.constant 0 : index
    %c0_9 = arith.constant 0 : index
    %23 = vector.load %arg3[%c0_8, %c0_9] : memref<1x32xf32, #tpu.memory_space<vmem>>, vector<1x32xf32>
    %24 = vector.broadcast %23 : vector<1x32xf32> to vector<16x32xf32>
    %25 = arith.addf %22, %24 : vector<16x32xf32>
    %cst_10 = arith.constant dense<0.000000e+00> : vector<32xf32>
    %26 = vector.multi_reduction <add>, %25, %cst_10 [0] : vector<16x32xf32> to vector<32xf32>
    %27 = vector.shape_cast %26 : vector<32xf32> to vector<1x32xf32>
    %cst_11 = arith.constant 1.600000e+01 : f32
    %28 = vector.broadcast %cst_11 : f32 to vector<1x32xf32>
    %29 = arith.divf %27, %28 : vector<1x32xf32>
    %30 = vector.broadcast %29 : vector<1x32xf32> to vector<16x32xf32>
    %31 = arith.subf %25, %30 : vector<16x32xf32>
    %c0_12 = arith.constant 0 : index
    %c0_13 = arith.constant 0 : index
    %c0_14 = arith.constant 0 : index
    %32 = vector.load %arg4[%c0_12, %c0_13, %c0_14] : memref<1x16x32xf32, #tpu.memory_space<vmem>>, vector<1x16x32xf32>
    %33 = vector.shape_cast %32 : vector<1x16x32xf32> to vector<16x32xf32>
    %34 = vector.shape_cast %31 : vector<16x32xf32> to vector<1x16x32xf32>
    tpu.vector_store %arg4[%c0_12, %c0_13, %c0_14], %34 {strides = array<i32>} : memref<1x16x32xf32, #tpu.memory_space<vmem>>, vector<1x16x32xf32>,
    return
  }
  func.func @transform_0(%arg0: i32) -> (i32, i32, i32) {
    %c0_i32 = arith.constant 0 : i32
    %c0_i32_0 = arith.constant 0 : i32
    %c0_i32_1 = arith.constant 0 : i32
    return %arg0, %c0_i32, %c0_i32_0 : i32, i32, i32
  }
  func.func @transform_1(%arg0: i32) -> (i32, i32) {
    %c0_i32 = arith.constant 0 : i32
    %c0_i32_0 = arith.constant 0 : i32
    %c0_i32_1 = arith.constant 0 : i32
    return %c0_i32, %c0_i32_0 : i32, i32
  }
  func.func @transform_2(%arg0: i32) -> (i32, i32) {
    %c0_i32 = arith.constant 0 : i32
    %c0_i32_0 = arith.constant 0 : i32
    %c0_i32_1 = arith.constant 0 : i32
    return %c0_i32, %c0_i32_0 : i32, i32
  }
  func.func @transform_3(%arg0: i32) -> (i32, i32, i32) {
    %c0_i32 = arith.constant 0 : i32
    %c0_i32_0 = arith.constant 0 : i32
    %c0_i32_1 = arith.constant 0 : i32
    return %arg0, %c0_i32, %c0_i32_0 : i32, i32, i32
  }
}

module attributes {stable_mosaic.version = 11 : i64} {
  func.func @_decomp_kernel(%arg0: i32, %arg1: memref<1x8x7xf32, #tpu.memory_space<vmem>>, %arg2: memref<8x8xf32, #tpu.memory_space<vmem>>, %arg3: memref<1x8x7xf32, #tpu.memory_space<vmem>>, %arg4: memref<1x8x7xf32, #tpu.memory_space<vmem>>) attributes {dimension_semantics = [#tpu.dimension_semantics<parallel>], iteration_bounds = array<i64: 2>, scalar_prefetch = 0 : i64, scratch_operands = 0 : i64, tpu.core_type = #tpu.core_type<tc>, window_params = [{transform_indices = @transform_0, window_bounds = array<i64: 1, 8, 7>}, {pipeline_mode = #tpu.pipeline_mode<synchronous>, transform_indices = @transform_1, window_bounds = array<i64: 8, 8>}, {transform_indices = @transform_2, window_bounds = array<i64: 1, 8, 7>}, {transform_indices = @transform_3, window_bounds = array<i64: 1, 8, 7>}]} {
    %c0 = arith.constant 0 : index
    %c0_0 = arith.constant 0 : index
    %c0_1 = arith.constant 0 : index
    %0 = vector.load %arg1[%c0, %c0_0, %c0_1] : memref<1x8x7xf32, #tpu.memory_space<vmem>>, vector<1x8x7xf32>
    %1 = vector.shape_cast %0 : vector<1x8x7xf32> to vector<8x7xf32>
    %c0_2 = arith.constant 0 : index
    %c0_3 = arith.constant 0 : index
    %2 = vector.load %arg2[%c0_2, %c0_3] : memref<8x8xf32, #tpu.memory_space<vmem>>, vector<8x8xf32>
    %cst = arith.constant dense<0.000000e+00> : vector<8x7xf32>
    %3 = tpu.matmul %2, %1, %cst {dimension_numbers = #tpu.dot_dimension_numbers<[1], [0], [0], [1], [0, 0, 1, 1], [], []>} : vector<8x8xf32>, vector<8x7xf32>, vector<8x7xf32> -> vector<8x7xf32>
    %4 = arith.subf %1, %3 : vector<8x7xf32>
    %c0_4 = arith.constant 0 : index
    %c0_5 = arith.constant 0 : index
    %c0_6 = arith.constant 0 : index
    %5 = vector.load %arg3[%c0_4, %c0_5, %c0_6] : memref<1x8x7xf32, #tpu.memory_space<vmem>>, vector<1x8x7xf32>
    %6 = vector.shape_cast %5 : vector<1x8x7xf32> to vector<8x7xf32>
    %7 = vector.shape_cast %4 : vector<8x7xf32> to vector<1x8x7xf32>
    tpu.vector_store %arg3[%c0_4, %c0_5, %c0_6], %7 {strides = array<i32>} : memref<1x8x7xf32, #tpu.memory_space<vmem>>, vector<1x8x7xf32>,
    %c0_7 = arith.constant 0 : index
    %c0_8 = arith.constant 0 : index
    %c0_9 = arith.constant 0 : index
    %8 = vector.load %arg4[%c0_7, %c0_8, %c0_9] : memref<1x8x7xf32, #tpu.memory_space<vmem>>, vector<1x8x7xf32>
    %9 = vector.shape_cast %8 : vector<1x8x7xf32> to vector<8x7xf32>
    %10 = vector.shape_cast %3 : vector<8x7xf32> to vector<1x8x7xf32>
    tpu.vector_store %arg4[%c0_7, %c0_8, %c0_9], %10 {strides = array<i32>} : memref<1x8x7xf32, #tpu.memory_space<vmem>>, vector<1x8x7xf32>,
    return
  }
  func.func @transform_0(%arg0: i32) -> (i32, i32, i32) {
    %c0_i32 = arith.constant 0 : i32
    %c0_i32_0 = arith.constant 0 : i32
    %c0_i32_1 = arith.constant 0 : i32
    return %arg0, %c0_i32, %c0_i32_0 : i32, i32, i32
  }
  func.func @transform_1(%arg0: i32) -> (i32, i32) {
    %c0_i32 = arith.constant 0 : i32
    %c0_i32_0 = arith.constant 0 : i32
    %c0_i32_1 = arith.constant 0 : i32
    return %c0_i32, %c0_i32_0 : i32, i32
  }
  func.func @transform_2(%arg0: i32) -> (i32, i32, i32) {
    %c0_i32 = arith.constant 0 : i32
    %c0_i32_0 = arith.constant 0 : i32
    %c0_i32_1 = arith.constant 0 : i32
    return %arg0, %c0_i32, %c0_i32_0 : i32, i32, i32
  }
  func.func @transform_3(%arg0: i32) -> (i32, i32, i32) {
    %c0_i32 = arith.constant 0 : i32
    %c0_i32_0 = arith.constant 0 : i32
    %c0_i32_1 = arith.constant 0 : i32
    return %arg0, %c0_i32, %c0_i32_0 : i32, i32, i32
  }
}

module attributes {stable_mosaic.version = 11 : i64} {
  func.func @_linear_kernel(%arg0: i32, %arg1: memref<24x32xbf16, #tpu.memory_space<vmem>>, %arg2: memref<32x96xbf16, #tpu.memory_space<vmem>>, %arg3: memref<1x96xf32, #tpu.memory_space<vmem>>, %arg4: memref<24x96xf32, #tpu.memory_space<vmem>>) attributes {dimension_semantics = [#tpu.dimension_semantics<parallel>], iteration_bounds = array<i64: 2>, scalar_prefetch = 0 : i64, scratch_operands = 0 : i64, tpu.core_type = #tpu.core_type<tc>, window_params = [{transform_indices = @transform_0, window_bounds = array<i64: 24, 32>}, {pipeline_mode = #tpu.pipeline_mode<synchronous>, transform_indices = @transform_1, window_bounds = array<i64: 32, 96>}, {pipeline_mode = #tpu.pipeline_mode<synchronous>, transform_indices = @transform_2, window_bounds = array<i64: 1, 96>}, {transform_indices = @transform_3, window_bounds = array<i64: 24, 96>}]} {
    %c0 = arith.constant 0 : index
    %c0_0 = arith.constant 0 : index
    %0 = vector.load %arg1[%c0, %c0_0] : memref<24x32xbf16, #tpu.memory_space<vmem>>, vector<24x32xbf16>
    %c0_1 = arith.constant 0 : index
    %c0_2 = arith.constant 0 : index
    %1 = vector.load %arg2[%c0_1, %c0_2] : memref<32x96xbf16, #tpu.memory_space<vmem>>, vector<32x96xbf16>
    %cst = arith.constant dense<0.000000e+00> : vector<24x96xf32>
    %2 = tpu.matmul %0, %1, %cst {dimension_numbers = #tpu.dot_dimension_numbers<[1], [0], [0], [1], [0, 0, 1, 1], [], []>} : vector<24x32xbf16>, vector<32x96xbf16>, vector<24x96xf32> -> vector<24x96xf32>
    %c0_3 = arith.constant 0 : index
    %c0_4 = arith.constant 0 : index
    %3 = vector.load %arg3[%c0_3, %c0_4] : memref<1x96xf32, #tpu.memory_space<vmem>>, vector<1x96xf32>
    %4 = vector.broadcast %3 : vector<1x96xf32> to vector<24x96xf32>
    %5 = arith.addf %2, %4 : vector<24x96xf32>
    %c0_5 = arith.constant 0 : index
    %c0_6 = arith.constant 0 : index
    %6 = vector.load %arg4[%c0_5, %c0_6] : memref<24x96xf32, #tpu.memory_space<vmem>>, vector<24x96xf32>
    tpu.vector_store %arg4[%c0_5, %c0_6], %5 {strides = array<i32>} : memref<24x96xf32, #tpu.memory_space<vmem>>, vector<24x96xf32>,
    return
  }
  func.func @transform_0(%arg0: i32) -> (i32, i32) {
    %c0_i32 = arith.constant 0 : i32
    %c0_i32_0 = arith.constant 0 : i32
    return %arg0, %c0_i32 : i32, i32
  }
  func.func @transform_1(%arg0: i32) -> (i32, i32) {
    %c0_i32 = arith.constant 0 : i32
    %c0_i32_0 = arith.constant 0 : i32
    %c0_i32_1 = arith.constant 0 : i32
    return %c0_i32, %c0_i32_0 : i32, i32
  }
  func.func @transform_2(%arg0: i32) -> (i32, i32) {
    %c0_i32 = arith.constant 0 : i32
    %c0_i32_0 = arith.constant 0 : i32
    %c0_i32_1 = arith.constant 0 : i32
    return %c0_i32, %c0_i32_0 : i32, i32
  }
  func.func @transform_3(%arg0: i32) -> (i32, i32) {
    %c0_i32 = arith.constant 0 : i32
    %c0_i32_0 = arith.constant 0 : i32
    return %arg0, %c0_i32 : i32, i32
  }
}

module attributes {stable_mosaic.version = 11 : i64} {
  func.func @_embed_kernel(%arg0: i32, %arg1: memref<1x24x7xf32, #tpu.memory_space<vmem>>, %arg2: memref<1x24x4xf32, #tpu.memory_space<vmem>>, %arg3: memref<2x24x24xf32, #tpu.memory_space<vmem>>, %arg4: memref<3x7x32xbf16, #tpu.memory_space<vmem>>, %arg5: memref<4x32xbf16, #tpu.memory_space<vmem>>, %arg6: memref<1x24x32xf32, #tpu.memory_space<vmem>>) attributes {dimension_semantics = [#tpu.dimension_semantics<parallel>], iteration_bounds = array<i64: 2>, scalar_prefetch = 0 : i64, scratch_operands = 0 : i64, tpu.core_type = #tpu.core_type<tc>, window_params = [{transform_indices = @transform_0, window_bounds = array<i64: 1, 24, 7>}, {transform_indices = @transform_1, window_bounds = array<i64: 1, 24, 4>}, {pipeline_mode = #tpu.pipeline_mode<synchronous>, transform_indices = @transform_2, window_bounds = array<i64: 2, 24, 24>}, {pipeline_mode = #tpu.pipeline_mode<synchronous>, transform_indices = @transform_3, window_bounds = array<i64: 3, 7, 32>}, {pipeline_mode = #tpu.pipeline_mode<synchronous>, transform_indices = @transform_4, window_bounds = array<i64: 4, 32>}, {transform_indices = @transform_5, window_bounds = array<i64: 1, 24, 32>}]} {
    %c0 = arith.constant 0 : index
    %c0_0 = arith.constant 0 : index
    %c0_1 = arith.constant 0 : index
    %0 = vector.load %arg1[%c0, %c0_0, %c0_1] : memref<1x24x7xf32, #tpu.memory_space<vmem>>, vector<1x24x7xf32>
    %1 = vector.shape_cast %0 : vector<1x24x7xf32> to vector<24x7xf32>
    %c0_2 = arith.constant 0 : index
    %c0_3 = arith.constant 0 : index
    %c0_4 = arith.constant 0 : index
    %2 = vector.load %arg2[%c0_2, %c0_3, %c0_4] : memref<1x24x4xf32, #tpu.memory_space<vmem>>, vector<1x24x4xf32>
    %3 = vector.shape_cast %2 : vector<1x24x4xf32> to vector<24x4xf32>
    %c0_5 = arith.constant 0 : index
    %c0_6 = arith.constant 0 : index
    %c0_7 = arith.constant 0 : index
    %4 = vector.load %arg3[%c0_5, %c0_6, %c0_7] : memref<2x24x24xf32, #tpu.memory_space<vmem>>, vector<1x24x24xf32>
    %5 = vector.shape_cast %4 : vector<1x24x24xf32> to vector<24x24xf32>
    %cst = arith.constant dense<0.000000e+00> : vector<24x7xf32>
    %6 = tpu.matmul %5, %1, %cst {dimension_numbers = #tpu.dot_dimension_numbers<[1], [0], [0], [1], [0, 0, 1, 1], [], []>} : vector<24x24xf32>, vector<24x7xf32>, vector<24x7xf32> -> vector<24x7xf32>
    %c1 = arith.constant 1 : index
    %c0_8 = arith.constant 0 : index
    %c0_9 = arith.constant 0 : index
    %7 = vector.load %arg3[%c1, %c0_8, %c0_9] : memref<2x24x24xf32, #tpu.memory_space<vmem>>, vector<1x24x24xf32>
    %8 = vector.shape_cast %7 : vector<1x24x24xf32> to vector<24x24xf32>
    %cst_10 = arith.constant dense<0.000000e+00> : vector<24x7xf32>
    %9 = tpu.matmul %8, %1, %cst_10 {dimension_numbers = #tpu.dot_dimension_numbers<[1], [0], [0], [1], [0, 0, 1, 1], [], []>} : vector<24x24xf32>, vector<24x7xf32>, vector<24x7xf32> -> vector<24x7xf32>
    %c0_11 = arith.constant 0 : index
    %c0_12 = arith.constant 0 : index
    %c0_13 = arith.constant 0 : index
    %10 = vector.load %arg4[%c0_11, %c0_12, %c0_13] : memref<3x7x32xbf16, #tpu.memory_space<vmem>>, vector<1x7x32xbf16>
    %11 = vector.shape_cast %10 : vector<1x7x32xbf16> to vector<7x32xbf16>
    %12 = arith.truncf %6 : vector<24x7xf32> to vector<24x7xbf16>
    %cst_14 = arith.constant dense<0.000000e+00> : vector<24x32xf32>
    %13 = tpu.matmul %12, %11, %cst_14 {dimension_numbers = #tpu.dot_dimension_numbers<[1], [0], [0], [1], [0, 0, 1, 1], [], []>} : vector<24x7xbf16>, vector<7x32xbf16>, vector<24x32xf32> -> vector<24x32xf32>
    %c1_15 = arith.constant 1 : index
    %c0_16 = arith.constant 0 : index
    %c0_17 = arith.constant 0 : index
    %14 = vector.load %arg4[%c1_15, %c0_16, %c0_17] : memref<3x7x32xbf16, #tpu.memory_space<vmem>>, vector<1x7x32xbf16>
    %15 = vector.shape_cast %14 : vector<1x7x32xbf16> to vector<7x32xbf16>
    %16 = arith.truncf %1 : vector<24x7xf32> to vector<24x7xbf16>
    %cst_18 = arith.constant dense<0.000000e+00> : vector<24x32xf32>
    %17 = tpu.matmul %16, %15, %cst_18 {dimension_numbers = #tpu.dot_dimension_numbers<[1], [0], [0], [1], [0, 0, 1, 1], [], []>} : vector<24x7xbf16>, vector<7x32xbf16>, vector<24x32xf32> -> vector<24x32xf32>
    %18 = arith.addf %13, %17 : vector<24x32xf32>
    %c2 = arith.constant 2 : index
    %c0_19 = arith.constant 0 : index
    %c0_20 = arith.constant 0 : index
    %19 = vector.load %arg4[%c2, %c0_19, %c0_20] : memref<3x7x32xbf16, #tpu.memory_space<vmem>>, vector<1x7x32xbf16>
    %20 = vector.shape_cast %19 : vector<1x7x32xbf16> to vector<7x32xbf16>
    %21 = arith.truncf %9 : vector<24x7xf32> to vector<24x7xbf16>
    %cst_21 = arith.constant dense<0.000000e+00> : vector<24x32xf32>
    %22 = tpu.matmul %21, %20, %cst_21 {dimension_numbers = #tpu.dot_dimension_numbers<[1], [0], [0], [1], [0, 0, 1, 1], [], []>} : vector<24x7xbf16>, vector<7x32xbf16>, vector<24x32xf32> -> vector<24x32xf32>
    %23 = arith.addf %18, %22 : vector<24x32xf32>
    %c0_22 = arith.constant 0 : index
    %c0_23 = arith.constant 0 : index
    %24 = vector.load %arg5[%c0_22, %c0_23] : memref<4x32xbf16, #tpu.memory_space<vmem>>, vector<4x32xbf16>
    %25 = arith.truncf %3 : vector<24x4xf32> to vector<24x4xbf16>
    %cst_24 = arith.constant dense<0.000000e+00> : vector<24x32xf32>
    %26 = tpu.matmul %25, %24, %cst_24 {dimension_numbers = #tpu.dot_dimension_numbers<[1], [0], [0], [1], [0, 0, 1, 1], [], []>} : vector<24x4xbf16>, vector<4x32xbf16>, vector<24x32xf32> -> vector<24x32xf32>
    %27 = arith.addf %23, %26 : vector<24x32xf32>
    %c0_25 = arith.constant 0 : index
    %c0_26 = arith.constant 0 : index
    %c0_27 = arith.constant 0 : index
    %28 = vector.load %arg6[%c0_25, %c0_26, %c0_27] : memref<1x24x32xf32, #tpu.memory_space<vmem>>, vector<1x24x32xf32>
    %29 = vector.shape_cast %28 : vector<1x24x32xf32> to vector<24x32xf32>
    %30 = vector.shape_cast %27 : vector<24x32xf32> to vector<1x24x32xf32>
    tpu.vector_store %arg6[%c0_25, %c0_26, %c0_27], %30 {strides = array<i32>} : memref<1x24x32xf32, #tpu.memory_space<vmem>>, vector<1x24x32xf32>,
    return
  }
  func.func @transform_0(%arg0: i32) -> (i32, i32, i32) {
    %c0_i32 = arith.constant 0 : i32
    %c0_i32_0 = arith.constant 0 : i32
    %c0_i32_1 = arith.constant 0 : i32
    return %arg0, %c0_i32, %c0_i32_0 : i32, i32, i32
  }
  func.func @transform_1(%arg0: i32) -> (i32, i32, i32) {
    %c0_i32 = arith.constant 0 : i32
    %c0_i32_0 = arith.constant 0 : i32
    %c0_i32_1 = arith.constant 0 : i32
    return %arg0, %c0_i32, %c0_i32_0 : i32, i32, i32
  }
  func.func @transform_2(%arg0: i32) -> (i32, i32, i32) {
    %c0_i32 = arith.constant 0 : i32
    %c0_i32_0 = arith.constant 0 : i32
    %c0_i32_1 = arith.constant 0 : i32
    %c0_i32_2 = arith.constant 0 : i32
    return %c0_i32, %c0_i32_0, %c0_i32_1 : i32, i32, i32
  }
  func.func @transform_3(%arg0: i32) -> (i32, i32, i32) {
    %c0_i32 = arith.constant 0 : i32
    %c0_i32_0 = arith.constant 0 : i32
    %c0_i32_1 = arith.constant 0 : i32
    %c0_i32_2 = arith.constant 0 : i32
    return %c0_i32, %c0_i32_0, %c0_i32_1 : i32, i32, i32
  }
  func.func @transform_4(%arg0: i32) -> (i32, i32) {
    %c0_i32 = arith.constant 0 : i32
    %c0_i32_0 = arith.constant 0 : i32
    %c0_i32_1 = arith.constant 0 : i32
    return %c0_i32, %c0_i32_0 : i32, i32
  }
  func.func @transform_5(%arg0: i32) -> (i32, i32, i32) {
    %c0_i32 = arith.constant 0 : i32
    %c0_i32_0 = arith.constant 0 : i32
    %c0_i32_1 = arith.constant 0 : i32
    return %arg0, %c0_i32, %c0_i32_0 : i32, i32, i32
  }
}

module attributes {stable_mosaic.version = 11 : i64} {
  func.func @_linear_kernel(%arg0: i32, %arg1: memref<24x32xbf16, #tpu.memory_space<vmem>>, %arg2: memref<32x32xbf16, #tpu.memory_space<vmem>>, %arg3: memref<1x32xf32, #tpu.memory_space<vmem>>, %arg4: memref<24x32xf32, #tpu.memory_space<vmem>>) attributes {dimension_semantics = [#tpu.dimension_semantics<parallel>], iteration_bounds = array<i64: 2>, scalar_prefetch = 0 : i64, scratch_operands = 0 : i64, tpu.core_type = #tpu.core_type<tc>, window_params = [{transform_indices = @transform_0, window_bounds = array<i64: 24, 32>}, {pipeline_mode = #tpu.pipeline_mode<synchronous>, transform_indices = @transform_1, window_bounds = array<i64: 32, 32>}, {pipeline_mode = #tpu.pipeline_mode<synchronous>, transform_indices = @transform_2, window_bounds = array<i64: 1, 32>}, {transform_indices = @transform_3, window_bounds = array<i64: 24, 32>}]} {
    %c0 = arith.constant 0 : index
    %c0_0 = arith.constant 0 : index
    %0 = vector.load %arg1[%c0, %c0_0] : memref<24x32xbf16, #tpu.memory_space<vmem>>, vector<24x32xbf16>
    %c0_1 = arith.constant 0 : index
    %c0_2 = arith.constant 0 : index
    %1 = vector.load %arg2[%c0_1, %c0_2] : memref<32x32xbf16, #tpu.memory_space<vmem>>, vector<32x32xbf16>
    %cst = arith.constant dense<0.000000e+00> : vector<24x32xf32>
    %2 = tpu.matmul %0, %1, %cst {dimension_numbers = #tpu.dot_dimension_numbers<[1], [0], [0], [1], [0, 0, 1, 1], [], []>} : vector<24x32xbf16>, vector<32x32xbf16>, vector<24x32xf32> -> vector<24x32xf32>
    %c0_3 = arith.constant 0 : index
    %c0_4 = arith.constant 0 : index
    %3 = vector.load %arg3[%c0_3, %c0_4] : memref<1x32xf32, #tpu.memory_space<vmem>>, vector<1x32xf32>
    %4 = vector.broadcast %3 : vector<1x32xf32> to vector<24x32xf32>
    %5 = arith.addf %2, %4 : vector<24x32xf32>
    %c0_5 = arith.constant 0 : index
    %c0_6 = arith.constant 0 : index
    %6 = vector.load %arg4[%c0_5, %c0_6] : memref<24x32xf32, #tpu.memory_space<vmem>>, vector<24x32xf32>
    tpu.vector_store %arg4[%c0_5, %c0_6], %5 {strides = array<i32>} : memref<24x32xf32, #tpu.memory_space<vmem>>, vector<24x32xf32>,
    return
  }
  func.func @transform_0(%arg0: i32) -> (i32, i32) {
    %c0_i32 = arith.constant 0 : i32
    %c0_i32_0 = arith.constant 0 : i32
    return %arg0, %c0_i32 : i32, i32
  }
  func.func @transform_1(%arg0: i32) -> (i32, i32) {
    %c0_i32 = arith.constant 0 : i32
    %c0_i32_0 = arith.constant 0 : i32
    %c0_i32_1 = arith.constant 0 : i32
    return %c0_i32, %c0_i32_0 : i32, i32
  }
  func.func @transform_2(%arg0: i32) -> (i32, i32) {
    %c0_i32 = arith.constant 0 : i32
    %c0_i32_0 = arith.constant 0 : i32
    %c0_i32_1 = arith.constant 0 : i32
    return %c0_i32, %c0_i32_0 : i32, i32
  }
  func.func @transform_3(%arg0: i32) -> (i32, i32) {
    %c0_i32 = arith.constant 0 : i32
    %c0_i32_0 = arith.constant 0 : i32
    return %arg0, %c0_i32 : i32, i32
  }
}

module attributes {stable_mosaic.version = 11 : i64} {
  func.func @_proj_add_decomp_kernel(%arg0: i32, %arg1: memref<1x24x32xf32, #tpu.memory_space<vmem>>, %arg2: memref<1x24x32xf32, #tpu.memory_space<vmem>>, %arg3: memref<32x32xbf16, #tpu.memory_space<vmem>>, %arg4: memref<1x32xf32, #tpu.memory_space<vmem>>, %arg5: memref<24x24xf32, #tpu.memory_space<vmem>>, %arg6: memref<1x24x32xf32, #tpu.memory_space<vmem>>, %arg7: memref<1x24x32xf32, #tpu.memory_space<vmem>>) attributes {dimension_semantics = [#tpu.dimension_semantics<parallel>], iteration_bounds = array<i64: 2>, scalar_prefetch = 0 : i64, scratch_operands = 0 : i64, tpu.core_type = #tpu.core_type<tc>, window_params = [{transform_indices = @transform_0, window_bounds = array<i64: 1, 24, 32>}, {transform_indices = @transform_1, window_bounds = array<i64: 1, 24, 32>}, {pipeline_mode = #tpu.pipeline_mode<synchronous>, transform_indices = @transform_2, window_bounds = array<i64: 32, 32>}, {pipeline_mode = #tpu.pipeline_mode<synchronous>, transform_indices = @transform_3, window_bounds = array<i64: 1, 32>}, {pipeline_mode = #tpu.pipeline_mode<synchronous>, transform_indices = @transform_4, window_bounds = array<i64: 24, 24>}, {transform_indices = @transform_5, window_bounds = array<i64: 1, 24, 32>}, {transform_indices = @transform_6, window_bounds = array<i64: 1, 24, 32>}]} {
    %c0 = arith.constant 0 : index
    %c0_0 = arith.constant 0 : index
    %c0_1 = arith.constant 0 : index
    %0 = vector.load %arg2[%c0, %c0_0, %c0_1] : memref<1x24x32xf32, #tpu.memory_space<vmem>>, vector<1x24x32xf32>
    %1 = vector.shape_cast %0 : vector<1x24x32xf32> to vector<24x32xf32>
    %c0_2 = arith.constant 0 : index
    %c0_3 = arith.constant 0 : index
    %c0_4 = arith.constant 0 : index
    %2 = vector.load %arg1[%c0_2, %c0_3, %c0_4] : memref<1x24x32xf32, #tpu.memory_space<vmem>>, vector<1x24x32xf32>
    %3 = vector.shape_cast %2 : vector<1x24x32xf32> to vector<24x32xf32>
    %c0_5 = arith.constant 0 : index
    %c0_6 = arith.constant 0 : index
    %4 = vector.load %arg3[%c0_5, %c0_6] : memref<32x32xbf16, #tpu.memory_space<vmem>>, vector<32x32xbf16>
    %5 = arith.truncf %3 : vector<24x32xf32> to vector<24x32xbf16>
    %cst = arith.constant dense<0.000000e+00> : vector<24x32xf32>
    %6 = tpu.matmul %5, %4, %cst {dimension_numbers = #tpu.dot_dimension_numbers<[1], [0], [0], [1], [0, 0, 1, 1], [], []>} : vector<24x32xbf16>, vector<32x32xbf16>, vector<24x32xf32> -> vector<24x32xf32>
    %7 = arith.addf %1, %6 : vector<24x32xf32>
    %c0_7 = arith.constant 0 : index
    %c0_8 = arith.constant 0 : index
    %8 = vector.load %arg4[%c0_7, %c0_8] : memref<1x32xf32, #tpu.memory_space<vmem>>, vector<1x32xf32>
    %9 = vector.broadcast %8 : vector<1x32xf32> to vector<24x32xf32>
    %10 = arith.addf %7, %9 : vector<24x32xf32>
    %c0_9 = arith.constant 0 : index
    %c0_10 = arith.constant 0 : index
    %11 = vector.load %arg5[%c0_9, %c0_10] : memref<24x24xf32, #tpu.memory_space<vmem>>, vector<24x24xf32>
    %cst_11 = arith.constant dense<0.000000e+00> : vector<24x32xf32>
    %12 = tpu.matmul %11, %10, %cst_11 {dimension_numbers = #tpu.dot_dimension_numbers<[1], [0], [0], [1], [0, 0, 1, 1], [], []>} : vector<24x24xf32>, vector<24x32xf32>, vector<24x32xf32> -> vector<24x32xf32>
    %13 = arith.subf %10, %12 : vector<24x32xf32>
    %c0_12 = arith.constant 0 : index
    %c0_13 = arith.constant 0 : index
    %c0_14 = arith.constant 0 : index
    %14 = vector.load %arg6[%c0_12, %c0_13, %c0_14] : memref<1x24x32xf32, #tpu.memory_space<vmem>>, vector<1x24x32xf32>
    %15 = vector.shape_cast %14 : vector<1x24x32xf32> to vector<24x32xf32>
    %16 = vector.shape_cast %13 : vector<24x32xf32> to vector<1x24x32xf32>
    tpu.vector_store %arg6[%c0_12, %c0_13, %c0_14], %16 {strides = array<i32>} : memref<1x24x32xf32, #tpu.memory_space<vmem>>, vector<1x24x32xf32>,
    %c0_15 = arith.constant 0 : index
    %c0_16 = arith.constant 0 : index
    %c0_17 = arith.constant 0 : index
    %17 = vector.load %arg7[%c0_15, %c0_16, %c0_17] : memref<1x24x32xf32, #tpu.memory_space<vmem>>, vector<1x24x32xf32>
    %18 = vector.shape_cast %17 : vector<1x24x32xf32> to vector<24x32xf32>
    %19 = vector.shape_cast %12 : vector<24x32xf32> to vector<1x24x32xf32>
    tpu.vector_store %arg7[%c0_15, %c0_16, %c0_17], %19 {strides = array<i32>} : memref<1x24x32xf32, #tpu.memory_space<vmem>>, vector<1x24x32xf32>,
    return
  }
  func.func @transform_0(%arg0: i32) -> (i32, i32, i32) {
    %c0_i32 = arith.constant 0 : i32
    %c0_i32_0 = arith.constant 0 : i32
    %c0_i32_1 = arith.constant 0 : i32
    return %arg0, %c0_i32, %c0_i32_0 : i32, i32, i32
  }
  func.func @transform_1(%arg0: i32) -> (i32, i32, i32) {
    %c0_i32 = arith.constant 0 : i32
    %c0_i32_0 = arith.constant 0 : i32
    %c0_i32_1 = arith.constant 0 : i32
    return %arg0, %c0_i32, %c0_i32_0 : i32, i32, i32
  }
  func.func @transform_2(%arg0: i32) -> (i32, i32) {
    %c0_i32 = arith.constant 0 : i32
    %c0_i32_0 = arith.constant 0 : i32
    %c0_i32_1 = arith.constant 0 : i32
    return %c0_i32, %c0_i32_0 : i32, i32
  }
  func.func @transform_3(%arg0: i32) -> (i32, i32) {
    %c0_i32 = arith.constant 0 : i32
    %c0_i32_0 = arith.constant 0 : i32
    %c0_i32_1 = arith.constant 0 : i32
    return %c0_i32, %c0_i32_0 : i32, i32
  }
  func.func @transform_4(%arg0: i32) -> (i32, i32) {
    %c0_i32 = arith.constant 0 : i32
    %c0_i32_0 = arith.constant 0 : i32
    %c0_i32_1 = arith.constant 0 : i32
    return %c0_i32, %c0_i32_0 : i32, i32
  }
  func.func @transform_5(%arg0: i32) -> (i32, i32, i32) {
    %c0_i32 = arith.constant 0 : i32
    %c0_i32_0 = arith.constant 0 : i32
    %c0_i32_1 = arith.constant 0 : i32
    return %arg0, %c0_i32, %c0_i32_0 : i32, i32, i32
  }
  func.func @transform_6(%arg0: i32) -> (i32, i32, i32) {
    %c0_i32 = arith.constant 0 : i32
    %c0_i32_0 = arith.constant 0 : i32
    %c0_i32_1 = arith.constant 0 : i32
    return %arg0, %c0_i32, %c0_i32_0 : i32, i32, i32
  }
}

module attributes {stable_mosaic.version = 11 : i64} {
  func.func @_dec_layer_post_kernel(%arg0: i32, %arg1: memref<1x24x32xf32, #tpu.memory_space<vmem>>, %arg2: memref<1x24x32xf32, #tpu.memory_space<vmem>>, %arg3: memref<32x32xbf16, #tpu.memory_space<vmem>>, %arg4: memref<1x32xf32, #tpu.memory_space<vmem>>, %arg5: memref<32x64xbf16, #tpu.memory_space<vmem>>, %arg6: memref<64x32xbf16, #tpu.memory_space<vmem>>, %arg7: memref<24x24xf32, #tpu.memory_space<vmem>>, %arg8: memref<1x24x32xf32, #tpu.memory_space<vmem>>, %arg9: memref<1x24x7xf32, #tpu.memory_space<vmem>>, %arg10: memref<2x24x24xf32, #tpu.memory_space<vmem>>, %arg11: memref<3x32x7xbf16, #tpu.memory_space<vmem>>, %arg12: memref<1x24x32xf32, #tpu.memory_space<vmem>>, %arg13: memref<1x24x7xf32, #tpu.memory_space<vmem>>) attributes {dimension_semantics = [#tpu.dimension_semantics<parallel>], iteration_bounds = array<i64: 2>, scalar_prefetch = 0 : i64, scratch_operands = 0 : i64, tpu.core_type = #tpu.core_type<tc>, window_params = [{transform_indices = @transform_0, window_bounds = array<i64: 1, 24, 32>}, {transform_indices = @transform_1, window_bounds = array<i64: 1, 24, 32>}, {pipeline_mode = #tpu.pipeline_mode<synchronous>, transform_indices = @transform_2, window_bounds = array<i64: 32, 32>}, {pipeline_mode = #tpu.pipeline_mode<synchronous>, transform_indices = @transform_3, window_bounds = array<i64: 1, 32>}, {pipeline_mode = #tpu.pipeline_mode<synchronous>, transform_indices = @transform_4, window_bounds = array<i64: 32, 64>}, {pipeline_mode = #tpu.pipeline_mode<synchronous>, transform_indices = @transform_5, window_bounds = array<i64: 64, 32>}, {pipeline_mode = #tpu.pipeline_mode<synchronous>, transform_indices = @transform_6, window_bounds = array<i64: 24, 24>}, {transform_indices = @transform_7, window_bounds = array<i64: 1, 24, 32>}, {transform_indices = @transform_8, window_bounds = array<i64: 1, 24, 7>}, {pipeline_mode = #tpu.pipeline_mode<synchronous>, transform_indices = @transform_9, window_bounds = array<i64: 2, 24, 24>}, {pipeline_mode = #tpu.pipeline_mode<synchronous>, transform_indices = @transform_10, window_bounds = array<i64: 3, 32, 7>}, {transform_indices = @transform_11, window_bounds = array<i64: 1, 24, 32>}, {transform_indices = @transform_12, window_bounds = array<i64: 1, 24, 7>}]} {
    %c0 = arith.constant 0 : index
    %c0_0 = arith.constant 0 : index
    %0 = vector.load %arg7[%c0, %c0_0] : memref<24x24xf32, #tpu.memory_space<vmem>>, vector<24x24xf32>
    %c0_1 = arith.constant 0 : index
    %c0_2 = arith.constant 0 : index
    %c0_3 = arith.constant 0 : index
    %1 = vector.load %arg2[%c0_1, %c0_2, %c0_3] : memref<1x24x32xf32, #tpu.memory_space<vmem>>, vector<1x24x32xf32>
    %2 = vector.shape_cast %1 : vector<1x24x32xf32> to vector<24x32xf32>
    %c0_4 = arith.constant 0 : index
    %c0_5 = arith.constant 0 : index
    %c0_6 = arith.constant 0 : index
    %3 = vector.load %arg1[%c0_4, %c0_5, %c0_6] : memref<1x24x32xf32, #tpu.memory_space<vmem>>, vector<1x24x32xf32>
    %4 = vector.shape_cast %3 : vector<1x24x32xf32> to vector<24x32xf32>
    %c0_7 = arith.constant 0 : index
    %c0_8 = arith.constant 0 : index
    %5 = vector.load %arg3[%c0_7, %c0_8] : memref<32x32xbf16, #tpu.memory_space<vmem>>, vector<32x32xbf16>
    %6 = arith.truncf %4 : vector<24x32xf32> to vector<24x32xbf16>
    %cst = arith.constant dense<0.000000e+00> : vector<24x32xf32>
    %7 = tpu.matmul %6, %5, %cst {dimension_numbers = #tpu.dot_dimension_numbers<[1], [0], [0], [1], [0, 0, 1, 1], [], []>} : vector<24x32xbf16>, vector<32x32xbf16>, vector<24x32xf32> -> vector<24x32xf32>
    %8 = arith.addf %2, %7 : vector<24x32xf32>
    %c0_9 = arith.constant 0 : index
    %c0_10 = arith.constant 0 : index
    %9 = vector.load %arg4[%c0_9, %c0_10] : memref<1x32xf32, #tpu.memory_space<vmem>>, vector<1x32xf32>
    %10 = vector.broadcast %9 : vector<1x32xf32> to vector<24x32xf32>
    %11 = arith.addf %8, %10 : vector<24x32xf32>
    %cst_11 = arith.constant dense<0.000000e+00> : vector<24x32xf32>
    %12 = tpu.matmul %0, %11, %cst_11 {dimension_numbers = #tpu.dot_dimension_numbers<[1], [0], [0], [1], [0, 0, 1, 1], [], []>} : vector<24x24xf32>, vector<24x32xf32>, vector<24x32xf32> -> vector<24x32xf32>
    %13 = arith.subf %11, %12 : vector<24x32xf32>
    %c0_12 = arith.constant 0 : index
    %c0_13 = arith.constant 0 : index
    %14 = vector.load %arg5[%c0_12, %c0_13] : memref<32x64xbf16, #tpu.memory_space<vmem>>, vector<32x64xbf16>
    %15 = arith.truncf %13 : vector<24x32xf32> to vector<24x32xbf16>
    %cst_14 = arith.constant dense<0.000000e+00> : vector<24x64xf32>
    %16 = tpu.matmul %15, %14, %cst_14 {dimension_numbers = #tpu.dot_dimension_numbers<[1], [0], [0], [1], [0, 0, 1, 1], [], []>} : vector<24x32xbf16>, vector<32x64xbf16>, vector<24x64xf32> -> vector<24x64xf32>
    %cst_15 = arith.constant 0.000000e+00 : f32
    %17 = vector.broadcast %cst_15 : f32 to vector<24x64xf32>
    %18 = arith.maximumf %16, %17 : vector<24x64xf32>
    %c0_16 = arith.constant 0 : index
    %c0_17 = arith.constant 0 : index
    %19 = vector.load %arg6[%c0_16, %c0_17] : memref<64x32xbf16, #tpu.memory_space<vmem>>, vector<64x32xbf16>
    %20 = arith.truncf %18 : vector<24x64xf32> to vector<24x64xbf16>
    %cst_18 = arith.constant dense<0.000000e+00> : vector<24x32xf32>
    %21 = tpu.matmul %20, %19, %cst_18 {dimension_numbers = #tpu.dot_dimension_numbers<[1], [0], [0], [1], [0, 0, 1, 1], [], []>} : vector<24x64xbf16>, vector<64x32xbf16>, vector<24x32xf32> -> vector<24x32xf32>
    %22 = arith.addf %13, %21 : vector<24x32xf32>
    %cst_19 = arith.constant dense<0.000000e+00> : vector<24x32xf32>
    %23 = tpu.matmul %0, %22, %cst_19 {dimension_numbers = #tpu.dot_dimension_numbers<[1], [0], [0], [1], [0, 0, 1, 1], [], []>} : vector<24x24xf32>, vector<24x32xf32>, vector<24x32xf32> -> vector<24x32xf32>
    %24 = arith.subf %22, %23 : vector<24x32xf32>
    %c0_20 = arith.constant 0 : index
    %c0_21 = arith.constant 0 : index
    %c0_22 = arith.constant 0 : index
    %25 = vector.load %arg12[%c0_20, %c0_21, %c0_22] : memref<1x24x32xf32, #tpu.memory_space<vmem>>, vector<1x24x32xf32>
    %26 = vector.shape_cast %25 : vector<1x24x32xf32> to vector<24x32xf32>
    %27 = vector.shape_cast %24 : vector<24x32xf32> to vector<1x24x32xf32>
    tpu.vector_store %arg12[%c0_20, %c0_21, %c0_22], %27 {strides = array<i32>} : memref<1x24x32xf32, #tpu.memory_space<vmem>>, vector<1x24x32xf32>,
    %c0_23 = arith.constant 0 : index
    %c0_24 = arith.constant 0 : index
    %c0_25 = arith.constant 0 : index
    %28 = vector.load %arg8[%c0_23, %c0_24, %c0_25] : memref<1x24x32xf32, #tpu.memory_space<vmem>>, vector<1x24x32xf32>
    %29 = vector.shape_cast %28 : vector<1x24x32xf32> to vector<24x32xf32>
    %30 = arith.addf %29, %12 : vector<24x32xf32>
    %31 = arith.addf %30, %23 : vector<24x32xf32>
    %c0_26 = arith.constant 0 : index
    %c0_27 = arith.constant 0 : index
    %c0_28 = arith.constant 0 : index
    %32 = vector.load %arg10[%c0_26, %c0_27, %c0_28] : memref<2x24x24xf32, #tpu.memory_space<vmem>>, vector<1x24x24xf32>
    %33 = vector.shape_cast %32 : vector<1x24x24xf32> to vector<24x24xf32>
    %cst_29 = arith.constant dense<0.000000e+00> : vector<24x32xf32>
    %34 = tpu.matmul %33, %31, %cst_29 {dimension_numbers = #tpu.dot_dimension_numbers<[1], [0], [0], [1], [0, 0, 1, 1], [], []>} : vector<24x24xf32>, vector<24x32xf32>, vector<24x32xf32> -> vector<24x32xf32>
    %c1 = arith.constant 1 : index
    %c0_30 = arith.constant 0 : index
    %c0_31 = arith.constant 0 : index
    %35 = vector.load %arg10[%c1, %c0_30, %c0_31] : memref<2x24x24xf32, #tpu.memory_space<vmem>>, vector<1x24x24xf32>
    %36 = vector.shape_cast %35 : vector<1x24x24xf32> to vector<24x24xf32>
    %cst_32 = arith.constant dense<0.000000e+00> : vector<24x32xf32>
    %37 = tpu.matmul %36, %31, %cst_32 {dimension_numbers = #tpu.dot_dimension_numbers<[1], [0], [0], [1], [0, 0, 1, 1], [], []>} : vector<24x24xf32>, vector<24x32xf32>, vector<24x32xf32> -> vector<24x32xf32>
    %c0_33 = arith.constant 0 : index
    %c0_34 = arith.constant 0 : index
    %c0_35 = arith.constant 0 : index
    %38 = vector.load %arg11[%c0_33, %c0_34, %c0_35] : memref<3x32x7xbf16, #tpu.memory_space<vmem>>, vector<1x32x7xbf16>
    %39 = vector.shape_cast %38 : vector<1x32x7xbf16> to vector<32x7xbf16>
    %40 = arith.truncf %34 : vector<24x32xf32> to vector<24x32xbf16>
    %cst_36 = arith.constant dense<0.000000e+00> : vector<24x7xf32>
    %41 = tpu.matmul %40, %39, %cst_36 {dimension_numbers = #tpu.dot_dimension_numbers<[1], [0], [0], [1], [0, 0, 1, 1], [], []>} : vector<24x32xbf16>, vector<32x7xbf16>, vector<24x7xf32> -> vector<24x7xf32>
    %c1_37 = arith.constant 1 : index
    %c0_38 = arith.constant 0 : index
    %c0_39 = arith.constant 0 : index
    %42 = vector.load %arg11[%c1_37, %c0_38, %c0_39] : memref<3x32x7xbf16, #tpu.memory_space<vmem>>, vector<1x32x7xbf16>
    %43 = vector.shape_cast %42 : vector<1x32x7xbf16> to vector<32x7xbf16>
    %44 = arith.truncf %31 : vector<24x32xf32> to vector<24x32xbf16>
    %cst_40 = arith.constant dense<0.000000e+00> : vector<24x7xf32>
    %45 = tpu.matmul %44, %43, %cst_40 {dimension_numbers = #tpu.dot_dimension_numbers<[1], [0], [0], [1], [0, 0, 1, 1], [], []>} : vector<24x32xbf16>, vector<32x7xbf16>, vector<24x7xf32> -> vector<24x7xf32>
    %46 = arith.addf %41, %45 : vector<24x7xf32>
    %c2 = arith.constant 2 : index
    %c0_41 = arith.constant 0 : index
    %c0_42 = arith.constant 0 : index
    %47 = vector.load %arg11[%c2, %c0_41, %c0_42] : memref<3x32x7xbf16, #tpu.memory_space<vmem>>, vector<1x32x7xbf16>
    %48 = vector.shape_cast %47 : vector<1x32x7xbf16> to vector<32x7xbf16>
    %49 = arith.truncf %37 : vector<24x32xf32> to vector<24x32xbf16>
    %cst_43 = arith.constant dense<0.000000e+00> : vector<24x7xf32>
    %50 = tpu.matmul %49, %48, %cst_43 {dimension_numbers = #tpu.dot_dimension_numbers<[1], [0], [0], [1], [0, 0, 1, 1], [], []>} : vector<24x32xbf16>, vector<32x7xbf16>, vector<24x7xf32> -> vector<24x7xf32>
    %51 = arith.addf %46, %50 : vector<24x7xf32>
    %c0_44 = arith.constant 0 : index
    %c0_45 = arith.constant 0 : index
    %c0_46 = arith.constant 0 : index
    %52 = vector.load %arg9[%c0_44, %c0_45, %c0_46] : memref<1x24x7xf32, #tpu.memory_space<vmem>>, vector<1x24x7xf32>
    %53 = vector.shape_cast %52 : vector<1x24x7xf32> to vector<24x7xf32>
    %54 = arith.addf %53, %51 : vector<24x7xf32>
    %c0_47 = arith.constant 0 : index
    %c0_48 = arith.constant 0 : index
    %c0_49 = arith.constant 0 : index
    %55 = vector.load %arg13[%c0_47, %c0_48, %c0_49] : memref<1x24x7xf32, #tpu.memory_space<vmem>>, vector<1x24x7xf32>
    %56 = vector.shape_cast %55 : vector<1x24x7xf32> to vector<24x7xf32>
    %57 = vector.shape_cast %54 : vector<24x7xf32> to vector<1x24x7xf32>
    tpu.vector_store %arg13[%c0_47, %c0_48, %c0_49], %57 {strides = array<i32>} : memref<1x24x7xf32, #tpu.memory_space<vmem>>, vector<1x24x7xf32>,
    return
  }
  func.func @transform_0(%arg0: i32) -> (i32, i32, i32) {
    %c0_i32 = arith.constant 0 : i32
    %c0_i32_0 = arith.constant 0 : i32
    %c0_i32_1 = arith.constant 0 : i32
    return %arg0, %c0_i32, %c0_i32_0 : i32, i32, i32
  }
  func.func @transform_1(%arg0: i32) -> (i32, i32, i32) {
    %c0_i32 = arith.constant 0 : i32
    %c0_i32_0 = arith.constant 0 : i32
    %c0_i32_1 = arith.constant 0 : i32
    return %arg0, %c0_i32, %c0_i32_0 : i32, i32, i32
  }
  func.func @transform_2(%arg0: i32) -> (i32, i32) {
    %c0_i32 = arith.constant 0 : i32
    %c0_i32_0 = arith.constant 0 : i32
    %c0_i32_1 = arith.constant 0 : i32
    return %c0_i32, %c0_i32_0 : i32, i32
  }
  func.func @transform_3(%arg0: i32) -> (i32, i32) {
    %c0_i32 = arith.constant 0 : i32
    %c0_i32_0 = arith.constant 0 : i32
    %c0_i32_1 = arith.constant 0 : i32
    return %c0_i32, %c0_i32_0 : i32, i32
  }
  func.func @transform_4(%arg0: i32) -> (i32, i32) {
    %c0_i32 = arith.constant 0 : i32
    %c0_i32_0 = arith.constant 0 : i32
    %c0_i32_1 = arith.constant 0 : i32
    return %c0_i32, %c0_i32_0 : i32, i32
  }
  func.func @transform_5(%arg0: i32) -> (i32, i32) {
    %c0_i32 = arith.constant 0 : i32
    %c0_i32_0 = arith.constant 0 : i32
    %c0_i32_1 = arith.constant 0 : i32
    return %c0_i32, %c0_i32_0 : i32, i32
  }
  func.func @transform_6(%arg0: i32) -> (i32, i32) {
    %c0_i32 = arith.constant 0 : i32
    %c0_i32_0 = arith.constant 0 : i32
    %c0_i32_1 = arith.constant 0 : i32
    return %c0_i32, %c0_i32_0 : i32, i32
  }
  func.func @transform_7(%arg0: i32) -> (i32, i32, i32) {
    %c0_i32 = arith.constant 0 : i32
    %c0_i32_0 = arith.constant 0 : i32
    %c0_i32_1 = arith.constant 0 : i32
    return %arg0, %c0_i32, %c0_i32_0 : i32, i32, i32
  }
  func.func @transform_8(%arg0: i32) -> (i32, i32, i32) {
    %c0_i32 = arith.constant 0 : i32
    %c0_i32_0 = arith.constant 0 : i32
    %c0_i32_1 = arith.constant 0 : i32
    return %arg0, %c0_i32, %c0_i32_0 : i32, i32, i32
  }
  func.func @transform_9(%arg0: i32) -> (i32, i32, i32) {
    %c0_i32 = arith.constant 0 : i32
    %c0_i32_0 = arith.constant 0 : i32
    %c0_i32_1 = arith.constant 0 : i32
    %c0_i32_2 = arith.constant 0 : i32
    return %c0_i32, %c0_i32_0, %c0_i32_1 : i32, i32, i32
  }
  func.func @transform_10(%arg0: i32) -> (i32, i32, i32) {
    %c0_i32 = arith.constant 0 : i32
    %c0_i32_0 = arith.constant 0 : i32
    %c0_i32_1 = arith.constant 0 : i32
    %c0_i32_2 = arith.constant 0 : i32
    return %c0_i32, %c0_i32_0, %c0_i32_1 : i32, i32, i32
  }
  func.func @transform_11(%arg0: i32) -> (i32, i32, i32) {
    %c0_i32 = arith.constant 0 : i32
    %c0_i32_0 = arith.constant 0 : i32
    %c0_i32_1 = arith.constant 0 : i32
    return %arg0, %c0_i32, %c0_i32_0 : i32, i32, i32
  }
  func.func @transform_12(%arg0: i32) -> (i32, i32, i32) {
    %c0_i32 = arith.constant 0 : i32
    %c0_i32_0 = arith.constant 0 : i32
    %c0_i32_1 = arith.constant 0 : i32
    return %arg0, %c0_i32, %c0_i32_0 : i32, i32, i32
  }
}

module attributes {stable_mosaic.version = 11 : i64} {
  func.func @_final_kernel(%arg0: i32, %arg1: memref<1x24x32xf32, #tpu.memory_space<vmem>>, %arg2: memref<1x32xf32, #tpu.memory_space<vmem>>, %arg3: memref<1x32xf32, #tpu.memory_space<vmem>>, %arg4: memref<32x7xbf16, #tpu.memory_space<vmem>>, %arg5: memref<1x7xf32, #tpu.memory_space<vmem>>, %arg6: memref<1x24x7xf32, #tpu.memory_space<vmem>>, %arg7: memref<1x24x7xf32, #tpu.memory_space<vmem>>) attributes {dimension_semantics = [#tpu.dimension_semantics<parallel>], iteration_bounds = array<i64: 2>, scalar_prefetch = 0 : i64, scratch_operands = 0 : i64, tpu.core_type = #tpu.core_type<tc>, window_params = [{transform_indices = @transform_0, window_bounds = array<i64: 1, 24, 32>}, {pipeline_mode = #tpu.pipeline_mode<synchronous>, transform_indices = @transform_1, window_bounds = array<i64: 1, 32>}, {pipeline_mode = #tpu.pipeline_mode<synchronous>, transform_indices = @transform_2, window_bounds = array<i64: 1, 32>}, {pipeline_mode = #tpu.pipeline_mode<synchronous>, transform_indices = @transform_3, window_bounds = array<i64: 32, 7>}, {pipeline_mode = #tpu.pipeline_mode<synchronous>, transform_indices = @transform_4, window_bounds = array<i64: 1, 7>}, {transform_indices = @transform_5, window_bounds = array<i64: 1, 24, 7>}, {transform_indices = @transform_6, window_bounds = array<i64: 1, 24, 7>}]} {
    %c0 = arith.constant 0 : index
    %c0_0 = arith.constant 0 : index
    %c0_1 = arith.constant 0 : index
    %0 = vector.load %arg1[%c0, %c0_0, %c0_1] : memref<1x24x32xf32, #tpu.memory_space<vmem>>, vector<1x24x32xf32>
    %1 = vector.shape_cast %0 : vector<1x24x32xf32> to vector<24x32xf32>
    %cst = arith.constant dense<0.000000e+00> : vector<24xf32>
    %2 = vector.multi_reduction <add>, %1, %cst [1] : vector<24x32xf32> to vector<24xf32>
    %3 = vector.shape_cast %2 : vector<24xf32> to vector<24x1xf32>
    %cst_2 = arith.constant 3.200000e+01 : f32
    %4 = vector.broadcast %cst_2 : f32 to vector<24x1xf32>
    %5 = arith.divf %3, %4 : vector<24x1xf32>
    %6 = vector.broadcast %5 : vector<24x1xf32> to vector<24x32xf32>
    %7 = arith.subf %1, %6 : vector<24x32xf32>
    %8 = arith.mulf %7, %7 : vector<24x32xf32>
    %cst_3 = arith.constant dense<0.000000e+00> : vector<24xf32>
    %9 = vector.multi_reduction <add>, %8, %cst_3 [1] : vector<24x32xf32> to vector<24xf32>
    %10 = vector.shape_cast %9 : vector<24xf32> to vector<24x1xf32>
    %cst_4 = arith.constant 3.200000e+01 : f32
    %11 = vector.broadcast %cst_4 : f32 to vector<24x1xf32>
    %12 = arith.divf %10, %11 : vector<24x1xf32>
    %13 = vector.broadcast %5 : vector<24x1xf32> to vector<24x32xf32>
    %14 = arith.subf %1, %13 : vector<24x32xf32>
    %cst_5 = arith.constant 9.99999974E-6 : f32
    %15 = vector.broadcast %cst_5 : f32 to vector<24x1xf32>
    %16 = arith.addf %12, %15 : vector<24x1xf32>
    %17 = math.rsqrt %16 : vector<24x1xf32>
    %18 = vector.broadcast %17 : vector<24x1xf32> to vector<24x32xf32>
    %19 = arith.mulf %14, %18 : vector<24x32xf32>
    %c0_6 = arith.constant 0 : index
    %c0_7 = arith.constant 0 : index
    %20 = vector.load %arg2[%c0_6, %c0_7] : memref<1x32xf32, #tpu.memory_space<vmem>>, vector<1x32xf32>
    %21 = vector.broadcast %20 : vector<1x32xf32> to vector<24x32xf32>
    %22 = arith.mulf %19, %21 : vector<24x32xf32>
    %c0_8 = arith.constant 0 : index
    %c0_9 = arith.constant 0 : index
    %23 = vector.load %arg3[%c0_8, %c0_9] : memref<1x32xf32, #tpu.memory_space<vmem>>, vector<1x32xf32>
    %24 = vector.broadcast %23 : vector<1x32xf32> to vector<24x32xf32>
    %25 = arith.addf %22, %24 : vector<24x32xf32>
    %cst_10 = arith.constant dense<0.000000e+00> : vector<32xf32>
    %26 = vector.multi_reduction <add>, %25, %cst_10 [0] : vector<24x32xf32> to vector<32xf32>
    %27 = vector.shape_cast %26 : vector<32xf32> to vector<1x32xf32>
    %cst_11 = arith.constant 2.400000e+01 : f32
    %28 = vector.broadcast %cst_11 : f32 to vector<1x32xf32>
    %29 = arith.divf %27, %28 : vector<1x32xf32>
    %30 = vector.broadcast %29 : vector<1x32xf32> to vector<24x32xf32>
    %31 = arith.subf %25, %30 : vector<24x32xf32>
    %c0_12 = arith.constant 0 : index
    %c0_13 = arith.constant 0 : index
    %32 = vector.load %arg4[%c0_12, %c0_13] : memref<32x7xbf16, #tpu.memory_space<vmem>>, vector<32x7xbf16>
    %33 = arith.truncf %31 : vector<24x32xf32> to vector<24x32xbf16>
    %cst_14 = arith.constant dense<0.000000e+00> : vector<24x7xf32>
    %34 = tpu.matmul %33, %32, %cst_14 {dimension_numbers = #tpu.dot_dimension_numbers<[1], [0], [0], [1], [0, 0, 1, 1], [], []>} : vector<24x32xbf16>, vector<32x7xbf16>, vector<24x7xf32> -> vector<24x7xf32>
    %c0_15 = arith.constant 0 : index
    %c0_16 = arith.constant 0 : index
    %35 = vector.load %arg5[%c0_15, %c0_16] : memref<1x7xf32, #tpu.memory_space<vmem>>, vector<1x7xf32>
    %36 = vector.broadcast %35 : vector<1x7xf32> to vector<24x7xf32>
    %37 = arith.addf %34, %36 : vector<24x7xf32>
    %c0_17 = arith.constant 0 : index
    %c0_18 = arith.constant 0 : index
    %c0_19 = arith.constant 0 : index
    %38 = vector.load %arg6[%c0_17, %c0_18, %c0_19] : memref<1x24x7xf32, #tpu.memory_space<vmem>>, vector<1x24x7xf32>
    %39 = vector.shape_cast %38 : vector<1x24x7xf32> to vector<24x7xf32>
    %40 = arith.addf %37, %39 : vector<24x7xf32>
    %c0_20 = arith.constant 0 : index
    %c0_21 = arith.constant 0 : index
    %c0_22 = arith.constant 0 : index
    %41 = vector.load %arg7[%c0_20, %c0_21, %c0_22] : memref<1x24x7xf32, #tpu.memory_space<vmem>>, vector<1x24x7xf32>
    %42 = vector.shape_cast %41 : vector<1x24x7xf32> to vector<24x7xf32>
    %43 = vector.shape_cast %40 : vector<24x7xf32> to vector<1x24x7xf32>
    tpu.vector_store %arg7[%c0_20, %c0_21, %c0_22], %43 {strides = array<i32>} : memref<1x24x7xf32, #tpu.memory_space<vmem>>, vector<1x24x7xf32>,
    return
  }
  func.func @transform_0(%arg0: i32) -> (i32, i32, i32) {
    %c0_i32 = arith.constant 0 : i32
    %c0_i32_0 = arith.constant 0 : i32
    %c0_i32_1 = arith.constant 0 : i32
    return %arg0, %c0_i32, %c0_i32_0 : i32, i32, i32
  }
  func.func @transform_1(%arg0: i32) -> (i32, i32) {
    %c0_i32 = arith.constant 0 : i32
    %c0_i32_0 = arith.constant 0 : i32
    %c0_i32_1 = arith.constant 0 : i32
    return %c0_i32, %c0_i32_0 : i32, i32
  }
  func.func @transform_2(%arg0: i32) -> (i32, i32) {
    %c0_i32 = arith.constant 0 : i32
    %c0_i32_0 = arith.constant 0 : i32
    %c0_i32_1 = arith.constant 0 : i32
    return %c0_i32, %c0_i32_0 : i32, i32
  }
  func.func @transform_3(%arg0: i32) -> (i32, i32) {
    %c0_i32 = arith.constant 0 : i32
    %c0_i32_0 = arith.constant 0 : i32
    %c0_i32_1 = arith.constant 0 : i32
    return %c0_i32, %c0_i32_0 : i32, i32
  }
  func.func @transform_4(%arg0: i32) -> (i32, i32) {
    %c0_i32 = arith.constant 0 : i32
    %c0_i32_0 = arith.constant 0 : i32
    %c0_i32_1 = arith.constant 0 : i32
    return %c0_i32, %c0_i32_0 : i32, i32
  }
  func.func @transform_5(%arg0: i32) -> (i32, i32, i32) {
    %c0_i32 = arith.constant 0 : i32
    %c0_i32_0 = arith.constant 0 : i32
    %c0_i32_1 = arith.constant 0 : i32
    return %arg0, %c0_i32, %c0_i32_0 : i32, i32, i32
  }
  func.func @transform_6(%arg0: i32) -> (i32, i32, i32) {
    %c0_i32 = arith.constant 0 : i32
    %c0_i32_0 = arith.constant 0 : i32
    %c0_i32_1 = arith.constant 0 : i32
    return %arg0, %c0_i32, %c0_i32_0 : i32, i32, i32
  }
}

</mosaic_0001>

<bundles_post_ra>
// kernel: reverse.11
= control target key start
LH: loop header
LB: loop body
LE: loop exit
PB: predicated region body
PF: predicated region fallthrough
CT: control target
= control target key end

     0   :  { %v2_v0 = vlaneseq  ;;  %s241_s0 = inlined_call_operand.vmem [shape: f32[2,4,8,7], index: 0, kind: input, shape index: {}]   ;;  %s242_s1 = inlined_call_operand.vmem [shape: f32[2,4,8,7], index: 1, kind: output, shape index: {}]  }
   0x1   :  { %v51_v2 = vld [vmem:[%s241_s0 + $0x10] sm:$0xff]  ;;  %v47_v3 = vld [vmem:[%s241_s0] sm:$0xff]  ;;  %v53_v5 = vld [vmem:[%s241_s0 + $0x18] sm:$0xff] }
   0x2   :  { %v3_v1 = vsub.s32 6, %v2_v0  ;;  %v55_v4 = vld [vmem:[%s241_s0 + $0x20] sm:$0xff]  ;;  %v49_v6 = vld [vmem:[%s241_s0 + $0x8] sm:$0xff]  ;;  %v61_v8 = vld [vmem:[%s241_s0 + $0x38] sm:$0xff] }
   0x3   :  { %v57_v7 = vld [vmem:[%s241_s0 + $0x28] sm:$0xff]  ;;  %v59_v9 = vld [vmem:[%s241_s0 + $0x30] sm:$0xff] }
   0x4   :  { %4 = vset.pattern.permute.xlu0 %v3_v1  ;;  %181 = vset.pattern.permute.xlu1 %v3_v1 }
   0x5   :  { %182 = vset.pattern.permute.xlu2 %v3_v1  ;;  %79 = vperm.xlu1 %181, %v51_v2  }
   0x6   :  { %67 = vperm.xlu0 %4, %v47_v3   ;;  %91 = vperm.xlu2 %182, %v55_v4  }
   0xd   :  { %85 = vperm.xlu1 %181, %v53_v5  }
   0xe   :  { %73 = vperm.xlu0 %4, %v49_v6   ;;  %97 = vperm.xlu2 %182, %v57_v7  }
  0x15   :  { %109 = vperm.xlu1 %181, %v61_v8  }
  0x16   :  { %103 = vperm.xlu0 %4, %v59_v9  }
  0x60   :  { %v92_v10 = vpop.permute.xlu2 %91 }
  0x61   :  { %163 = vst [vmem:[%s242_s1 + $0x20] sm:$0xff] %v92_v10 }
  0x68   :  { %v98_v11 = vpop.permute.xlu2 %97 }
  0x69   :  { %165 = vst [vmem:[%s242_s1 + $0x28] sm:$0xff] %v98_v11 }
  0x77   :  { %v80_v12 = vpop.permute.xlu1 %79 }
  0x78   :  { %v68_v13 = vpop.permute.xlu0 %67  ;;  %159 = vst [vmem:[%s242_s1 + $0x10] sm:$0xff] %v80_v12 }
  0x79   :  { %155 = vst [vmem:[%s242_s1] sm:$0xff] %v68_v13 }
  0x7f   :  { %v86_v14 = vpop.permute.xlu1 %85 }
  0x80   :  { %v74_v15 = vpop.permute.xlu0 %73  ;;  %161 = vst [vmem:[%s242_s1 + $0x18] sm:$0xff] %v86_v14 }
  0x81   :  { %157 = vst [vmem:[%s242_s1 + $0x8] sm:$0xff] %v74_v15 }
  0x87   :  { %v110_v16 = vpop.permute.xlu1 %109 }
  0x88   :  { %v104_v17 = vpop.permute.xlu0 %103  ;;  %169 = vst [vmem:[%s242_s1 + $0x38] sm:$0xff] %v110_v16 }
  0x89   :  { %167 = vst [vmem:[%s242_s1 + $0x30] sm:$0xff] %v104_v17 }

// kernel: autoformer_forward.15
= control target key start
LH: loop header
LB: loop body
LE: loop exit
PB: predicated region body
PF: predicated region fallthrough
CT: control target
= control target key end

     0   :  { %s343_s12 = smov 0   ;;  %s369_s0 = inlined_call_operand.vmem [shape: bf16[32,32], index: 0, kind: input, shape index: {}]   ;;  %s370_s1 = inlined_call_operand.vmem [shape: bf16[32,96], index: 1, kind: input, shape index: {}]   ;;  %s371_s2 = inlined_call_operand.vmem [shape: f32[1,96], index: 2, kind: input, shape index: {}]   ;;  %s372_s3 = inlined_call_operand.vmem [shape: f32[32,96], index: 3, kind: output, shape index: {}]  }
   0x1 LB: > { %s279_s13 = sadd.s32 4294967295, %s321_s12   ;;  %p283_p0 = scmp.ge.s32.totalorder %s321_s12, 1  ;;  %s321_s12 = sphi %s343_s12, %s13_s12  }
   0x2   : > { %p138_p1 = scmp.lt.s32.totalorder %s321_s12, 3 }
   0x4   : > { %p139_p2 = pnand %p283_p0, %p138_p1 }
   0x5   : > { %s284_s16 = sshll.u32 (!%p139_p2), %s279_s13, 1 }
   0x6   : > { %142 = sbr.rel (%p139_p2) target bundleno = 156 (0x9c), region = 32  ;;  %p163_p3 = scmp.lt.s32.totalorder (!%p139_p2), %s284_s16, 3 }
   0xb   : > { %v305_v0 = vld [vmem:[%s370_s1 + $0x8] sm:$0xff]  ;;  %v304_v1 = vld [vmem:[%s370_s1] sm:$0xff]  ;;  %s374_s16 = smov (!%p163_p3, %s284_s16), 3  ;;  %vm202_vm0 = vcmask 261120   ;;  %vm220_vm1 = vcmask 785408  }
   0xc   : > { %212 = vmatpush.bf16.msra.mxu0 %v305_v0  ;;  %s285_s19 = sshll.u32 %s374_s16, 2  ;;  %s287_s23 = sshll.u32 %s374_s16, 3  ;;  %v314_v3 = vld [vmem:[%s371_s2] ss:$0 sm:$0xff] }
   0xd   : > { %s166_s22 = scalar_lea.vmem %s369_s0, %s285_s19  ;;  %s172_s28 = scalar_lea.vmem %s372_s3, %s287_s23 }
   0xe   : > { %v303_v2 = vld [vmem:[%s166_s22] sm:$0xff] }
  0x10   : > { %213 = vmatpush.bf16.msra.mxu0 %v304_v1 }
  0x13   : > { %300 = vmatmul.msk.bf16.vlgmr.msra.gmra.mxu0 %vm202_vm0, %v303_v2 }
  0x90   : > { %v215_v4 = vpop.f32.mrf.mxu0 }
  0x91   : > { %v216_v5 = vadd.f32 %v314_v3, %v215_v4 }
  0x93   : > { %221 = vst.msk [vmem:[%s172_s28] sm:$0xff] %vm220_vm1, %v216_v5 }
  0x98   : > { %v217_v6 = vpop.f32.mrf.mxu0 }
  0x99   : > { %v218_v7 = vadd.f32 %v314_v3, %v217_v6 }
  0x9b   : > { %222 = vst.msk [vmem:[%s172_s28 + $0x8] sm:$0xff] %vm220_vm1, %v218_v7 }
  0x9c PF: > { %s13_s12 = sadd.s32 1, %s321_s12  }
  0x9d   : > { %p10_p4 = scmp.ge.s32.totalorder %s13_s12, 4  }
  0x9f   :  { %12 = sbr.rel (!%p10_p4) target bundleno = 1 (0x1), region = 62 }

// kernel: autoformer_forward.14
= control target key start
LH: loop header
LB: loop body
LE: loop exit
PB: predicated region body
PF: predicated region fallthrough
CT: control target
= control target key end

     0   :  { %s565_s18 = smov 0   ;;  %s617_s0 = inlined_call_operand.vmem [shape: f32[2,16,7], index: 0, kind: input, shape index: {}]   ;;  %s618_s1 = inlined_call_operand.vmem [shape: f32[2,16,4], index: 1, kind: input, shape index: {}]   ;;  %s619_s2 = inlined_call_operand.vmem [shape: f32[2,16,16], index: 2, kind: input, shape index: {}]   ;;  %s620_s3 = inlined_call_operand.vmem [shape: bf16[3,7,32], index: 3, kind: input, shape index: {}]   ;;  %s621_s4 = inlined_call_operand.vmem [shape: bf16[4,32], index: 4, kind: input, shape index: {}]   ;;  %s622_s5 = inlined_call_operand.vmem [shape: f32[2,16,32], index: 5, kind: output, shape index: {}]  }
   0x1 LB: > { %s485_s19 = sadd.s32 4294967295, %s532_s18   ;;  %p489_p0 = scmp.ge.s32.totalorder %s532_s18, 1  ;;  %s532_s18 = sphi %s565_s18, %s15_s18  }
   0x2   : > { %p197_p1 = scmp.lt.s32.totalorder %s532_s18, 3 }
   0x4   : > { %p198_p2 = pnand %p489_p0, %p197_p1 }
   0x5   : > { %p230_p3 = scmp.lt.s32.totalorder (!%p198_p2), %s485_s19, 1 }
   0x6   : > { %201 = sbr.rel (%p198_p2) target bundleno = 299 (0x12b), region = 40 }
   0xb   : > { %vm323_vm0 = vcmask 1042432   ;;  %s624_s19 = smov (!%p230_p3, %s485_s19), 1  ;;  %vm324_vm1 = vcmask 1043456   ;;  %v534_v0 = vmov 65535   ;;  %v502_v2 = vld [vmem:[%s620_s3 + $0x4] sm:$0xf] }
   0xc   : > { %v325_v1 = vsel %vm323_vm0, 4294967295, %v534_v0  ;;  %s573_s20 = sshll.u32 %s624_s19, 4  ;;  %v314_v6 = vld [vmem:[%s620_s3] sm:$0xf]  ;;  %v251_v7 = vld [vmem:[%s619_s2 + $0x8] sm:$0xff]  ;;  %vm252_vm2 = vcmask 130048  }
   0xd   : > { %s234_s23 = scalar_lea.vmem %s617_s0, %s573_s20  ;;  %v326_v5 = vsel %vm324_vm1, %v325_v1, 0  ;;  %v499_v8 = vld [vmem:[%s619_s2 + $0x18] sm:$0xff]  ;;  %v250_v9 = vld [vmem:[%s619_s2] sm:$0xff]  ;;  %v498_v10 = vld [vmem:[%s619_s2 + $0x10] sm:$0xff]  ;;  %vm319_vm3 = vcmask 56320   ;;  %s239_s15 = scalar_lea.vmem %s618_s1, %s573_s20  ;;  %vm395_vm4 = vcmask 1041408  }
   0xe   : > { %v247_v3 = vld [vmem:[%s234_s23 + $0x8] sm:$0xff]  ;;  %v246_v4 = vld [vmem:[%s234_s23] sm:$0xff]  ;;  %v328_v11 = vand.u32 %v502_v2, %v326_v5  ;;  %v348_v12 = vand.u32 %v326_v5, %v314_v6  ;;  %vm391_vm5 = vcmask 31744   ;;  %s244_s22 = scalar_lea.vmem %s622_s5, %s573_s20  ;;  %vm415_vm6 = vcmask 261120  }
   0xf   : > { %513 = vmatpush.msra.mxu2 %v247_v3  ;;  %515 = vmatpush.msra.mxu3 %v247_v3  ;;  %v318_v13 = vpack.c.bf16 %v247_v3, %v246_v4  ;;  %v505_v14 = vld [vmem:[%s620_s3 + $0x8] sm:$0xf]  ;;  %v389_v16 = vld [vmem:[%s621_s4] sm:$0x3] }
  0x10   : > { %273 = vmatpush.msra.mxu0 %v247_v3  ;;  %305 = vmatpush.msra.mxu1 %v247_v3  ;;  %v371_v15 = vand.u32 %v505_v14, %v326_v5  ;;  %v397_v17 = vsel %vm395_vm4, %v389_v16, 0  ;;  %v248_v18 = vld [vmem:[%s239_s15] sm:$0xff]  ;;  %v249_v19 = vld [vmem:[%s239_s15 + $0x8] sm:$0xff] }
  0x11   : > { %514 = vmatpush.msra.mxu2 %v246_v4  ;;  %516 = vmatpush.msra.mxu3 %v246_v4  ;;  %v390_v20 = vpack.c.bf16 %v249_v19, %v248_v18 }
  0x12   : > { %497 = vmatmul.msk.f32.vlgmr.msra.gmra.mxu2 %vm252_vm2, %v251_v7  ;;  %501 = vmatmul.msk.f32.vlgmr.msra.gmra.mxu3 %vm252_vm2, %v499_v8 }
  0x13   : > { %274 = vmatpush.msra.mxu0 %v246_v4  ;;  %306 = vmatpush.msra.mxu1 %v246_v4 }
  0x14   : > { %496 = vmatmul.msk.f32.vlgmr.msra.gmra.mxu0 %vm252_vm2, %v250_v9  ;;  %500 = vmatmul.msk.f32.vlgmr.msra.gmra.mxu1 %vm252_vm2, %v498_v10 }
  0x15   : > { %337 = vmatpush.bf16.msrb.mxu2 %v328_v11  ;;  %357 = vmatpush.bf16.msrb.mxu3 %v348_v12 }
  0x16   : > { %380 = vmatpush.bf16.msrb.mxu0 %v371_v15  ;;  %406 = vmatpush.bf16.msrb.mxu1 %v397_v17 }
  0x1a   : > { %503 = vmatmul.msk.bf16.vlgmr.msrb.gmra.mxu2 %vm319_vm3, %v318_v13 }
  0x1c   : > { %507 = vmatmul.msk.bf16.vlgmr.msrb.gmra.mxu1 %vm391_vm5, %v390_v20 }
  0x91   : > { %v276_v21 = vpop.f32.mrf.mxu0  ;;  %v308_v22 = vpop.f32.mrf.mxu1 }
  0x95   : > { %v279_v23 = vpop.f32.mrf.mxu2  ;;  %v311_v24 = vpop.f32.mrf.mxu3 }
  0x96   : > { %v315_v25 = vpack.c.bf16 %v279_v23, %v276_v21  ;;  %v366_v26 = vpack.c.bf16 %v311_v24, %v308_v22 }
  0x98   : > { %504 = vmatmul.msk.bf16.vlgmr.msrb.gmra.mxu3 %vm319_vm3, %v315_v25  ;;  %506 = vmatmul.msk.bf16.vlgmr.msrb.gmra.mxu0 %vm319_vm3, %v366_v26 }
  0x99   : > { %v408_v31 = vpop.f32.mrf.mxu1 }
  0x9d   : > { %v339_v27 = vpop.f32.mrf.mxu2 }
  0xa1   : > { %v410_v39 = vpop.f32.mrf.mxu1 }
  0xa5   : > { %v341_v34 = vpop.f32.mrf.mxu2 }
 0x115   : > { %v382_v28 = vpop.f32.mrf.mxu0 }
 0x11b   : > { %v359_v29 = vpop.f32.mrf.mxu3 }
 0x11c   : > { %v360_v30 = vadd.f32 %v359_v29, %v339_v27 }
 0x11d   : > { %v384_v37 = vpop.f32.mrf.mxu0 }
 0x11e   : > { %v387_v32 = vadd.f32 %v382_v28, %v360_v30 }
 0x120   : > { %v413_v33 = vadd.f32 %v408_v31, %v387_v32 }
 0x122   : > { %416 = vst.msk [vmem:[%s244_s22] sm:$0xff] %vm415_vm6, %v413_v33 }
 0x123   : > { %v361_v35 = vpop.f32.mrf.mxu3 }
 0x124   : > { %v362_v36 = vadd.f32 %v361_v35, %v341_v34 }
 0x126   : > { %v388_v38 = vadd.f32 %v384_v37, %v362_v36 }
 0x128   : > { %v414_v40 = vadd.f32 %v410_v39, %v388_v38 }
 0x12a   : > { %417 = vst.msk [vmem:[%s244_s22 + $0x8] sm:$0xff] %vm415_vm6, %v414_v40 }
 0x12b PF: > { %s15_s18 = sadd.s32 1, %s532_s18  }
 0x12c   : > { %p12_p4 = scmp.ge.s32.totalorder %s15_s18, 4  }
 0x12e   :  { %14 = sbr.rel (!%p12_p4) target bundleno = 1 (0x1), region = 76 }

// kernel: autoformer_forward.20
= control target key start
LH: loop header
LB: loop body
LE: loop exit
PB: predicated region body
PF: predicated region fallthrough
CT: control target
= control target key end

     0   :  { %s343_s12 = smov 0   ;;  %s369_s0 = inlined_call_operand.vmem [shape: bf16[32,32], index: 0, kind: input, shape index: {}]   ;;  %s370_s1 = inlined_call_operand.vmem [shape: bf16[32,64], index: 1, kind: input, shape index: {}]   ;;  %s371_s2 = inlined_call_operand.vmem [shape: f32[1,64], index: 2, kind: input, shape index: {}]   ;;  %s372_s3 = inlined_call_operand.vmem [shape: f32[32,64], index: 3, kind: output, shape index: {}]  }
   0x1 LB: > { %s279_s13 = sadd.s32 4294967295, %s321_s12   ;;  %p283_p0 = scmp.ge.s32.totalorder %s321_s12, 1  ;;  %s321_s12 = sphi %s343_s12, %s13_s12  }
   0x2   : > { %p138_p1 = scmp.lt.s32.totalorder %s321_s12, 3 }
   0x4   : > { %p139_p2 = pnand %p283_p0, %p138_p1 }
   0x5   : > { %s284_s16 = sshll.u32 (!%p139_p2), %s279_s13, 1 }
   0x6   : > { %142 = sbr.rel (%p139_p2) target bundleno = 156 (0x9c), region = 32  ;;  %p163_p3 = scmp.lt.s32.totalorder (!%p139_p2), %s284_s16, 3 }
   0xb   : > { %v305_v0 = vld [vmem:[%s370_s1 + $0x8] sm:$0xff]  ;;  %v304_v1 = vld [vmem:[%s370_s1] sm:$0xff]  ;;  %s374_s16 = smov (!%p163_p3, %s284_s16), 3  ;;  %vm202_vm0 = vcmask 261120   ;;  %vm220_vm1 = vcmask 523264  }
   0xc   : > { %212 = vmatpush.bf16.msra.mxu0 %v305_v0  ;;  %s285_s19 = sshll.u32 %s374_s16, 2  ;;  %s287_s23 = sshll.u32 %s374_s16, 3  ;;  %v314_v3 = vld [vmem:[%s371_s2] ss:$0 sm:$0xff] }
   0xd   : > { %s166_s22 = scalar_lea.vmem %s369_s0, %s285_s19  ;;  %s172_s28 = scalar_lea.vmem %s372_s3, %s287_s23 }
   0xe   : > { %v303_v2 = vld [vmem:[%s166_s22] sm:$0xff] }
  0x10   : > { %213 = vmatpush.bf16.msra.mxu0 %v304_v1 }
  0x13   : > { %300 = vmatmul.msk.bf16.vlgmr.msra.gmra.mxu0 %vm202_vm0, %v303_v2 }
  0x90   : > { %v215_v4 = vpop.f32.mrf.mxu0 }
  0x91   : > { %v216_v5 = vadd.f32 %v314_v3, %v215_v4 }
  0x93   : > { %221 = vst.msk [vmem:[%s172_s28] sm:$0xff] %vm220_vm1, %v216_v5 }
  0x98   : > { %v217_v6 = vpop.f32.mrf.mxu0 }
  0x99   : > { %v218_v7 = vadd.f32 %v314_v3, %v217_v6 }
  0x9b   : > { %222 = vst.msk [vmem:[%s172_s28 + $0x8] sm:$0xff] %vm220_vm1, %v218_v7 }
  0x9c PF: > { %s13_s12 = sadd.s32 1, %s321_s12  }
  0x9d   : > { %p10_p4 = scmp.ge.s32.totalorder %s13_s12, 4  }
  0x9f   :  { %12 = sbr.rel (!%p10_p4) target bundleno = 1 (0x1), region = 62 }

// kernel: autoformer_forward.19
= control target key start
LH: loop header
LB: loop body
LE: loop exit
PB: predicated region body
PF: predicated region fallthrough
CT: control target
= control target key end

     0   :  { %s376_s12 = smov 0   ;;  %s414_s0 = inlined_call_operand.vmem [shape: f32[2,16,32], index: 0, kind: input, shape index: {}]   ;;  %s415_s1 = inlined_call_operand.vmem [shape: f32[1,32], index: 1, kind: input, shape index: {}]   ;;  %s416_s2 = inlined_call_operand.vmem [shape: f32[1,32], index: 2, kind: input, shape index: {}]   ;;  %s417_s3 = inlined_call_operand.vmem [shape: f32[2,16,32], index: 3, kind: output, shape index: {}]  }
   0x1 LB: > { %s313_s13 = sadd.s32 4294967295, %s352_s12   ;;  %p317_p0 = scmp.ge.s32.totalorder %s352_s12, 1  ;;  %s352_s12 = sphi %s376_s12, %s13_s12  }
   0x2   : > { %p137_p1 = scmp.lt.s32.totalorder %s352_s12, 3 }
   0x4   : > { %p138_p2 = pnand %p317_p0, %p137_p1 }
   0x5   : > { %p161_p3 = scmp.lt.s32.totalorder (!%p138_p2), %s313_s13, 1 }
   0x6   : > { %141 = sbr.rel (%p138_p2) target bundleno = 312 (0x138), region = 32 }
   0xb   : > { %s419_s13 = smov (!%p161_p3, %s313_s13), 1  ;;  %vm173_vm0 = vcmask 261120   ;;  %v354_v4 = vmov 32.0   ;;  %v355_v37 = vmov 16.0   ;;  %v336_v39 = vld [vmem:[%s415_s1] ss:$0 sm:$0xff] }
   0xc   : > { %s324_s14 = sshll.u32 %s419_s13, 4  ;;  %338 = vrcp.f32 %v354_v4  ;;  %v337_v43 = vld [vmem:[%s416_s2] ss:$0 sm:$0xff] }
   0xd   : > { %s165_s17 = scalar_lea.vmem %s414_s0, %s324_s14  ;;  %s170_s24 = scalar_lea.vmem %s417_s3, %s324_s14 }
   0xe   : > { %v171_v0 = vld [vmem:[%s165_s17] sm:$0xff]  ;;  %v172_v2 = vld [vmem:[%s165_s17 + $0x8] sm:$0xff] }
   0xf   : > { %v174_v1 = vsel %vm173_vm0, %v171_v0, 0.0  ;;  %v177_v3 = vsel %vm173_vm0, %v172_v2, 0.0 }
  0x10   : > { %175 = vadd.xlane.f32.xlu0 %v174_v1 }
  0x12   : > { %v339_v5 = vpop.eup %338 }
  0x13   : > { %v181_v6 = vmul.f32 32.0, %v339_v5  ;;  %vm185_vm1 = vweird.f32 %v339_v5 }
  0x15   : > { %v182_v7 = vsub.f32 1.0, %v181_v6 }
  0x17   : > { %v183_v8 = vmul.f32 %v339_v5, %v182_v7 }
  0x18   : > { %178 = vadd.xlane.f32.xlu0 %v177_v3 }
  0x19   : > { %v184_v9 = vadd.f32 %v339_v5, %v183_v8 }
  0x1b   : > { %v186_v10 = vsel %vm185_vm1, %v339_v5, %v184_v9 }
  0x83   : > { %v176_v11 = vpop.xlane.xlu0 %175 }
  0x84   : > { %v187_v12 = vmul.f32 %v186_v10, %v176_v11 }
  0x86   : > { %v189_v13 = vsub.f32 %v171_v0, %v187_v12 }
  0x88   : > { %v191_v14 = vmul.f32 %v189_v13, %v189_v13 }
  0x8a   : > { %v193_v15 = vsel %vm173_vm0, %v191_v14, 0.0 }
  0x8b   : > { %194 = vadd.xlane.f32.xlu1 %v193_v15  ;;  %v179_v16 = vpop.xlane.xlu0 %178 }
  0x8c   : > { %v188_v17 = vmul.f32 %v186_v10, %v179_v16 }
  0x8e   : > { %v190_v18 = vsub.f32 %v172_v2, %v188_v17 }
  0x90   : > { %v192_v19 = vmul.f32 %v190_v18, %v190_v18 }
  0x92   : > { %v196_v20 = vsel %vm173_vm0, %v192_v19, 0.0 }
  0x93   : > { %197 = vadd.xlane.f32.xlu1 %v196_v20 }
  0xfe   : > { %v195_v21 = vpop.xlane.xlu1 %194 }
  0xff   : > { %v199_v22 = vmul.f32 %v195_v21, %v186_v10 }
 0x101   : > { %v201_v23 = vadd.f32 1e-05, %v199_v22 }
 0x103   : > { %340 = vrsqrt.f32 %v201_v23  ;;  %vm209_vm3 = vweird.f32 %v201_v23 }
 0x106   : > { %v198_v24 = vpop.xlane.xlu1 %197 }
 0x107   : > { %v200_v25 = vmul.f32 %v198_v24, %v186_v10 }
 0x109   : > { %v341_v26 = vpop.eup %340  ;;  %v202_v27 = vadd.f32 1e-05, %v200_v25 }
 0x10a   : > { %v204_v28 = vmul.f32 %v341_v26, %v201_v23  ;;  %vm210_vm2 = vweird.f32 %v341_v26 }
 0x10b   : > { %342 = vrsqrt.f32 %v202_v27  ;;  %vm211_vm4 = vmor %vm209_vm3, %vm210_vm2  ;;  %vm219_vm6 = vweird.f32 %v202_v27 }
 0x10c   : > { %v205_v29 = vmul.f32 %v341_v26, %v204_v28  ;;  %344 = vrcp.f32 %v355_v37 }
 0x10e   : > { %v206_v30 = vmul.f32 0.5, %v205_v29 }
 0x110   : > { %v207_v31 = vsub.f32 1.5, %v206_v30 }
 0x111   : > { %v343_v32 = vpop.eup %342 }
 0x112   : > { %v208_v33 = vmul.f32 %v341_v26, %v207_v31  ;;  %v214_v34 = vmul.f32 %v343_v32, %v202_v27  ;;  %vm220_vm5 = vweird.f32 %v343_v32  ;;  %v345_v45 = vpop.eup %344 }
 0x113   : > { %vm221_vm7 = vmor %vm219_vm6, %vm220_vm5  ;;  %v247_v49 = vmul.f32 16.0, %v345_v45  ;;  %vm251_vm8 = vweird.f32 %v345_v45 }
 0x114   : > { %v212_v35 = vsel %vm211_vm4, %v341_v26, %v208_v33  ;;  %v215_v36 = vmul.f32 %v343_v32, %v214_v34 }
 0x115   : > { %v223_v40 = vmul.f32 %v212_v35, %v189_v13  ;;  %v248_v53 = vsub.f32 1.0, %v247_v49 }
 0x116   : > { %v216_v38 = vmul.f32 0.5, %v215_v36 }
 0x117   : > { %v229_v44 = vmul.f32 %v336_v39, %v223_v40  ;;  %v249_v57 = vmul.f32 %v345_v45, %v248_v53 }
 0x118   : > { %v217_v41 = vsub.f32 1.5, %v216_v38 }
 0x119   : > { %v235_v48 = vadd.f32 %v337_v43, %v229_v44  ;;  %v250_v60 = vadd.f32 %v345_v45, %v249_v57 }
 0x11a   : > { %v218_v42 = vmul.f32 %v343_v32, %v217_v41 }
 0x11b   : > { %v237_v52 = vsel %vm173_vm0, %v235_v48, 0.0  ;;  %v252_v63 = vsel %vm251_vm8, %v345_v45, %v250_v60 }
 0x11c   : > { %v222_v46 = vsel %vm221_vm7, %v343_v32, %v218_v42 }
 0x11d   : > { %v224_v47 = vmul.f32 %v222_v46, %v190_v18 }
 0x11f   : > { %v230_v50 = vmul.f32 %v336_v39, %v224_v47 }
 0x121   : > { %v236_v51 = vadd.f32 %v337_v43, %v230_v50 }
 0x123   : > { %v238_v54 = vsel %vm173_vm0, %v236_v51, 0.0 }
 0x124   : > { %v239_v55 = vadd.f32 %v238_v54, %v237_v52 }
 0x126   : > { %v240_v56 = vrot.slane %v239_v55, 4 }
 0x128   : > { %v241_v58 = vadd.f32 %v240_v56, %v239_v55 }
 0x12a   : > { %v242_v59 = vrot.slane %v241_v58, 2 }
 0x12c   : > { %v243_v61 = vadd.f32 %v242_v59, %v241_v58 }
 0x12e   : > { %v244_v62 = vrot.slane %v243_v61, 1 }
 0x130   : > { %v245_v0 = vadd.f32 %v244_v62, %v243_v61 }
 0x132   : > { %v253_v1 = vmul.f32 %v252_v63, %v245_v0 }
 0x134   : > { %v254_v2 = vsub.f32 %v235_v48, %v253_v1  ;;  %v255_v3 = vsub.f32 %v236_v51, %v253_v1 }
 0x136   : > { %256 = vst.msk [vmem:[%s170_s24] sm:$0xff] %vm173_vm0, %v254_v2 }
 0x137   : > { %257 = vst.msk [vmem:[%s170_s24 + $0x8] sm:$0xff] %vm173_vm0, %v255_v3 }
 0x138 PF: > { %s13_s12 = sadd.s32 1, %s352_s12  }
 0x139   : > { %p10_p4 = scmp.ge.s32.totalorder %s13_s12, 4  }
 0x13b   :  { %12 = sbr.rel (!%p10_p4) target bundleno = 1 (0x1), region = 62 }

// kernel: autoformer_forward.16
= control target key start
LH: loop header
LB: loop body
LE: loop exit
PB: predicated region body
PF: predicated region fallthrough
CT: control target
= control target key end

     0   :  { %s686_s24 = smov 0   ;;  %s752_s0 = inlined_call_operand.vmem [shape: f32[2,16,32], index: 0, kind: input, shape index: {}]   ;;  %s753_s1 = inlined_call_operand.vmem [shape: f32[2,16,32], index: 1, kind: input, shape index: {}]   ;;  %s754_s2 = inlined_call_operand.vmem [shape: bf16[32,32], index: 2, kind: input, shape index: {}]   ;;  %s755_s3 = inlined_call_operand.vmem [shape: f32[1,32], index: 3, kind: input, shape index: {}]   ;;  %s756_s4 = inlined_call_operand.vmem [shape: bf16[32,64], index: 4, kind: input, shape index: {}]   ;;  %s757_s5 = inlined_call_operand.vmem [shape: bf16[64,32], index: 5, kind: input, shape index: {}]   ;;  %s758_s6 = inlined_call_operand.vmem [shape: f32[16,16], index: 6, kind: input, shape index: {}]   ;;  %s759_s7 = inlined_call_operand.vmem [shape: f32[2,16,32], index: 7, kind: output, shape index: {}]  }
   0x1 LB: > { %s564_s25 = sadd.s32 4294967295, %s644_s24   ;;  %p568_p0 = scmp.ge.s32.totalorder %s644_s24, 1  ;;  %s644_s24 = sphi %s686_s24, %s17_s24  }
   0x2   : > { %p247_p1 = scmp.lt.s32.totalorder %s644_s24, 3 }
   0x4   : > { %p248_p2 = pnand %p568_p0, %p247_p1 }
   0x5   : > { %p284_p3 = scmp.lt.s32.totalorder (!%p248_p2), %s564_s25, 1 }
   0x6   : > { %251 = sbr.rel (%p248_p2) target bundleno = 722 (0x2d2), region = 48 }
   0xb   : > { %v620_v0 = vld [vmem:[%s754_s2 + $0x8] sm:$0xff]  ;;  %v619_v1 = vld [vmem:[%s754_s2] sm:$0xff]  ;;  %s761_s25 = smov (!%p284_p3, %s564_s25), 1  ;;  %vm323_vm0 = vcmask 261120   ;;  %vm349_vm1 = vcmask 130048   ;;  %v626_v18 = vld [vmem:[%s757_s5 + $0x18] sm:$0xff] }
   0xc   : > { %333 = vmatpush.bf16.msra.mxu0 %v620_v0  ;;  %s700_s30 = sshll.u32 %s761_s25, 4  ;;  %v637_v10 = vld [vmem:[%s755_s3] ss:$0 sm:$0xff]  ;;  %v301_v15 = vld [vmem:[%s758_s6 + $0x8] sm:$0xff]  ;;  %458 = vmatpush.bf16.msra.mxu3 %v626_v18  ;;  %v625_v24 = vld [vmem:[%s757_s5 + $0x10] sm:$0xff]  ;;  %vm450_vm2 = vcmask 523264  }
   0xd   : > { %s288_s10 = scalar_lea.vmem %s752_s0, %s700_s30  ;;  %s293_s13 = scalar_lea.vmem %s753_s1, %s700_s30  ;;  %v300_v14 = vld [vmem:[%s758_s6] sm:$0xff]  ;;  %v622_v16 = vld [vmem:[%s756_s4 + $0x8] sm:$0xff] }
   0xe   : > { %v304_v2 = vld [vmem:[%s288_s10] sm:$0xff]  ;;  %v305_v3 = vld [vmem:[%s288_s10 + $0x8] sm:$0xff] }
   0xf   : > { %v310_v4 = vpack.c.bf16 %v305_v3, %v304_v2  ;;  %v302_v6 = vld [vmem:[%s293_s13] sm:$0xff]  ;;  %v303_v7 = vld [vmem:[%s293_s13 + $0x8] sm:$0xff]  ;;  %s298_s13 = scalar_lea.vmem %s759_s7, %s700_s30 }
  0x10   : > { %334 = vmatpush.bf16.msra.mxu0 %v619_v1  ;;  %v621_v17 = vld [vmem:[%s756_s4] sm:$0xff]  ;;  %459 = vmatpush.bf16.msra.mxu3 %v625_v24  ;;  %v624_v25 = vld [vmem:[%s757_s5 + $0x8] sm:$0xff] }
  0x11   : > { %v623_v26 = vld [vmem:[%s757_s5] sm:$0xff] }
  0x13   : > { %583 = vmatmul.msk.bf16.vlgmr.msra.gmra.mxu0 %vm323_vm0, %v310_v4 }
  0x14   : > { %460 = vmatpush.bf16.msra.mxu3 %v624_v25 }
  0x18   : > { %461 = vmatpush.bf16.msra.mxu3 %v623_v26 }
  0x90   : > { %v336_v5 = vpop.f32.mrf.mxu0 }
  0x91   : > { %v341_v9 = vadd.f32 %v336_v5, %v302_v6 }
  0x93   : > { %v347_v13 = vadd.f32 %v637_v10, %v341_v9 }
  0x98   : > { %v338_v8 = vpop.f32.mrf.mxu0 }
  0x99   : > { %v342_v11 = vadd.f32 %v338_v8, %v303_v7 }
  0x9b   : > { %v348_v12 = vadd.f32 %v637_v10, %v342_v11 }
  0x9d   : > { %370 = vmatpush.msra.mxu1 %v348_v12  ;;  %627 = vmatpush.msra.mxu2 %v348_v12 }
  0x9f   : > { %371 = vmatpush.msra.mxu1 %v347_v13  ;;  %628 = vmatpush.msra.mxu2 %v347_v13 }
  0xa0   : > { %584 = vmatmul.msk.f32.vlgmr.msra.gmra.mxu1 %vm349_vm1, %v300_v14  ;;  %585 = vmatmul.msk.f32.vlgmr.msra.gmra.mxu2 %vm349_vm1, %v301_v15 }
  0xa1   : > { %407 = vmatpush.bf16.msrb.mxu2 %v622_v16 }
  0xa5   : > { %408 = vmatpush.bf16.msrb.mxu2 %v621_v17 }
 0x11d   : > { %v373_v19 = vpop.f32.mrf.mxu1 }
 0x11e   : > { %v379_v21 = vsub.f32 %v347_v13, %v373_v19 }
 0x123   : > { %v376_v20 = vpop.f32.mrf.mxu2 }
 0x124   : > { %v380_v22 = vsub.f32 %v348_v12, %v376_v20 }
 0x126   : > { %v385_v23 = vpack.c.bf16 %v380_v22, %v379_v21 }
 0x128   : > { %594 = vmatmul.msk.bf16.vlgmr.msrb.gmra.mxu2 %vm323_vm0, %v385_v23 }
 0x1ab   : > { %v410_v27 = vpop.f32.mrf.mxu2 }
 0x1ac   : > { %v415_v29 = vmax.f32 %v410_v27, 0.0 }
 0x1b3   : > { %v412_v28 = vpop.f32.mrf.mxu2 }
 0x1b4   : > { %v416_v30 = vmax.f32 %v412_v28, 0.0 }
 0x1b6   : > { %v425_v31 = vpack.c.bf16 %v416_v30, %v415_v29 }
 0x1b8   : > { %611 = vmatmul.msk.bf16.vlgmr.msra.gmra.mxu3 %vm450_vm2, %v425_v31 }
 0x23b   : > { %v463_v32 = vpop.f32.mrf.mxu3 }
 0x23c   : > { %v468_v35 = vadd.f32 %v463_v32, %v379_v21 }
 0x243   : > { %v465_v33 = vpop.f32.mrf.mxu3 }
 0x244   : > { %v469_v34 = vadd.f32 %v465_v33, %v380_v22 }
 0x246   : > { %484 = vmatpush.msrb.mxu1 %v469_v34 }
 0x248   : > { %485 = vmatpush.msrb.mxu1 %v468_v35 }
 0x249   : > { %612 = vmatmul.msk.f32.vlgmr.msrb.gmra.mxu1 %vm349_vm1, %v300_v14 }
 0x251   : > { %613 = vmatmul.msk.f32.gmra.mxu1 %vm349_vm1, %v301_v15 }
 0x2c6   : > { %v487_v36 = vpop.f32.mrf.mxu1 }
 0x2c7   : > { %v493_v37 = vsub.f32 %v468_v35, %v487_v36 }
 0x2c9   : > { %495 = vst.msk [vmem:[%s298_s13] sm:$0xff] %vm323_vm0, %v493_v37 }
 0x2ce   : > { %v490_v38 = vpop.f32.mrf.mxu1 }
 0x2cf   : > { %v494_v39 = vsub.f32 %v469_v34, %v490_v38 }
 0x2d1   : > { %496 = vst.msk [vmem:[%s298_s13 + $0x8] sm:$0xff] %vm323_vm0, %v494_v39 }
 0x2d2 PF: > { %s17_s24 = sadd.s32 1, %s644_s24  }
 0x2d3   : > { %p14_p4 = scmp.ge.s32.totalorder %s17_s24, 4  }
 0x2d5   :  { %16 = sbr.rel (!%p14_p4) target bundleno = 1 (0x1), region = 81 }

// kernel: autoformer_forward.21
= control target key start
LH: loop header
LB: loop body
LE: loop exit
PB: predicated region body
PF: predicated region fallthrough
CT: control target
= control target key end

     0   :  { %s314_s12 = smov 0   ;;  %s350_s0 = inlined_call_operand.vmem [shape: f32[2,8,7], index: 0, kind: input, shape index: {}]   ;;  %s351_s1 = inlined_call_operand.vmem [shape: f32[8,8], index: 1, kind: input, shape index: {}]   ;;  %s352_s2 = inlined_call_operand.vmem [shape: f32[2,8,7], index: 2, kind: output, shape index: {0}]   ;;  %s353_s3 = inlined_call_operand.vmem [shape: f32[2,8,7], index: 3, kind: output, shape index: {1}]  }
   0x1 LB: > { %s291_s13 = sadd.s32 4294967295, %s316_s12   ;;  %p295_p0 = scmp.ge.s32.totalorder %s316_s12, 1  ;;  %s316_s12 = sphi %s314_s12, %s14_s12  }
   0x2   : > { %p139_p1 = scmp.lt.s32.totalorder %s316_s12, 3 }
   0x4   : > { %p140_p2 = pnand %p295_p0, %p139_p1 }
   0x5   : > { %p165_p3 = scmp.lt.s32.totalorder (!%p140_p2), %s291_s13, 1 }
   0x6   : > { %143 = sbr.rel (%p140_p2) target bundleno = 145 (0x91), region = 28 }
   0xb   : > { %s355_s13 = smov (!%p165_p3, %s291_s13), 1  ;;  %v178_v0 = vld [vmem:[%s351_s1] sm:$0xff]  ;;  %vm179_vm0 = vcmask 64512   ;;  %vm204_vm1 = vcmask 56320  }
   0xc   : > { %s296_s14 = sshll.u32 %s355_s13, 3 }
   0xd   : > { %s168_s17 = scalar_lea.vmem %s350_s0, %s296_s14  ;;  %s176_s22 = scalar_lea.vmem %s353_s3, %s296_s14 }
   0xe   : > { %v177_v1 = vld [vmem:[%s168_s17] sm:$0xff]  ;;  %s172_s25 = scalar_lea.vmem %s352_s2, %s296_s14 }
   0xf   : > { %198 = vmatpush.msra.mxu0 %v177_v1 }
  0x10   : > { %299 = vmatmul.msk.f32.vlgmr.msra.gmra.mxu0 %vm179_vm0, %v178_v0 }
  0x8d   : > { %v200_v2 = vpop.f32.mrf.mxu0 }
  0x8e   : > { %v203_v3 = vsub.f32 %v177_v1, %v200_v2  ;;  %206 = vst.msk [vmem:[%s176_s22] sm:$0xff] %vm204_vm1, %v200_v2 }
  0x90   : > { %205 = vst.msk [vmem:[%s172_s25] sm:$0xff] %vm204_vm1, %v203_v3 }
  0x91 PF: > { %s14_s12 = sadd.s32 1, %s316_s12  }
  0x92   : > { %p11_p4 = scmp.ge.s32.totalorder %s14_s12, 4  }
  0x94   :  { %13 = sbr.rel (!%p11_p4) target bundleno = 1 (0x1), region = 70 }

// kernel: autoformer_forward.23
= control target key start
LH: loop header
LB: loop body
LE: loop exit
PB: predicated region body
PF: predicated region fallthrough
CT: control target
= control target key end

     0   :  { %s356_s12 = smov 0   ;;  %s382_s0 = inlined_call_operand.vmem [shape: bf16[48,32], index: 0, kind: input, shape index: {}]   ;;  %s383_s1 = inlined_call_operand.vmem [shape: bf16[32,96], index: 1, kind: input, shape index: {}]   ;;  %s384_s2 = inlined_call_operand.vmem [shape: f32[1,96], index: 2, kind: input, shape index: {}]   ;;  %s385_s3 = inlined_call_operand.vmem [shape: f32[48,96], index: 3, kind: output, shape index: {}]  }
   0x1 LB: > { %s291_s13 = sadd.s32 4294967295, %s334_s12   ;;  %p295_p0 = scmp.ge.s32.totalorder %s334_s12, 1  ;;  %s334_s12 = sphi %s356_s12, %s13_s12  }
   0x2   : > { %p138_p1 = scmp.lt.s32.totalorder %s334_s12, 3 }
   0x4   : > { %p139_p2 = pnand %p295_p0, %p138_p1 }
   0x5   : > { %s162_s16 = smul.u32 (!%p139_p2), 3, %s291_s13 }
   0x6   : > { %142 = sbr.rel (%p139_p2) target bundleno = 156 (0x9c), region = 32 }
   0x7   : > { %p163_p3 = scmp.lt.s32.totalorder (!%p139_p2), %s162_s16, 5 }
   0xb   : > { %v316_v0 = vld [vmem:[%s383_s1 + $0x8] sm:$0xff]  ;;  %v315_v1 = vld [vmem:[%s383_s1] sm:$0xff]  ;;  %s387_s16 = smov (!%p163_p3, %s162_s16), 5  ;;  %vm206_vm0 = vcmask 261120   ;;  %vm231_vm1 = vcmask 785408  }
   0xc   : > { %219 = vmatpush.bf16.msra.mxu0 %v316_v0  ;;  %317 = vmatpush.bf16.msra.mxu1 %v316_v0  ;;  %s296_s19 = sshll.u32 %s387_s16, 2  ;;  %s297_s23 = sshll.u32 %s387_s16, 3  ;;  %v327_v6 = vld [vmem:[%s384_s2] ss:$0 sm:$0xff] }
   0xd   : > { %s166_s22 = scalar_lea.vmem %s382_s0, %s296_s19  ;;  %s172_s28 = scalar_lea.vmem %s385_s3, %s297_s23 }
   0xe   : > { %v314_v2 = vld [vmem:[%s166_s22] sm:$0xff]  ;;  %v177_v3 = vld [vmem:[%s166_s22 + $0x8] sm:$0xf] }
   0xf   : > { %v191_v4 = vunpack.c.l.b16 %v177_v3 }
  0x10   : > { %220 = vmatpush.bf16.msra.mxu0 %v315_v1  ;;  %318 = vmatpush.bf16.msra.mxu1 %v315_v1 }
  0x11   : > { %v193_v5 = vpack.c.b16 %v191_v4, %v191_v4 }
  0x13   : > { %310 = vmatmul.msk.bf16.vlgmr.msra.gmra.mxu0 %vm206_vm0, %v314_v2  ;;  %311 = vmatmul.msk.bf16.vlgmr.msra.gmra.mxu1 %vm206_vm0, %v193_v5 }
  0x90   : > { %v222_v7 = vpop.f32.mrf.mxu0  ;;  %v227_v9 = vpop.f32.mrf.mxu1 }
  0x91   : > { %v223_v8 = vadd.f32 %v327_v6, %v222_v7  ;;  %v228_v10 = vadd.f32 %v327_v6, %v227_v9 }
  0x93   : > { %232 = vst.msk [vmem:[%s172_s28] sm:$0xff] %vm231_vm1, %v223_v8 }
  0x94   : > { %234 = vst.msk [vmem:[%s172_s28 + $0x10] sm:$0xff] %vm231_vm1, %v228_v10 }
  0x98   : > { %v224_v11 = vpop.f32.mrf.mxu0  ;;  %v229_v13 = vpop.f32.mrf.mxu1 }
  0x99   : > { %v225_v12 = vadd.f32 %v327_v6, %v224_v11 }
  0x9b   : > { %233 = vst.msk [vmem:[%s172_s28 + $0x8] sm:$0xff] %vm231_vm1, %v225_v12 }
  0x9c PF: > { %s13_s12 = sadd.s32 1, %s334_s12  }
  0x9d   : > { %p10_p4 = scmp.ge.s32.totalorder %s13_s12, 4  }
  0x9f   :  { %12 = sbr.rel (!%p10_p4) target bundleno = 1 (0x1), region = 62 }

// kernel: autoformer_forward.22
= control target key start
LH: loop header
LB: loop body
LE: loop exit
PB: predicated region body
PF: predicated region fallthrough
CT: control target
= control target key end

     0   :  { %s616_s18 = smov 0   ;;  %s687_s0 = inlined_call_operand.vmem [shape: f32[2,24,7], index: 0, kind: input, shape index: {}]   ;;  %s688_s1 = inlined_call_operand.vmem [shape: f32[2,24,4], index: 1, kind: input, shape index: {}]   ;;  %s689_s2 = inlined_call_operand.vmem [shape: f32[2,24,24], index: 2, kind: input, shape index: {}]   ;;  %s690_s3 = inlined_call_operand.vmem [shape: bf16[3,7,32], index: 3, kind: input, shape index: {}]   ;;  %s691_s4 = inlined_call_operand.vmem [shape: bf16[4,32], index: 4, kind: input, shape index: {}]   ;;  %s692_s5 = inlined_call_operand.vmem [shape: f32[2,24,32], index: 5, kind: output, shape index: {}]  }
   0x1 LB: > { %s536_s19 = sadd.s32 4294967295, %s583_s18   ;;  %p540_p0 = scmp.ge.s32.totalorder %s583_s18, 1  ;;  %s583_s18 = sphi %s616_s18, %s15_s18  }
   0x2   : > { %p197_p1 = scmp.lt.s32.totalorder %s583_s18, 3 }
   0x4   : > { %p198_p2 = pnand %p540_p0, %p197_p1 }
   0x5   : > { %p230_p3 = scmp.lt.s32.totalorder (!%p198_p2), %s536_s19, 1 }
   0x6   : > { %201 = sbr.rel (%p198_p2) target bundleno = 329 (0x149), region = 40 }
   0xb   : > { %vm344_vm0 = vcmask 1042432   ;;  %vm345_vm1 = vcmask 1043456   ;;  %s694_s19 = smov (!%p230_p3, %s536_s19), 1  ;;  %v553_v0 = vld [vmem:[%s690_s3 + $0x4] sm:$0xf]  ;;  %v585_v1 = vmov 65535  }
   0xc   : > { %v346_v2 = vsel %vm344_vm0, 4294967295, %v585_v1  ;;  %s627_s22 = smul.u32 24, %s694_s19  ;;  %vm337_vm2 = vcmask 56320   ;;  %v252_v9 = vld [vmem:[%s689_s2] sm:$0xff]  ;;  %vm255_vm3 = vcmask 195584   ;;  %v547_v10 = vld [vmem:[%s689_s2 + $0x18] sm:$0xff] }
   0xd   : > { %v347_v3 = vsel %vm345_vm1, %v346_v2, 0  ;;  %v253_v11 = vld [vmem:[%s689_s2 + $0x8] sm:$0xff]  ;;  %v548_v12 = vld [vmem:[%s689_s2 + $0x20] sm:$0xff]  ;;  %v254_v13 = vld [vmem:[%s689_s2 + $0x10] sm:$0xff]  ;;  %vm440_vm4 = vcmask 1041408   ;;  %vm433_vm5 = vcmask 31744  }
   0xe   : > { %v349_v4 = vand.u32 %v553_v0, %v347_v3  ;;  %s234_s25 = scalar_lea.vmem %s687_s0, %s627_s22  ;;  %v549_v14 = vld [vmem:[%s689_s2 + $0x28] sm:$0xff]  ;;  %v330_v15 = vld [vmem:[%s690_s3] sm:$0xf]  ;;  %s659_s17 = scalar_lea.vmem %s688_s1, %s627_s22  ;;  %vm465_vm6 = vcmask 261120  }
   0xf   : > { %v248_v5 = vld [vmem:[%s234_s25 + $0x10] sm:$0xff]  ;;  %v247_v6 = vld [vmem:[%s234_s25 + $0x8] sm:$0xff]  ;;  %v246_v7 = vld [vmem:[%s234_s25] sm:$0xff]  ;;  %v376_v16 = vand.u32 %v347_v3, %v330_v15  ;;  %s244_s26 = scalar_lea.vmem %s692_s5, %s627_s22 }
  0x10   : > { %358 = vmatpush.bf16.msra.mxu2 %v349_v4  ;;  %278 = vmatpush.msra.mxu0 %v248_v5  ;;  %v335_v8 = vpack.c.bf16 %v247_v6, %v246_v7  ;;  %v558_v17 = vld [vmem:[%s690_s3 + $0x8] sm:$0xf]  ;;  %v430_v18 = vld [vmem:[%s691_s4] sm:$0x3]  ;;  %v336_v19 = vpack.c.bf16 %v248_v5, %v248_v5  ;;  %v251_v35 = vld [vmem:[%s659_s17 + $0x10] sm:$0xff] }
  0x11   : > { %317 = vmatpush.msra.mxu1 %v248_v5  ;;  %385 = vmatpush.bf16.msra.mxu3 %v376_v16  ;;  %v249_v20 = vld [vmem:[%s659_s17] sm:$0xff]  ;;  %v407_v21 = vand.u32 %v558_v17, %v347_v3  ;;  %v442_v22 = vsel %vm440_vm4, %v430_v18, 0  ;;  %v250_v23 = vld [vmem:[%s659_s17 + $0x8] sm:$0xff]  ;;  %v432_v36 = vpack.c.bf16 %v251_v35, %v251_v35 }
  0x12   : > { %279 = vmatpush.msra.mxu0 %v247_v6  ;;  %v431_v24 = vpack.c.bf16 %v250_v23, %v249_v20 }
  0x13   : > { %318 = vmatpush.msra.mxu1 %v247_v6  ;;  %554 = vmatmul.msk.bf16.vlgmr.msra.gmra.mxu2 %vm337_vm2, %v335_v8 }
  0x14   : > { %280 = vmatpush.msra.mxu0 %v246_v7  ;;  %565 = vmatpush.bf16.msrb.mxu2 %v407_v21 }
  0x15   : > { %319 = vmatpush.msra.mxu1 %v246_v7  ;;  %544 = vmatmul.msk.f32.vlgmr.msra.gmra.mxu0 %vm255_vm3, %v252_v9 }
  0x16   : > { %550 = vmatmul.msk.f32.vlgmr.msra.gmra.mxu1 %vm255_vm3, %v547_v10  ;;  %566 = vmatpush.bf16.msrb.mxu3 %v442_v22 }
  0x17   : > { %416 = vmatpush.bf16.msrb.mxu0 %v407_v21  ;;  %451 = vmatpush.bf16.msrb.mxu1 %v442_v22 }
  0x1d   : > { %545 = vmatmul.msk.f32.gmra.mxu0 %vm255_vm3, %v253_v11 }
  0x1e   : > { %551 = vmatmul.msk.f32.gmra.mxu1 %vm255_vm3, %v548_v12 }
  0x23   : > { %555 = vmatmul.msk.bf16.gmra.mxu2 %vm337_vm2, %v336_v19 }
  0x25   : > { %546 = vmatmul.msk.f32.gmra.mxu0 %vm255_vm3, %v254_v13 }
  0x26   : > { %552 = vmatmul.msk.f32.gmra.mxu1 %vm255_vm3, %v549_v14 }
  0x2e   : > { %561 = vmatmul.msk.bf16.vlgmr.msrb.gmra.mxu1 %vm433_vm5, %v431_v24 }
  0x92   : > { %v282_v25 = vpop.f32.mrf.mxu0 }
  0x93   : > { %v321_v26 = vpop.f32.mrf.mxu1 }
  0x96   : > { %v360_v37 = vpop.f32.mrf.mxu2 }
  0x9a   : > { %v285_v27 = vpop.f32.mrf.mxu0 }
  0x9b   : > { %v324_v28 = vpop.f32.mrf.mxu1  ;;  %v331_v29 = vpack.c.bf16 %v285_v27, %v282_v25 }
  0x9c   : > { %v398_v30 = vpack.c.bf16 %v324_v28, %v321_v26 }
  0x9d   : > { %556 = vmatmul.msk.bf16.vlgmr.msra.gmra.mxu3 %vm337_vm2, %v331_v29 }
  0x9e   : > { %559 = vmatmul.msk.bf16.vlgmr.msrb.gmra.mxu0 %vm337_vm2, %v398_v30  ;;  %v362_v38 = vpop.f32.mrf.mxu2 }
  0xa2   : > { %v288_v33 = vpop.f32.mrf.mxu0 }
  0xa3   : > { %v327_v31 = vpop.f32.mrf.mxu1  ;;  %v332_v34 = vpack.c.bf16 %v288_v33, %v288_v33 }
  0xa4   : > { %v399_v32 = vpack.c.bf16 %v327_v31, %v327_v31 }
  0xa6   : > { %560 = vmatmul.msk.bf16.vlgmr.msrb.gmra.mxu2 %vm337_vm2, %v399_v32  ;;  %v365_v39 = vpop.f32.mrf.mxu2 }
  0xab   : > { %v453_v43 = vpop.f32.mrf.mxu1 }
  0xad   : > { %557 = vmatmul.msk.bf16.gmra.mxu3 %vm337_vm2, %v332_v34 }
  0xae   : > { %v367_v40 = vpop.f32.mrf.mxu2 }
  0xb3   : > { %v455_v51 = vpop.f32.mrf.mxu1 }
  0xbd   : > { %562 = vmatmul.msk.bf16.vlgmr.msrb.gmra.mxu3 %vm433_vm5, %v432_v36 }
 0x11b   : > { %v418_v41 = vpop.f32.mrf.mxu0 }
 0x120   : > { %v387_v42 = vpop.f32.mrf.mxu3 }
 0x121   : > { %v388_v44 = vadd.f32 %v387_v42, %v360_v37 }
 0x123   : > { %v427_v45 = vadd.f32 %v418_v41, %v388_v44  ;;  %v420_v47 = vpop.f32.mrf.mxu0 }
 0x125   : > { %v462_v46 = vadd.f32 %v453_v43, %v427_v45 }
 0x127   : > { %466 = vst.msk [vmem:[%s244_s26] sm:$0xff] %vm465_vm6, %v462_v46 }
 0x128   : > { %v389_v48 = vpop.f32.mrf.mxu3 }
 0x129   : > { %v423_v49 = vpop.f32.mrf.mxu2  ;;  %v390_v50 = vadd.f32 %v389_v48, %v362_v38 }
 0x12b   : > { %v428_v52 = vadd.f32 %v420_v47, %v390_v50 }
 0x12d   : > { %v463_v53 = vadd.f32 %v455_v51, %v428_v52 }
 0x12f   : > { %467 = vst.msk [vmem:[%s244_s26 + $0x8] sm:$0xff] %vm465_vm6, %v463_v53 }
 0x130   : > { %v392_v54 = vpop.f32.mrf.mxu3 }
 0x131   : > { %v425_v55 = vpop.f32.mrf.mxu2  ;;  %v393_v57 = vadd.f32 %v392_v54, %v365_v39 }
 0x133   : > { %v429_v58 = vadd.f32 %v423_v49, %v393_v57 }
 0x138   : > { %v394_v56 = vpop.f32.mrf.mxu3 }
 0x140   : > { %v458_v59 = vpop.f32.mrf.mxu3 }
 0x141   : > { %v464_v60 = vadd.f32 %v458_v59, %v429_v58 }
 0x143   : > { %468 = vst.msk [vmem:[%s244_s26 + $0x10] sm:$0xff] %vm465_vm6, %v464_v60 }
 0x148   : > { %v460_v61 = vpop.f32.mrf.mxu3 }
 0x149 PF: > { %s15_s18 = sadd.s32 1, %s583_s18  }
 0x14a   : > { %p12_p4 = scmp.ge.s32.totalorder %s15_s18, 4  }
 0x14c   :  { %14 = sbr.rel (!%p12_p4) target bundleno = 1 (0x1), region = 76 }

// kernel: reverse.9
= control target key start
LH: loop header
LB: loop body
LE: loop exit
PB: predicated region body
PF: predicated region fallthrough
CT: control target
= control target key end

     0   :  { %v2_v0 = vlaneseq  ;;  %s241_s0 = inlined_call_operand.vmem [shape: f32[2,4,8,11], index: 0, kind: input, shape index: {}]   ;;  %s242_s1 = inlined_call_operand.vmem [shape: f32[2,4,8,11], index: 1, kind: output, shape index: {}]  }
   0x1   :  { %v51_v2 = vld [vmem:[%s241_s0 + $0x10] sm:$0xff]  ;;  %v47_v3 = vld [vmem:[%s241_s0] sm:$0xff]  ;;  %v53_v5 = vld [vmem:[%s241_s0 + $0x18] sm:$0xff] }
   0x2   :  { %v3_v1 = vsub.s32 10, %v2_v0  ;;  %v55_v4 = vld [vmem:[%s241_s0 + $0x20] sm:$0xff]  ;;  %v49_v6 = vld [vmem:[%s241_s0 + $0x8] sm:$0xff]  ;;  %v61_v8 = vld [vmem:[%s241_s0 + $0x38] sm:$0xff] }
   0x3   :  { %v57_v7 = vld [vmem:[%s241_s0 + $0x28] sm:$0xff]  ;;  %v59_v9 = vld [vmem:[%s241_s0 + $0x30] sm:$0xff] }
   0x4   :  { %4 = vset.pattern.permute.xlu0 %v3_v1  ;;  %181 = vset.pattern.permute.xlu1 %v3_v1 }
   0x5   :  { %182 = vset.pattern.permute.xlu2 %v3_v1  ;;  %79 = vperm.xlu1 %181, %v51_v2  }
   0x6   :  { %67 = vperm.xlu0 %4, %v47_v3   ;;  %91 = vperm.xlu2 %182, %v55_v4  }
   0xd   :  { %85 = vperm.xlu1 %181, %v53_v5  }
   0xe   :  { %73 = vperm.xlu0 %4, %v49_v6   ;;  %97 = vperm.xlu2 %182, %v57_v7  }
  0x15   :  { %109 = vperm.xlu1 %181, %v61_v8  }
  0x16   :  { %103 = vperm.xlu0 %4, %v59_v9  }
  0x60   :  { %v92_v10 = vpop.permute.xlu2 %91 }
  0x61   :  { %163 = vst [vmem:[%s242_s1 + $0x20] sm:$0xff] %v92_v10 }
  0x68   :  { %v98_v11 = vpop.permute.xlu2 %97 }
  0x69   :  { %165 = vst [vmem:[%s242_s1 + $0x28] sm:$0xff] %v98_v11 }
  0x77   :  { %v80_v12 = vpop.permute.xlu1 %79 }
  0x78   :  { %v68_v13 = vpop.permute.xlu0 %67  ;;  %159 = vst [vmem:[%s242_s1 + $0x10] sm:$0xff] %v80_v12 }
  0x79   :  { %155 = vst [vmem:[%s242_s1] sm:$0xff] %v68_v13 }
  0x7f   :  { %v86_v14 = vpop.permute.xlu1 %85 }
  0x80   :  { %v74_v15 = vpop.permute.xlu0 %73  ;;  %161 = vst [vmem:[%s242_s1 + $0x18] sm:$0xff] %v86_v14 }
  0x81   :  { %157 = vst [vmem:[%s242_s1 + $0x8] sm:$0xff] %v74_v15 }
  0x87   :  { %v110_v16 = vpop.permute.xlu1 %109 }
  0x88   :  { %v104_v17 = vpop.permute.xlu0 %103  ;;  %169 = vst [vmem:[%s242_s1 + $0x38] sm:$0xff] %v110_v16 }
  0x89   :  { %167 = vst [vmem:[%s242_s1 + $0x30] sm:$0xff] %v104_v17 }

// kernel: autoformer_forward.25
= control target key start
LH: loop header
LB: loop body
LE: loop exit
PB: predicated region body
PF: predicated region fallthrough
CT: control target
= control target key end

     0   :  { %s355_s12 = smov 0   ;;  %s386_s0 = inlined_call_operand.vmem [shape: bf16[48,32], index: 0, kind: input, shape index: {}]   ;;  %s387_s1 = inlined_call_operand.vmem [shape: bf16[32,32], index: 1, kind: input, shape index: {}]   ;;  %s388_s2 = inlined_call_operand.vmem [shape: f32[1,32], index: 2, kind: input, shape index: {}]   ;;  %s389_s3 = inlined_call_operand.vmem [shape: f32[48,32], index: 3, kind: output, shape index: {}]  }
   0x1 LB: > { %s290_s13 = sadd.s32 4294967295, %s333_s12   ;;  %p294_p0 = scmp.ge.s32.totalorder %s333_s12, 1  ;;  %s333_s12 = sphi %s355_s12, %s13_s12  }
   0x2   : > { %p138_p1 = scmp.lt.s32.totalorder %s333_s12, 3 }
   0x4   : > { %p139_p2 = pnand %p294_p0, %p138_p1 }
   0x5   : > { %s162_s16 = smul.u32 (!%p139_p2), 3, %s290_s13 }
   0x6   : > { %142 = sbr.rel (%p139_p2) target bundleno = 156 (0x9c), region = 32 }
   0x7   : > { %p163_p3 = scmp.lt.s32.totalorder (!%p139_p2), %s162_s16, 5 }
   0xb   : > { %v315_v0 = vld [vmem:[%s387_s1 + $0x8] sm:$0xff]  ;;  %v314_v1 = vld [vmem:[%s387_s1] sm:$0xff]  ;;  %s391_s16 = smov (!%p163_p3, %s162_s16), 5  ;;  %vm206_vm0 = vcmask 261120  }
   0xc   : > { %219 = vmatpush.bf16.msra.mxu0 %v315_v0  ;;  %316 = vmatpush.bf16.msra.mxu1 %v315_v0  ;;  %s295_s19 = sshll.u32 %s391_s16, 2  ;;  %s296_s23 = sshll.u32 %s391_s16, 3  ;;  %v326_v6 = vld [vmem:[%s388_s2] ss:$0 sm:$0xff] }
   0xd   : > { %s166_s22 = scalar_lea.vmem %s386_s0, %s295_s19  ;;  %s172_s28 = scalar_lea.vmem %s389_s3, %s296_s23 }
   0xe   : > { %v313_v2 = vld [vmem:[%s166_s22] sm:$0xff]  ;;  %v177_v3 = vld [vmem:[%s166_s22 + $0x8] sm:$0xf] }
   0xf   : > { %v191_v4 = vunpack.c.l.b16 %v177_v3 }
  0x10   : > { %220 = vmatpush.bf16.msra.mxu0 %v314_v1  ;;  %317 = vmatpush.bf16.msra.mxu1 %v314_v1 }
  0x11   : > { %v193_v5 = vpack.c.b16 %v191_v4, %v191_v4 }
  0x13   : > { %309 = vmatmul.msk.bf16.vlgmr.msra.gmra.mxu0 %vm206_vm0, %v313_v2  ;;  %310 = vmatmul.msk.bf16.vlgmr.msra.gmra.mxu1 %vm206_vm0, %v193_v5 }
  0x90   : > { %v222_v7 = vpop.f32.mrf.mxu0  ;;  %v227_v9 = vpop.f32.mrf.mxu1 }
  0x91   : > { %v223_v8 = vadd.f32 %v326_v6, %v222_v7  ;;  %v228_v10 = vadd.f32 %v326_v6, %v227_v9 }
  0x93   : > { %231 = vst.msk [vmem:[%s172_s28] sm:$0xff] %vm206_vm0, %v223_v8 }
  0x94   : > { %233 = vst.msk [vmem:[%s172_s28 + $0x10] sm:$0xff] %vm206_vm0, %v228_v10 }
  0x98   : > { %v224_v11 = vpop.f32.mrf.mxu0  ;;  %v229_v13 = vpop.f32.mrf.mxu1 }
  0x99   : > { %v225_v12 = vadd.f32 %v326_v6, %v224_v11 }
  0x9b   : > { %232 = vst.msk [vmem:[%s172_s28 + $0x8] sm:$0xff] %vm206_vm0, %v225_v12 }
  0x9c PF: > { %s13_s12 = sadd.s32 1, %s333_s12  }
  0x9d   : > { %p10_p4 = scmp.ge.s32.totalorder %s13_s12, 4  }
  0x9f   :  { %12 = sbr.rel (!%p10_p4) target bundleno = 1 (0x1), region = 62 }

// kernel: autoformer_forward.24
= control target key start
LH: loop header
LB: loop body
LE: loop exit
PB: predicated region body
PF: predicated region fallthrough
CT: control target
= control target key end

     0   :  { %s577_s21 = smov 0   ;;  %s632_s0 = inlined_call_operand.vmem [shape: f32[2,24,32], index: 0, kind: input, shape index: {}]   ;;  %s633_s1 = inlined_call_operand.vmem [shape: f32[2,24,32], index: 1, kind: input, shape index: {}]   ;;  %s634_s2 = inlined_call_operand.vmem [shape: bf16[32,32], index: 2, kind: input, shape index: {}]   ;;  %s635_s3 = inlined_call_operand.vmem [shape: f32[1,32], index: 3, kind: input, shape index: {}]   ;;  %s636_s4 = inlined_call_operand.vmem [shape: f32[24,24], index: 4, kind: input, shape index: {}]   ;;  %s637_s5 = inlined_call_operand.vmem [shape: f32[2,24,32], index: 5, kind: output, shape index: {0}]   ;;  %s638_s6 = inlined_call_operand.vmem [shape: f32[2,24,32], index: 6, kind: output, shape index: {1}]  }
   0x1 LB: > { %s493_s22 = sadd.s32 4294967295, %s540_s21   ;;  %p497_p0 = scmp.ge.s32.totalorder %s540_s21, 1  ;;  %s540_s21 = sphi %s577_s21, %s17_s21  }
   0x2   : > { %p225_p1 = scmp.lt.s32.totalorder %s540_s21, 3 }
   0x4   : > { %p226_p2 = pnand %p497_p0, %p225_p1 }
   0x5   : > { %p265_p3 = scmp.lt.s32.totalorder (!%p226_p2), %s493_s22, 1 }
   0x6   : > { %229 = sbr.rel (%p226_p2) target bundleno = 303 (0x12f), region = 40 }
   0xb   : > { %v518_v0 = vld [vmem:[%s634_s2 + $0x8] sm:$0xff]  ;;  %v517_v1 = vld [vmem:[%s634_s2] sm:$0xff]  ;;  %s640_s22 = smov (!%p265_p3, %s493_s22), 1  ;;  %vm310_vm0 = vcmask 261120   ;;  %vm348_vm1 = vcmask 195584   ;;  %v347_v23 = vld [vmem:[%s636_s4 + $0x10] sm:$0xff] }
   0xc   : > { %323 = vmatpush.bf16.msra.mxu0 %v518_v0  ;;  %519 = vmatpush.bf16.msra.mxu2 %v518_v0  ;;  %s591_s27 = smul.u32 24, %s640_s22  ;;  %v533_v12 = vld [vmem:[%s635_s3] ss:$0 sm:$0xff]  ;;  %v346_v21 = vld [vmem:[%s636_s4 + $0x8] sm:$0xff] }
   0xd   : > { %v345_v20 = vld [vmem:[%s636_s4] sm:$0xff] }
   0xe   : > { %s269_s30 = scalar_lea.vmem %s632_s0, %s591_s27  ;;  %s274_s9 = scalar_lea.vmem %s633_s1, %s591_s27 }
   0xf   : > { %v289_v2 = vld [vmem:[%s269_s30] sm:$0xff]  ;;  %v290_v3 = vld [vmem:[%s269_s30 + $0x8] sm:$0xff]  ;;  %v291_v4 = vld [vmem:[%s269_s30 + $0x10] sm:$0xff]  ;;  %s279_s20 = scalar_lea.vmem %s637_s5, %s591_s27  ;;  %s284_s24 = scalar_lea.vmem %s638_s6, %s591_s27 }
  0x10   : > { %324 = vmatpush.bf16.msra.mxu0 %v517_v1  ;;  %520 = vmatpush.bf16.msra.mxu2 %v517_v1  ;;  %v296_v5 = vpack.c.bf16 %v290_v3, %v289_v2  ;;  %v297_v6 = vpack.c.bf16 %v291_v4, %v291_v4  ;;  %v288_v8 = vld [vmem:[%s274_s9 + $0x10] sm:$0xff]  ;;  %v286_v9 = vld [vmem:[%s274_s9] sm:$0xff]  ;;  %v287_v11 = vld [vmem:[%s274_s9 + $0x8] sm:$0xff] }
  0x13   : > { %510 = vmatmul.msk.bf16.vlgmr.msra.gmra.mxu0 %vm310_vm0, %v296_v5  ;;  %511 = vmatmul.msk.bf16.vlgmr.msra.gmra.mxu2 %vm310_vm0, %v297_v6 }
  0x90   : > { %v326_v7 = vpop.f32.mrf.mxu0 }
  0x91   : > { %v335_v15 = vadd.f32 %v326_v7, %v286_v9 }
  0x93   : > { %v342_v19 = vadd.f32 %v533_v12, %v335_v15 }
  0x96   : > { %v331_v10 = vpop.f32.mrf.mxu2 }
  0x97   : > { %v337_v13 = vadd.f32 %v331_v10, %v288_v8 }
  0x98   : > { %v328_v14 = vpop.f32.mrf.mxu0 }
  0x99   : > { %v344_v16 = vadd.f32 %v533_v12, %v337_v13  ;;  %v336_v17 = vadd.f32 %v328_v14, %v287_v11 }
  0x9b   : > { %v343_v18 = vadd.f32 %v533_v12, %v336_v17  ;;  %371 = vmatpush.msra.mxu1 %v344_v16  ;;  %521 = vmatpush.msra.mxu3 %v344_v16 }
  0x9d   : > { %372 = vmatpush.msra.mxu1 %v343_v18  ;;  %522 = vmatpush.msra.mxu3 %v343_v18 }
  0x9e   : > { %v333_v22 = vpop.f32.mrf.mxu2 }
  0x9f   : > { %373 = vmatpush.msra.mxu1 %v342_v19  ;;  %523 = vmatpush.msra.mxu3 %v342_v19 }
  0xa0   : > { %512 = vmatmul.msk.f32.vlgmr.msra.gmra.mxu1 %vm348_vm1, %v345_v20  ;;  %513 = vmatmul.msk.f32.vlgmr.msra.gmra.mxu3 %vm348_vm1, %v346_v21 }
  0xa8   : > { %514 = vmatmul.msk.f32.gmra.mxu3 %vm348_vm1, %v347_v23 }
 0x11d   : > { %v375_v24 = vpop.f32.mrf.mxu1 }
 0x11e   : > { %v384_v25 = vsub.f32 %v342_v19, %v375_v24  ;;  %390 = vst.msk [vmem:[%s284_s24] sm:$0xff] %vm310_vm0, %v375_v24 }
 0x120   : > { %387 = vst.msk [vmem:[%s279_s20] sm:$0xff] %vm310_vm0, %v384_v25 }
 0x123   : > { %v378_v26 = vpop.f32.mrf.mxu3 }
 0x124   : > { %v385_v27 = vsub.f32 %v343_v18, %v378_v26  ;;  %391 = vst.msk [vmem:[%s284_s24 + $0x8] sm:$0xff] %vm310_vm0, %v378_v26 }
 0x126   : > { %388 = vst.msk [vmem:[%s279_s20 + $0x8] sm:$0xff] %vm310_vm0, %v385_v27 }
 0x12b   : > { %v381_v28 = vpop.f32.mrf.mxu3 }
 0x12c   : > { %v386_v29 = vsub.f32 %v344_v16, %v381_v28  ;;  %392 = vst.msk [vmem:[%s284_s24 + $0x10] sm:$0xff] %vm310_vm0, %v381_v28 }
 0x12e   : > { %389 = vst.msk [vmem:[%s279_s20 + $0x10] sm:$0xff] %vm310_vm0, %v386_v29 }
 0x12f PF: > { %s17_s21 = sadd.s32 1, %s540_s21  }
 0x130   : > { %p14_p4 = scmp.ge.s32.totalorder %s17_s21, 4  }
 0x132   :  { %16 = sbr.rel (!%p14_p4) target bundleno = 1 (0x1), region = 85 }

// kernel: autoformer_forward.27
= control target key start
LH: loop header
LB: loop body
LE: loop exit
PB: predicated region body
PF: predicated region fallthrough
CT: control target
= control target key end

     0   :  { %s602_s21 = smov 0   ;;  %s658_s0 = inlined_call_operand.vmem [shape: f32[2,24,32], index: 0, kind: input, shape index: {}]   ;;  %s659_s1 = inlined_call_operand.vmem [shape: f32[1,32], index: 1, kind: input, shape index: {}]   ;;  %s660_s2 = inlined_call_operand.vmem [shape: f32[1,32], index: 2, kind: input, shape index: {}]   ;;  %s661_s3 = inlined_call_operand.vmem [shape: bf16[32,7], index: 3, kind: input, shape index: {}]   ;;  %s662_s4 = inlined_call_operand.vmem [shape: f32[1,7], index: 4, kind: input, shape index: {}]   ;;  %s663_s5 = inlined_call_operand.vmem [shape: f32[2,24,7], index: 5, kind: input, shape index: {}]   ;;  %s664_s6 = inlined_call_operand.vmem [shape: f32[2,24,7], index: 6, kind: output, shape index: {}]  }
   0x1 LB: > { %s509_s22 = sadd.s32 4294967295, %s563_s21   ;;  %p513_p0 = scmp.ge.s32.totalorder %s563_s21, 1  ;;  %s563_s21 = sphi %s602_s21, %s16_s21  }
   0x2   : > { %p222_p1 = scmp.lt.s32.totalorder %s563_s21, 3 }
   0x4   : > { %p223_p2 = pnand %p513_p0, %p222_p1 }
   0x5   : > { %p257_p3 = scmp.lt.s32.totalorder (!%p223_p2), %s509_s22, 1 }
   0x6   : > { %226 = sbr.rel (%p223_p2) target bundleno = 460 (0x1cc), region = 44 }
   0xb   : > { %s666_s22 = smov (!%p257_p3, %s509_s22), 1  ;;  %vm276_vm0 = vcmask 261120   ;;  %v565_v6 = vmov 32.0   ;;  %v530_v33 = vld [vmem:[%s661_s3 + $0x8] sm:$0xff]  ;;  %v529_v36 = vld [vmem:[%s661_s3] sm:$0xff]  ;;  %v566_v60 = vmov 24.0  }
   0xc   : > { %s610_s23 = smul.u32 24, %s666_s22  ;;  %547 = vrcp.f32 %v565_v6  ;;  %420 = vmatpush.bf16.msra.mxu0 %v530_v33  ;;  %531 = vmatpush.bf16.msra.mxu1 %v530_v33  ;;  %v544_v58 = vld [vmem:[%s659_s1] ss:$0 sm:$0xff]  ;;  %vm438_vm12 = vcmask 56320  }
   0xe   : > { %s261_s26 = scalar_lea.vmem %s658_s0, %s610_s23  ;;  %s266_s13 = scalar_lea.vmem %s663_s5, %s610_s23 }
   0xf   : > { %v273_v0 = vld [vmem:[%s261_s26] sm:$0xff]  ;;  %v275_v1 = vld [vmem:[%s261_s26 + $0x10] sm:$0xff]  ;;  %v274_v4 = vld [vmem:[%s261_s26 + $0x8] sm:$0xff]  ;;  %s271_s18 = scalar_lea.vmem %s664_s6, %s610_s23 }
  0x10   : > { %v277_v2 = vsel %vm276_vm0, %v273_v0, 0.0  ;;  %v283_v3 = vsel %vm276_vm0, %v275_v1, 0.0  ;;  %v280_v5 = vsel %vm276_vm0, %v274_v4, 0.0  ;;  %421 = vmatpush.bf16.msra.mxu0 %v529_v36  ;;  %532 = vmatpush.bf16.msra.mxu1 %v529_v36  ;;  %v432_v33 = vld [vmem:[%s266_s13] sm:$0xff] }
  0x11   : > { %278 = vadd.xlane.f32.xlu0 %v277_v2  ;;  %284 = vadd.xlane.f32.xlu1 %v283_v3 }
  0x12   : > { %v548_v7 = vpop.eup %547 }
  0x13   : > { %v287_v8 = vmul.f32 32.0, %v548_v7  ;;  %vm291_vm1 = vweird.f32 %v548_v7 }
  0x15   : > { %v288_v9 = vsub.f32 1.0, %v287_v8 }
  0x17   : > { %v289_v10 = vmul.f32 %v548_v7, %v288_v9 }
  0x19   : > { %281 = vadd.xlane.f32.xlu0 %v280_v5  ;;  %v290_v11 = vadd.f32 %v548_v7, %v289_v10 }
  0x1b   : > { %v292_v12 = vsel %vm291_vm1, %v548_v7, %v290_v11 }
  0x84   : > { %v279_v13 = vpop.xlane.xlu0 %278  ;;  %v285_v17 = vpop.xlane.xlu1 %284 }
  0x85   : > { %v293_v14 = vmul.f32 %v292_v12, %v279_v13  ;;  %v295_v21 = vmul.f32 %v292_v12, %v285_v17 }
  0x87   : > { %v296_v15 = vsub.f32 %v273_v0, %v293_v14  ;;  %v620_v23 = vsub.f32 %v275_v1, %v295_v21  ;;  %v545_v0 = vld [vmem:[%s660_s2] ss:$0 sm:$0xff] }
  0x89   : > { %v299_v16 = vmul.f32 %v296_v15, %v296_v15  ;;  %v301_v26 = vmul.f32 %v620_v23, %v620_v23 }
  0x8b   : > { %v302_v18 = vsel %vm276_vm0, %v299_v16, 0.0  ;;  %v308_v27 = vsel %vm276_vm0, %v301_v26, 0.0 }
  0x8c   : > { %303 = vadd.xlane.f32.xlu1 %v302_v18  ;;  %v282_v19 = vpop.xlane.xlu0 %281 }
  0x8d   : > { %v294_v20 = vmul.f32 %v292_v12, %v282_v19 }
  0x8f   : > { %v297_v22 = vsub.f32 %v274_v4, %v294_v20 }
  0x91   : > { %v300_v24 = vmul.f32 %v297_v22, %v297_v22 }
  0x93   : > { %v305_v25 = vsel %vm276_vm0, %v300_v24, 0.0 }
  0x94   : > { %306 = vadd.xlane.f32.xlu2 %v305_v25 }
  0x9c   : > { %309 = vadd.xlane.f32.xlu2 %v308_v27 }
  0xff   : > { %v304_v28 = vpop.xlane.xlu1 %303 }
 0x100   : > { %v311_v29 = vmul.f32 %v304_v28, %v292_v12 }
 0x102   : > { %v314_v30 = vadd.f32 1e-05, %v311_v29 }
 0x104   : > { %549 = vrsqrt.f32 %v314_v30  ;;  %vm323_vm3 = vweird.f32 %v314_v30 }
 0x107   : > { %v307_v31 = vpop.xlane.xlu2 %306 }
 0x108   : > { %v312_v32 = vmul.f32 %v307_v31, %v292_v12  ;;  %v546_v31 = vld [vmem:[%s662_s4] ss:$0 sm:$0xff] }
 0x10a   : > { %v550_v34 = vpop.eup %549  ;;  %v315_v35 = vadd.f32 1e-05, %v312_v32 }
 0x10b   : > { %v318_v37 = vmul.f32 %v550_v34, %v314_v30  ;;  %vm324_vm2 = vweird.f32 %v550_v34 }
 0x10c   : > { %551 = vrsqrt.f32 %v315_v35  ;;  %vm325_vm5 = vmor %vm323_vm3, %vm324_vm2  ;;  %vm333_vm6 = vweird.f32 %v315_v35 }
 0x10d   : > { %v319_v38 = vmul.f32 %v550_v34, %v318_v37 }
 0x10f   : > { %v320_v39 = vmul.f32 0.5, %v319_v38  ;;  %v310_v40 = vpop.xlane.xlu2 %309 }
 0x110   : > { %v313_v41 = vmul.f32 %v310_v40, %v292_v12 }
 0x111   : > { %v321_v44 = vsub.f32 1.5, %v320_v39 }
 0x112   : > { %v552_v42 = vpop.eup %551  ;;  %v316_v43 = vadd.f32 1e-05, %v313_v41  ;;  %v433_v41 = vld [vmem:[%s266_s13 + $0x8] sm:$0xff] }
 0x113   : > { %v328_v45 = vmul.f32 %v552_v42, %v315_v35  ;;  %v322_v47 = vmul.f32 %v550_v34, %v321_v44  ;;  %vm334_vm4 = vweird.f32 %v552_v42  ;;  %v434_v35 = vld [vmem:[%s266_s13 + $0x10] sm:$0xff] }
 0x114   : > { %553 = vrsqrt.f32 %v316_v43  ;;  %vm335_vm7 = vmor %vm333_vm6, %vm334_vm4  ;;  %vm343_vm9 = vweird.f32 %v316_v43 }
 0x115   : > { %v329_v46 = vmul.f32 %v552_v42, %v328_v45  ;;  %v326_v51 = vsel %vm325_vm5, %v550_v34, %v322_v47  ;;  %555 = vrcp.f32 %v566_v60 }
 0x116   : > { %v347_v56 = vmul.f32 %v326_v51, %v296_v15 }
 0x117   : > { %v330_v48 = vmul.f32 0.5, %v329_v46 }
 0x118   : > { %v354_v63 = vmul.f32 %v544_v58, %v347_v56 }
 0x119   : > { %v331_v49 = vsub.f32 1.5, %v330_v48 }
 0x11a   : > { %v554_v50 = vpop.eup %553  ;;  %v361_v6 = vadd.f32 %v545_v0, %v354_v63 }
 0x11b   : > { %v332_v52 = vmul.f32 %v552_v42, %v331_v49  ;;  %v338_v53 = vmul.f32 %v554_v50, %v316_v43  ;;  %vm344_vm8 = vweird.f32 %v554_v50  ;;  %v556_v3 = vpop.eup %555 }
 0x11c   : > { %vm345_vm10 = vmor %vm343_vm9, %vm344_vm8  ;;  %v376_v9 = vmul.f32 24.0, %v556_v3  ;;  %v364_v11 = vsel %vm276_vm0, %v361_v6, 0.0  ;;  %vm380_vm11 = vweird.f32 %v556_v3 }
 0x11d   : > { %v336_v54 = vsel %vm335_vm7, %v552_v42, %v332_v52  ;;  %v339_v55 = vmul.f32 %v554_v50, %v338_v53 }
 0x11e   : > { %v348_v57 = vmul.f32 %v336_v54, %v297_v22  ;;  %v377_v14 = vsub.f32 1.0, %v376_v9 }
 0x11f   : > { %v340_v59 = vmul.f32 0.5, %v339_v55 }
 0x120   : > { %v355_v61 = vmul.f32 %v544_v58, %v348_v57  ;;  %v378_v17 = vmul.f32 %v556_v3, %v377_v14 }
 0x121   : > { %v341_v62 = vsub.f32 1.5, %v340_v59 }
 0x122   : > { %v362_v2 = vadd.f32 %v545_v0, %v355_v61  ;;  %v379_v20 = vadd.f32 %v556_v3, %v378_v17 }
 0x123   : > { %v342_v1 = vmul.f32 %v554_v50, %v341_v62 }
 0x124   : > { %v365_v8 = vsel %vm276_vm0, %v362_v2, 0.0 }
 0x125   : > { %v346_v4 = vsel %vm345_vm10, %v554_v50, %v342_v1  ;;  %v366_v12 = vadd.f32 %v365_v8, %v364_v11 }
 0x126   : > { %v349_v5 = vmul.f32 %v346_v4, %v620_v23  ;;  %v381_v23 = vsel %vm380_vm11, %v556_v3, %v379_v20 }
 0x128   : > { %v356_v7 = vmul.f32 %v544_v58, %v349_v5 }
 0x12a   : > { %v363_v10 = vadd.f32 %v545_v0, %v356_v7 }
 0x12c   : > { %v367_v13 = vsel %vm276_vm0, %v363_v10, 0.0 }
 0x12d   : > { %v368_v15 = vadd.f32 %v367_v13, %v366_v12 }
 0x12f   : > { %v369_v16 = vrot.slane %v368_v15, 4 }
 0x131   : > { %v370_v18 = vadd.f32 %v369_v16, %v368_v15 }
 0x133   : > { %v371_v19 = vrot.slane %v370_v18, 2 }
 0x135   : > { %v372_v21 = vadd.f32 %v371_v19, %v370_v18 }
 0x137   : > { %v373_v22 = vrot.slane %v372_v21, 1 }
 0x139   : > { %v374_v24 = vadd.f32 %v373_v22, %v372_v21 }
 0x13b   : > { %v382_v25 = vmul.f32 %v381_v23, %v374_v24 }
 0x13d   : > { %v383_v26 = vsub.f32 %v361_v6, %v382_v25  ;;  %v384_v27 = vsub.f32 %v362_v2, %v382_v25  ;;  %v385_v28 = vsub.f32 %v363_v10, %v382_v25 }
 0x13f   : > { %v390_v29 = vpack.c.bf16 %v384_v27, %v383_v26  ;;  %v391_v30 = vpack.c.bf16 %v385_v28, %v385_v28 }
 0x141   : > { %525 = vmatmul.msk.bf16.vlgmr.msra.gmra.mxu0 %vm276_vm0, %v390_v29  ;;  %526 = vmatmul.msk.bf16.vlgmr.msra.gmra.mxu1 %vm276_vm0, %v391_v30 }
 0x1be   : > { %v423_v32 = vpop.f32.mrf.mxu0  ;;  %v428_v34 = vpop.f32.mrf.mxu1 }
 0x1bf   : > { %v424_v36 = vadd.f32 %v546_v31, %v423_v32  ;;  %v429_v37 = vadd.f32 %v546_v31, %v428_v34 }
 0x1c1   : > { %v435_v38 = vadd.f32 %v432_v33, %v424_v36  ;;  %v437_v39 = vadd.f32 %v434_v35, %v429_v37 }
 0x1c3   : > { %439 = vst.msk [vmem:[%s271_s18] sm:$0xff] %vm438_vm12, %v435_v38 }
 0x1c4   : > { %441 = vst.msk [vmem:[%s271_s18 + $0x10] sm:$0xff] %vm438_vm12, %v437_v39 }
 0x1c6   : > { %v425_v40 = vpop.f32.mrf.mxu0  ;;  %v430_v42 = vpop.f32.mrf.mxu1 }
 0x1c7   : > { %v426_v43 = vadd.f32 %v546_v31, %v425_v40 }
 0x1c9   : > { %v436_v44 = vadd.f32 %v433_v41, %v426_v43 }
 0x1cb   : > { %440 = vst.msk [vmem:[%s271_s18 + $0x8] sm:$0xff] %vm438_vm12, %v436_v44 }
 0x1cc PF: > { %s16_s21 = sadd.s32 1, %s563_s21  }
 0x1cd   : > { %p13_p4 = scmp.ge.s32.totalorder %s16_s21, 4  }
 0x1cf   :  { %15 = sbr.rel (!%p13_p4) target bundleno = 1 (0x1), region = 77 }

// kernel: autoformer_forward.26
= control target key start
LH: loop header
LB: loop body
LE: loop exit
PB: predicated region body
PF: predicated region fallthrough
CT: control target
= control target key end

     0   :  { %s1282_s21 = smov 0   ;;  %s1419_s0 = inlined_call_operand.vmem [shape: f32[2,24,32], index: 0, kind: input, shape index: {}]   ;;  %s1420_s1 = inlined_call_operand.vmem [shape: f32[2,24,32], index: 1, kind: input, shape index: {}]   ;;  %s1421_s2 = inlined_call_operand.vmem [shape: bf16[32,32], index: 2, kind: input, shape index: {}]   ;;  %s1422_s3 = inlined_call_operand.vmem [shape: f32[1,32], index: 3, kind: input, shape index: {}]   ;;  %s1423_s4 = inlined_call_operand.vmem [shape: bf16[32,64], index: 4, kind: input, shape index: {}]   ;;  %s1424_s5 = inlined_call_operand.vmem [shape: bf16[64,32], index: 5, kind: input, shape index: {}]   ;;  %s1425_s6 = inlined_call_operand.vmem [shape: f32[24,24], index: 6, kind: input, shape index: {}]   ;;  %s1426_s7 = inlined_call_operand.vmem [shape: f32[2,24,32], index: 7, kind: input, shape index: {}]   ;;  %s1427_s8 = inlined_call_operand.vmem [shape: f32[2,24,7], index: 8, kind: input, shape index: {}]   ;;  %s1428_s9 = inlined_call_operand.vmem [shape: f32[2,24,24], index: 9, kind: input, shape index: {}]   ;;  %s1429_s10 = inlined_call_operand.vmem [shape: bf16[3,32,7], index: 10, kind: input, shape index: {}]   ;;  %s1430_s11 = inlined_call_operand.vmem [shape: f32[2,24,32], index: 11, kind: output, shape index: {0}]   ;;  %s1431_s12 = inlined_call_operand.vmem [shape: f32[2,24,7], index: 12, kind: output, shape index: {1}]  }
   0x1 LB: > { %s1079_s22 = sadd.s32 4294967295, %s1215_s21   ;;  %p1083_p0 = scmp.ge.s32.totalorder %s1215_s21, 1  ;;  %s1215_s21 = sphi %s1282_s21, %s23_s21  }
   0x2   : > { %p395_p1 = scmp.lt.s32.totalorder %s1215_s21, 3 }
   0x4   : > { %p396_p2 = pnand %p1083_p0, %p395_p1 }
   0x5   : > { %p457_p3 = scmp.lt.s32.totalorder (!%p396_p2), %s1079_s22, 1 }
   0x6   : > { %399 = sbr.rel (%p396_p2) target bundleno = 1038 (0x40e), region = 64 }
   0xb   : > { %v1184_v0 = vld [vmem:[%s1421_s2 + $0x8] sm:$0xff]  ;;  %v1183_v1 = vld [vmem:[%s1421_s2] sm:$0xff]  ;;  %s1433_s22 = smov (!%p457_p3, %s1079_s22), 1  ;;  %vm515_vm0 = vcmask 261120   ;;  %vm550_vm1 = vcmask 195584   ;;  %v490_v23 = vld [vmem:[%s1425_s6 + $0x10] sm:$0xff] }
   0xc   : > { %528 = vmatpush.bf16.msra.mxu0 %v1184_v0  ;;  %1197 = vmatpush.bf16.msra.mxu2 %v1184_v0  ;;  %s1296_s27 = smul.u32 24, %s1433_s22  ;;  %v1208_v13 = vld [vmem:[%s1422_s3] ss:$0 sm:$0xff]  ;;  %v489_v22 = vld [vmem:[%s1425_s6 + $0x8] sm:$0xff]  ;;  %v1190_v26 = vld [vmem:[%s1424_s5 + $0x18] sm:$0xff]  ;;  %vm668_vm2 = vcmask 523264  }
   0xd   : > { %v488_v20 = vld [vmem:[%s1425_s6] sm:$0xff]  ;;  %v1186_v24 = vld [vmem:[%s1423_s4 + $0x8] sm:$0xff]  ;;  %679 = vmatpush.bf16.msra.mxu3 %v1190_v26  ;;  %v1189_v35 = vld [vmem:[%s1424_s5 + $0x10] sm:$0xff]  ;;  %vm951_vm3 = vcmask 56320  }
   0xe   : > { %s461_s30 = scalar_lea.vmem %s1419_s0, %s1296_s27  ;;  %s466_s15 = scalar_lea.vmem %s1420_s1, %s1296_s27  ;;  %v1185_v25 = vld [vmem:[%s1423_s4] sm:$0xff]  ;;  %v1188_v36 = vld [vmem:[%s1424_s5 + $0x8] sm:$0xff]  ;;  %v1194_v54 = vld [vmem:[%s1429_s10 + $0x18] sm:$0xff] }
   0xf   : > { %v494_v2 = vld [vmem:[%s461_s30] sm:$0xff]  ;;  %v495_v3 = vld [vmem:[%s461_s30 + $0x8] sm:$0xff]  ;;  %v496_v4 = vld [vmem:[%s461_s30 + $0x10] sm:$0xff]  ;;  %s481_s28 = scalar_lea.vmem %s1430_s11, %s1296_s27  ;;  %s471_s13 = scalar_lea.vmem %s1426_s7, %s1296_s27 }
  0x10   : > { %529 = vmatpush.bf16.msra.mxu0 %v1183_v1  ;;  %1198 = vmatpush.bf16.msra.mxu2 %v1183_v1  ;;  %v501_v5 = vpack.c.bf16 %v495_v3, %v494_v2  ;;  %v502_v6 = vpack.c.bf16 %v496_v4, %v496_v4  ;;  %v493_v8 = vld [vmem:[%s466_s15 + $0x10] sm:$0xff]  ;;  %v491_v9 = vld [vmem:[%s466_s15] sm:$0xff]  ;;  %v492_v11 = vld [vmem:[%s466_s15 + $0x8] sm:$0xff]  ;;  %s476_s20 = scalar_lea.vmem %s1427_s8, %s1296_s27  ;;  %s486_s24 = scalar_lea.vmem %s1431_s12, %s1296_s27 }
  0x11   : > { %680 = vmatpush.bf16.msra.mxu3 %v1189_v35  ;;  %v1187_v37 = vld [vmem:[%s1424_s5] sm:$0xff]  ;;  %v1193_v55 = vld [vmem:[%s1429_s10 + $0x10] sm:$0xff]  ;;  %v729_v59 = vld [vmem:[%s471_s13 + $0x8] sm:$0xff] }
  0x12   : > { %v728_v58 = vld [vmem:[%s471_s13] sm:$0xff]  ;;  %v730_v3 = vld [vmem:[%s471_s13 + $0x10] sm:$0xff] }
  0x13   : > { %1098 = vmatmul.msk.bf16.vlgmr.msra.gmra.mxu0 %vm515_vm0, %v501_v5  ;;  %1099 = vmatmul.msk.bf16.vlgmr.msra.gmra.mxu2 %vm515_vm0, %v502_v6 }
  0x14   : > { %619 = vmatpush.bf16.msrb.mxu2 %v1186_v24 }
  0x15   : > { %681 = vmatpush.bf16.msra.mxu3 %v1188_v36  ;;  %v945_v36 = vld [vmem:[%s476_s20] sm:$0xff] }
  0x18   : > { %620 = vmatpush.bf16.msrb.mxu2 %v1185_v25 }
  0x19   : > { %682 = vmatpush.bf16.msra.mxu3 %v1187_v37 }
  0x1d   : > { %851 = vmatpush.bf16.msrb.mxu3 %v1194_v54 }
  0x21   : > { %852 = vmatpush.bf16.msrb.mxu3 %v1193_v55 }
  0x90   : > { %v531_v7 = vpop.f32.mrf.mxu0 }
  0x91   : > { %v540_v15 = vadd.f32 %v531_v7, %v491_v9  ;;  %v1137_v9 = vld [vmem:[%s1428_s9 + $0x18] sm:$0xff] }
  0x93   : > { %v547_v19 = vadd.f32 %v1208_v13, %v540_v15  ;;  %v1192_v15 = vld [vmem:[%s1429_s10 + $0x8] sm:$0xff] }
  0x96   : > { %v536_v10 = vpop.f32.mrf.mxu2 }
  0x97   : > { %v542_v12 = vadd.f32 %v536_v10, %v493_v8  ;;  %v737_v8 = vld [vmem:[%s1428_s9] sm:$0xff] }
  0x98   : > { %v533_v14 = vpop.f32.mrf.mxu0 }
  0x99   : > { %v541_v16 = vadd.f32 %v533_v14, %v492_v11  ;;  %v549_v17 = vadd.f32 %v1208_v13, %v542_v12  ;;  %v738_v11 = vld [vmem:[%s1428_s9 + $0x8] sm:$0xff]  ;;  %v1138_v12 = vld [vmem:[%s1428_s9 + $0x20] sm:$0xff] }
  0x9a   : > { %v1139_v14 = vld [vmem:[%s1428_s9 + $0x28] sm:$0xff] }
  0x9b   : > { %573 = vmatpush.msra.mxu1 %v549_v17  ;;  %v548_v18 = vadd.f32 %v1208_v13, %v541_v16  ;;  %v739_v13 = vld [vmem:[%s1428_s9 + $0x10] sm:$0xff]  ;;  %v1191_v16 = vld [vmem:[%s1429_s10] sm:$0xff] }
  0x9d   : > { %574 = vmatpush.msra.mxu1 %v548_v18 }
  0x9e   : > { %v538_v21 = vpop.f32.mrf.mxu2 }
  0x9f   : > { %575 = vmatpush.msra.mxu1 %v547_v19 }
  0xa0   : > { %1100 = vmatmul.msk.f32.vlgmr.msra.gmra.mxu1 %vm550_vm1, %v488_v20 }
  0xa8   : > { %1101 = vmatmul.msk.f32.gmra.mxu1 %vm550_vm1, %v489_v22 }
  0xb0   : > { %1102 = vmatmul.msk.f32.gmra.mxu1 %vm550_vm1, %v490_v23 }
 0x11d   : > { %v577_v27 = vpop.f32.mrf.mxu1 }
 0x11e   : > { %v586_v29 = vsub.f32 %v547_v19, %v577_v27  ;;  %v731_v60 = vadd.f32 %v728_v58, %v577_v27 }
 0x125   : > { %v580_v28 = vpop.f32.mrf.mxu1 }
 0x126   : > { %v587_v30 = vsub.f32 %v548_v18, %v580_v28  ;;  %v732_v61 = vadd.f32 %v729_v59, %v580_v28  ;;  %v1195_v18 = vld [vmem:[%s1429_s10 + $0x20] sm:$0xff] }
 0x128   : > { %v593_v31 = vpack.c.bf16 %v587_v30, %v586_v29 }
 0x12a   : > { %1111 = vmatmul.msk.bf16.vlgmr.msrb.gmra.mxu2 %vm515_vm0, %v593_v31 }
 0x12d   : > { %v583_v32 = vpop.f32.mrf.mxu1 }
 0x12e   : > { %v588_v33 = vsub.f32 %v549_v17, %v583_v32  ;;  %v733_v4 = vadd.f32 %v730_v3, %v583_v32  ;;  %v1196_v17 = vld [vmem:[%s1429_s10 + $0x28] sm:$0xff] }
 0x130   : > { %v594_v34 = vpack.c.bf16 %v588_v33, %v588_v33 }
 0x13a   : > { %1112 = vmatmul.msk.bf16.gmra.mxu2 %vm515_vm0, %v594_v34 }
 0x1ad   : > { %v622_v38 = vpop.f32.mrf.mxu2 }
 0x1ae   : > { %v631_v40 = vmax.f32 %v622_v38, 0.0 }
 0x1b5   : > { %v624_v39 = vpop.f32.mrf.mxu2 }
 0x1b6   : > { %v632_v41 = vmax.f32 %v624_v39, 0.0 }
 0x1b8   : > { %v642_v42 = vpack.c.bf16 %v632_v41, %v631_v40 }
 0x1ba   : > { %1129 = vmatmul.msk.bf16.vlgmr.msra.gmra.mxu3 %vm668_vm2, %v642_v42  ;;  %v946_v42 = vld [vmem:[%s476_s20 + $0x8] sm:$0xff] }
 0x1bd   : > { %v627_v43 = vpop.f32.mrf.mxu2 }
 0x1be   : > { %v633_v44 = vmax.f32 %v627_v43, 0.0 }
 0x1c0   : > { %v643_v46 = vpack.c.bf16 %v633_v44, %v633_v44 }
 0x1c5   : > { %v629_v45 = vpop.f32.mrf.mxu2 }
 0x1ca   : > { %1130 = vmatmul.msk.bf16.gmra.mxu3 %vm668_vm2, %v643_v46 }
 0x23d   : > { %v684_v47 = vpop.f32.mrf.mxu3 }
 0x23e   : > { %v693_v52 = vadd.f32 %v684_v47, %v586_v29 }
 0x245   : > { %v686_v48 = vpop.f32.mrf.mxu3 }
 0x246   : > { %v694_v51 = vadd.f32 %v686_v48, %v587_v30  ;;  %v947_v48 = vld [vmem:[%s476_s20 + $0x10] sm:$0xff] }
 0x24d   : > { %v689_v49 = vpop.f32.mrf.mxu3 }
 0x24e   : > { %v695_v50 = vadd.f32 %v689_v49, %v588_v33 }
 0x250   : > { %709 = vmatpush.msrb.mxu1 %v695_v50 }
 0x252   : > { %710 = vmatpush.msrb.mxu1 %v694_v51 }
 0x254   : > { %711 = vmatpush.msrb.mxu1 %v693_v52 }
 0x255   : > { %v691_v53 = vpop.f32.mrf.mxu3  ;;  %1131 = vmatmul.msk.f32.vlgmr.msrb.gmra.mxu1 %vm550_vm1, %v488_v20 }
 0x256   : > { %887 = vmatpush.bf16.msra.mxu1 %v1192_v15 }
 0x25a   : > { %888 = vmatpush.bf16.msra.mxu1 %v1191_v16 }
 0x25d   : > { %1132 = vmatmul.msk.f32.gmra.mxu1 %vm550_vm1, %v489_v22 }
 0x265   : > { %1133 = vmatmul.msk.f32.gmra.mxu1 %vm550_vm1, %v490_v23 }
 0x2d2   : > { %v713_v56 = vpop.f32.mrf.mxu1 }
 0x2d3   : > { %v722_v57 = vsub.f32 %v693_v52, %v713_v56  ;;  %v734_v63 = vadd.f32 %v731_v60, %v713_v56 }
 0x2d5   : > { %725 = vst.msk [vmem:[%s481_s28] sm:$0xff] %vm515_vm0, %v722_v57 }
 0x2da   : > { %v716_v62 = vpop.f32.mrf.mxu1 }
 0x2db   : > { %v723_v0 = vsub.f32 %v694_v51, %v716_v62  ;;  %v735_v1 = vadd.f32 %v732_v61, %v716_v62 }
 0x2dd   : > { %726 = vst.msk [vmem:[%s481_s28 + $0x8] sm:$0xff] %vm515_vm0, %v723_v0  ;;  %v825_v2 = vpack.c.bf16 %v735_v1, %v734_v63 }
 0x2df   : > { %1155 = vmatmul.msk.bf16.vlgmr.msrb.gmra.mxu3 %vm515_vm0, %v825_v2 }
 0x2e2   : > { %v719_v5 = vpop.f32.mrf.mxu1 }
 0x2e3   : > { %v724_v6 = vsub.f32 %v695_v50, %v719_v5  ;;  %v736_v7 = vadd.f32 %v733_v4, %v719_v5 }
 0x2e5   : > { %727 = vst.msk [vmem:[%s481_s28 + $0x10] sm:$0xff] %vm515_vm0, %v724_v6  ;;  %762 = vmatpush.msrb.mxu0 %v736_v7  ;;  %801 = vmatpush.msra.mxu2 %v736_v7  ;;  %v826_v10 = vpack.c.bf16 %v736_v7, %v736_v7 }
 0x2e7   : > { %763 = vmatpush.msrb.mxu0 %v735_v1  ;;  %802 = vmatpush.msra.mxu2 %v735_v1 }
 0x2e9   : > { %764 = vmatpush.msrb.mxu0 %v734_v63  ;;  %803 = vmatpush.msra.mxu2 %v734_v63 }
 0x2ea   : > { %1134 = vmatmul.msk.f32.vlgmr.msrb.gmra.mxu0 %vm550_vm1, %v737_v8  ;;  %1140 = vmatmul.msk.f32.vlgmr.msra.gmra.mxu2 %vm550_vm1, %v1137_v9 }
 0x2eb   : > { %930 = vmatpush.bf16.msra.mxu0 %v1196_v17 }
 0x2ef   : > { %1156 = vmatmul.msk.bf16.gmra.mxu3 %vm515_vm0, %v826_v10  ;;  %931 = vmatpush.bf16.msra.mxu0 %v1195_v18 }
 0x2f2   : > { %1135 = vmatmul.msk.f32.gmra.mxu0 %vm550_vm1, %v738_v11  ;;  %1141 = vmatmul.msk.f32.gmra.mxu2 %vm550_vm1, %v1138_v12 }
 0x2fa   : > { %1136 = vmatmul.msk.f32.gmra.mxu0 %vm550_vm1, %v739_v13  ;;  %1142 = vmatmul.msk.f32.gmra.mxu2 %vm550_vm1, %v1139_v14 }
 0x362   : > { %v854_v19 = vpop.f32.mrf.mxu3 }
 0x367   : > { %v766_v20 = vpop.f32.mrf.mxu0 }
 0x36a   : > { %v856_v21 = vpop.f32.mrf.mxu3 }
 0x36d   : > { %v805_v22 = vpop.f32.mrf.mxu2 }
 0x36f   : > { %v769_v23 = vpop.f32.mrf.mxu0 }
 0x370   : > { %v818_v24 = vpack.c.bf16 %v769_v23, %v766_v20 }
 0x372   : > { %v859_v25 = vpop.f32.mrf.mxu3  ;;  %1165 = vmatmul.msk.bf16.vlgmr.msra.gmra.mxu1 %vm515_vm0, %v818_v24 }
 0x375   : > { %v808_v26 = vpop.f32.mrf.mxu2 }
 0x376   : > { %v904_v27 = vpack.c.bf16 %v808_v26, %v805_v22 }
 0x377   : > { %v772_v29 = vpop.f32.mrf.mxu0 }
 0x378   : > { %1179 = vmatmul.msk.bf16.vlgmr.msra.gmra.mxu0 %vm515_vm0, %v904_v27  ;;  %v819_v30 = vpack.c.bf16 %v772_v29, %v772_v29 }
 0x37a   : > { %v861_v28 = vpop.f32.mrf.mxu3 }
 0x37d   : > { %v811_v31 = vpop.f32.mrf.mxu2 }
 0x37e   : > { %v905_v32 = vpack.c.bf16 %v811_v31, %v811_v31 }
 0x382   : > { %1166 = vmatmul.msk.bf16.gmra.mxu1 %vm515_vm0, %v819_v30 }
 0x388   : > { %1180 = vmatmul.msk.bf16.gmra.mxu0 %vm515_vm0, %v905_v32 }
 0x3ef   : > { %v890_v33 = vpop.f32.mrf.mxu1 }
 0x3f0   : > { %v891_v34 = vadd.f32 %v890_v33, %v854_v19 }
 0x3f5   : > { %v933_v35 = vpop.f32.mrf.mxu0 }
 0x3f6   : > { %v942_v37 = vadd.f32 %v933_v35, %v891_v34 }
 0x3f7   : > { %v892_v38 = vpop.f32.mrf.mxu1 }
 0x3f8   : > { %v948_v39 = vadd.f32 %v945_v36, %v942_v37  ;;  %v893_v40 = vadd.f32 %v892_v38, %v856_v21 }
 0x3fa   : > { %952 = vst.msk [vmem:[%s486_s24] sm:$0xff] %vm951_vm3, %v948_v39 }
 0x3fd   : > { %v935_v41 = vpop.f32.mrf.mxu0 }
 0x3fe   : > { %v943_v43 = vadd.f32 %v935_v41, %v893_v40 }
 0x3ff   : > { %v895_v44 = vpop.f32.mrf.mxu1 }
 0x400   : > { %v949_v45 = vadd.f32 %v946_v42, %v943_v43  ;;  %v896_v46 = vadd.f32 %v895_v44, %v859_v25 }
 0x402   : > { %953 = vst.msk [vmem:[%s486_s24 + $0x8] sm:$0xff] %vm951_vm3, %v949_v45 }
 0x405   : > { %v938_v47 = vpop.f32.mrf.mxu0 }
 0x406   : > { %v944_v49 = vadd.f32 %v938_v47, %v896_v46 }
 0x407   : > { %v897_v50 = vpop.f32.mrf.mxu1 }
 0x408   : > { %v950_v51 = vadd.f32 %v947_v48, %v944_v49 }
 0x40a   : > { %954 = vst.msk [vmem:[%s486_s24 + $0x10] sm:$0xff] %vm951_vm3, %v950_v51 }
 0x40d   : > { %v940_v52 = vpop.f32.mrf.mxu0 }
 0x40e PF: > { %s23_s21 = sadd.s32 1, %s1215_s21  }
 0x40f   : > { %p20_p4 = scmp.ge.s32.totalorder %s23_s21, 4  }
 0x411   :  { %22 = sbr.rel (!%p20_p4) target bundleno = 1 (0x1), region = 118 }

</bundles_post_ra>
